<compile_context>
chip_gen: v7x
topology: tpu7x:2x2x1
jax: 0.10.0
libtpu: 0.0.40
codegen_flags: <defaults>
</compile_context>

<pallas_src>
import math
from functools import partial

import jax
import jax.numpy as jnp
from jax import lax
from jax.experimental import pallas as pl
from jax.experimental.pallas import tpu as pltpu


def _downblock_kernel(x_ref, w1_ref, sh1_ref, w2_ref, sh2_ref, weca_ref,
                      xskip_ref, xpool_ref, *, pool_size):
    """Processes block_n samples per grid step.

    x_ref     : (Nb, H, W, Cin)       input block (NHWC)
    w1_ref    : (K*Cin, Cout)         conv1 taps, BN1 scale folded in (row = t*Cin + ci)
    sh1_ref   : (1, Cout)             folded bias + BN1 shift
    w2_ref    : (K*Cout, Cout)        conv2 taps, BN2 scale folded in
    sh2_ref   : (1, Cout)             folded bias + BN2 shift
    weca_ref  : (1, k_eca)            ECA 1D conv taps (over channels)
    xskip_ref : (Nb, H, W, Cout)      output: skip tensor
    xpool_ref : (Nb, H//P, W, Cout)   output: pooled + re-gated tensor
    """
    Nb, H, W, Cin = x_ref.shape
    Cout = w1_ref.shape[1]
    k_eca = weca_ref.shape[1]
    pad_e = (k_eca - 1) // 2
    P = pool_size

    x = x_ref[...].astype(jnp.float32)

    def conv_bn_relu(inp, w_ref, sh_ref):
        nb, hh, ww, cp = inp.shape
        cq = w_ref.shape[1]
        kk = w_ref.shape[0] // cp
        half = kk // 2
        # Zero-pad along H once (hoisted); per-tap shifts are plain slices of it.
        zrows = jnp.zeros((nb, half, ww, cp), jnp.float32)
        xp = jnp.concatenate([zrows, inp, zrows], axis=1)          # (nb, hh+2*half, ww, cp)
        # im2col: tap t contributes x[h + t - half]; concat taps along the lane axis.
        taps = [xp[:, t:t + hh] for t in range(kk)]                # each (nb, hh, ww, cp)
        lhs = jnp.concatenate(taps, axis=3)                        # (nb, hh, ww, kk*cp)
        lhs = lhs.reshape(nb * hh * ww, kk * cp)                   # leading-dim merge only
        # Single fused-tap matmul (BN scale already folded into w_ref).
        y = jnp.dot(lhs, w_ref[...], preferred_element_type=jnp.float32)
        y = jnp.maximum(y + sh_ref[...], 0.0)                      # shift + ReLU epilogue (f32)
        return y.reshape(nb, hh, ww, cq)

    h = conv_bn_relu(x, w1_ref, sh1_ref)
    h = conv_bn_relu(h, w2_ref, sh2_ref)

    def eca(v):
        # Per-sample global average over (H, W), then a tiny k_eca-tap conv over the
        # channel (lane) axis done as shifted slices on the VPU -- no band matrix, no MXU.
        nb, hh, ww, cq = v.shape
        s = jnp.sum(v.reshape(nb, hh * ww, cq), axis=1)            # (nb, cq)
        avg = s * (1.0 / (hh * ww))
        if pad_e > 0:
            zc = jnp.zeros((nb, pad_e), jnp.float32)
            ap = jnp.concatenate([zc, avg, zc], axis=1)            # (nb, cq + 2*pad_e)
        else:
            ap = avg
        z = jnp.zeros((nb, cq), jnp.float32)
        for t in range(k_eca):
            z = z + weca_ref[0:1, t:t + 1] * ap[:, t:t + cq]
        gate = jax.nn.sigmoid(z)                                   # (nb, cq)
        return v * gate[:, None, None, :]

    x_skip = eca(h)
    xskip_ref[...] = x_skip.astype(xskip_ref.dtype)

    # MaxPool2d((P, 1)): split H (a non-minor dim -> no lane/sublane relayout), reduce.
    pooled = jnp.max(x_skip.reshape(Nb * (H // P), P, W, Cout), axis=1)
    pooled = pooled.reshape(Nb, H // P, W, Cout)
    xpool_ref[...] = eca(pooled).astype(xpool_ref.dtype)


def downblock_forward(x_nchw, w1f, sh1, w2f, sh2, w_eca, *, pool_size=2, block_n=2):
    """x_nchw: (N, Cin, H, W) (PyTorch layout). Returns (x, x_skip) in NCHW."""
    N, Cin, H, W = x_nchw.shape
    KCin, Cout = w1f.shape
    KCout = w2f.shape[0]
    k_eca = w_eca.shape[1]
    assert H % pool_size == 0
    block_n = max(1, min(block_n, N))
    assert N % block_n == 0, "N must be divisible by block_n"

    x_nhwc = jnp.transpose(x_nchw, (0, 2, 3, 1))
    out_dtype = x_nchw.dtype

    kernel = partial(_downblock_kernel, pool_size=pool_size)
    xskip_nhwc, xpool_nhwc = pl.pallas_call(
        kernel,
        out_shape=(
            jax.ShapeDtypeStruct((N, H, W, Cout), out_dtype),
            jax.ShapeDtypeStruct((N, H // pool_size, W, Cout), out_dtype),
        ),
        grid=(N // block_n,),
        in_specs=[
            pl.BlockSpec((block_n, H, W, Cin), lambda n: (n, 0, 0, 0)),
            pl.BlockSpec((KCin, Cout), lambda n: (0, 0)),
            pl.BlockSpec((1, Cout), lambda n: (0, 0)),
            pl.BlockSpec((KCout, Cout), lambda n: (0, 0)),
            pl.BlockSpec((1, Cout), lambda n: (0, 0)),
            pl.BlockSpec((1, k_eca), lambda n: (0, 0)),
        ],
        out_specs=(
            pl.BlockSpec((block_n, H, W, Cout), lambda n: (n, 0, 0, 0)),
            pl.BlockSpec((block_n, H // pool_size, W, Cout), lambda n: (n, 0, 0, 0)),
        ),
        compiler_params=pltpu.CompilerParams(
            dimension_semantics=("parallel",),          # batch steps are independent -> v7x dual-TC
            vmem_limit_bytes=32 * 1024 * 1024,
        ),
    )(x_nhwc, w1f, sh1, w2f, sh2, w_eca)

    x_out = jnp.transpose(xpool_nhwc, (0, 3, 1, 2))
    x_skip = jnp.transpose(xskip_nhwc, (0, 3, 1, 2))
    return x_out, x_skip


# ----------------------- parameter setup (deterministic) -----------------------

def make_params(key, in_ch, out_ch, ksize=3, eps=1e-5):
    ks = jax.random.split(key, 13)
    # conv1 / BN1
    w1_t = 0.3 * jax.random.normal(ks[0], (out_ch, in_ch, ksize, 1), jnp.float32)
    b1 = 0.1 * jax.random.normal(ks[1], (out_ch,), jnp.float32)
    g1 = 1.0 + 0.1 * jax.random.normal(ks[2], (out_ch,), jnp.float32)
    be1 = 0.1 * jax.random.normal(ks[3], (out_ch,), jnp.float32)
    m1 = 0.05 * jax.random.normal(ks[4], (out_ch,), jnp.float32)
    v1 = 0.5 + jnp.abs(jax.random.normal(ks[5], (out_ch,), jnp.float32)) * 0.5
    # conv2 / BN2
    w2_t = 0.3 * jax.random.normal(ks[6], (out_ch, out_ch, ksize, 1), jnp.float32)
    b2 = 0.1 * jax.random.normal(ks[7], (out_ch,), jnp.float32)
    g2 = 1.0 + 0.1 * jax.random.normal(ks[8], (out_ch,), jnp.float32)
    be2 = 0.1 * jax.random.normal(ks[9], (out_ch,), jnp.float32)
    m2 = 0.05 * jax.random.normal(ks[10], (out_ch,), jnp.float32)
    v2 = 0.5 + jnp.abs(jax.random.normal(ks[11], (out_ch,), jnp.float32)) * 0.5
    # ECA 1D conv (kernel size derived from channel count, as in eca_block.__init__)
    k_eca = int(abs((math.log(out_ch, 2) + 1) / 2))
    k_eca = k_eca if k_eca % 2 else k_eca + 1
    w_eca = 0.5 * jax.random.normal(ks[12], (k_eca,), jnp.float32)

    raw = (w1_t, b1, g1, be1, m1, v1, w2_t, b2, g2, be2, m2, v2, w_eca)

    # --- fold bias + BatchNorm into (weight, shift); reorder taps for the fused matmul ---
    sc1 = g1 / jnp.sqrt(v1 + eps)
    sh1 = (b1 - m1) * sc1 + be1
    w1f = jnp.transpose(w1_t[:, :, :, 0] * sc1[:, None, None], (2, 1, 0))   # (K, Cin, Cout)
    w1f = w1f.reshape(ksize * in_ch, out_ch)                                # row = t*Cin + ci

    sc2 = g2 / jnp.sqrt(v2 + eps)
    sh2 = (b2 - m2) * sc2 + be2
    w2f = jnp.transpose(w2_t[:, :, :, 0] * sc2[:, None, None], (2, 1, 0))   # (K, Cout, Cout)
    w2f = w2f.reshape(ksize * out_ch, out_ch)

    params = (w1f, sh1[None, :], w2f, sh2[None, :], w_eca[None, :])
    return params, raw


# ----------------------- pure-JAX reference (NCHW, mirrors PyTorch) -----------------------

def reference(x, raw, pool_size=2, eps=1e-5):
    (w1_t, b1, g1, be1, m1, v1, w2_t, b2, g2, be2, m2, v2, w_eca) = raw
    pad_h = w1_t.shape[2] // 2

    def conv_bn_relu(inp, w, b, g, be, m, v):
        y = lax.conv_general_dilated(inp, w, (1, 1), ((pad_h, pad_h), (0, 0)),
                                     dimension_numbers=("NCHW", "OIHW", "NCHW"))
        y = y + b[None, :, None, None]
        y = ((y - m[None, :, None, None]) / jnp.sqrt(v + eps)[None, :, None, None]
             * g[None, :, None, None] + be[None, :, None, None])
        return jnp.maximum(y, 0.0)

    h = conv_bn_relu(x, w1_t, b1, g1, be1, m1, v1)
    h = conv_bn_relu(h, w2_t, b2, g2, be2, m2, v2)

    k_eca = w_eca.shape[0]
    pad = (k_eca - 1) // 2

    def eca(v):
        N, C, H, W = v.shape
        p = jnp.mean(v, axis=(2, 3))                       # (N, C)
        pp = jnp.pad(p, ((0, 0), (pad, pad)))
        z = sum(w_eca[t] * pp[:, t:t + C] for t in range(k_eca))
        gate = jax.nn.sigmoid(z)
        return v * gate[:, :, None, None]

    x_skip = eca(h)
    N, C, H, W = x_skip.shape
    xp = jnp.max(x_skip.reshape(N, C, H // pool_size, pool_size, W), axis=3)
    xp = eca(xp)
    return xp, x_skip


if __name__ == "__main__":
    N, in_ch, out_ch, H, W = 4, 6, 32, 32, 4
    key = jax.random.PRNGKey(0)
    kx, kp = jax.random.split(key)

    x = jax.random.normal(kx, (N, in_ch, H, W), jnp.float32)   # NCHW, like PyTorch
    params, raw = make_params(kp, in_ch, out_ch)

    x_out, x_skip = downblock_forward(x, *params, pool_size=2, block_n=2)
    jax.block_until_ready((x_out, x_skip))

    x_out_ref, x_skip_ref = reference(x, raw, pool_size=2)
    assert x_out.shape == (N, out_ch, H // 2, W)
    assert x_skip.shape == (N, out_ch, H, W)
    assert jnp.allclose(x_out, x_out_ref, rtol=1e-4, atol=1e-4), "pooled output mismatch"
    assert jnp.allclose(x_skip, x_skip_ref, rtol=1e-4, atol=1e-4), "skip output mismatch"

    print("KERNEL_OK")
</pallas_src>

<mosaic_0001>
module attributes {stable_mosaic.version = 11 : i64} {
  func.func @_downblock_kernel(%arg0: i32, %arg1: memref<2x32x4x6xf32, #tpu.memory_space<vmem>>, %arg2: memref<18x32xf32, #tpu.memory_space<vmem>>, %arg3: memref<1x32xf32, #tpu.memory_space<vmem>>, %arg4: memref<96x32xf32, #tpu.memory_space<vmem>>, %arg5: memref<1x32xf32, #tpu.memory_space<vmem>>, %arg6: memref<1x3xf32, #tpu.memory_space<vmem>>, %arg7: memref<2x32x4x32xf32, #tpu.memory_space<vmem>>, %arg8: memref<2x16x4x32xf32, #tpu.memory_space<vmem>>) attributes {dimension_semantics = [#tpu.dimension_semantics<parallel>], iteration_bounds = array<i64: 2>, scalar_prefetch = 0 : i64, scratch_operands = 0 : i64, tpu.core_type = #tpu.core_type<tc>, window_params = [{transform_indices = @transform_0, window_bounds = array<i64: 2, 32, 4, 6>}, {pipeline_mode = #tpu.pipeline_mode<synchronous>, transform_indices = @transform_1, window_bounds = array<i64: 18, 32>}, {pipeline_mode = #tpu.pipeline_mode<synchronous>, transform_indices = @transform_2, window_bounds = array<i64: 1, 32>}, {pipeline_mode = #tpu.pipeline_mode<synchronous>, transform_indices = @transform_3, window_bounds = array<i64: 96, 32>}, {pipeline_mode = #tpu.pipeline_mode<synchronous>, transform_indices = @transform_4, window_bounds = array<i64: 1, 32>}, {pipeline_mode = #tpu.pipeline_mode<synchronous>, transform_indices = @transform_5, window_bounds = array<i64: 1, 3>}, {transform_indices = @transform_6, window_bounds = array<i64: 2, 32, 4, 32>}, {transform_indices = @transform_7, window_bounds = array<i64: 2, 16, 4, 32>}]} {
    %c0 = arith.constant 0 : index
    %c0_0 = arith.constant 0 : index
    %c0_1 = arith.constant 0 : index
    %c0_2 = arith.constant 0 : index
    %0 = vector.load %arg1[%c0, %c0_0, %c0_1, %c0_2] : memref<2x32x4x6xf32, #tpu.memory_space<vmem>>, vector<2x32x4x6xf32>
    %cst = arith.constant 0.000000e+00 : f32
    %1 = vector.broadcast %cst : f32 to vector<2x1x4x6xf32>
    %2 = tpu.concatenate %1, %0, %1 in 1 : vector<2x1x4x6xf32>, vector<2x32x4x6xf32>, vector<2x1x4x6xf32> -> vector<2x34x4x6xf32>
    %3 = vector.extract_strided_slice %2 {offsets = [0, 0, 0, 0], sizes = [2, 32, 4, 6], strides = [1, 1, 1, 1]} : vector<2x34x4x6xf32> to vector<2x32x4x6xf32>
    %4 = vector.extract_strided_slice %2 {offsets = [0, 1, 0, 0], sizes = [2, 32, 4, 6], strides = [1, 1, 1, 1]} : vector<2x34x4x6xf32> to vector<2x32x4x6xf32>
    %5 = vector.extract_strided_slice %2 {offsets = [0, 2, 0, 0], sizes = [2, 32, 4, 6], strides = [1, 1, 1, 1]} : vector<2x34x4x6xf32> to vector<2x32x4x6xf32>
    %6 = tpu.concatenate %3, %4, %5 in 3 : vector<2x32x4x6xf32>, vector<2x32x4x6xf32>, vector<2x32x4x6xf32> -> vector<2x32x4x18xf32>
    %7 = vector.shape_cast %6 : vector<2x32x4x18xf32> to vector<256x18xf32>
    %c0_3 = arith.constant 0 : index
    %c0_4 = arith.constant 0 : index
    %8 = vector.load %arg2[%c0_3, %c0_4] : memref<18x32xf32, #tpu.memory_space<vmem>>, vector<18x32xf32>
    %cst_5 = arith.constant dense<0.000000e+00> : vector<256x32xf32>
    %9 = tpu.matmul %7, %8, %cst_5 {dimension_numbers = #tpu.dot_dimension_numbers<[1], [0], [0], [1], [0, 0, 1, 1], [], []>} : vector<256x18xf32>, vector<18x32xf32>, vector<256x32xf32> -> vector<256x32xf32>
    %c0_6 = arith.constant 0 : index
    %c0_7 = arith.constant 0 : index
    %10 = vector.load %arg3[%c0_6, %c0_7] : memref<1x32xf32, #tpu.memory_space<vmem>>, vector<1x32xf32>
    %11 = vector.broadcast %10 : vector<1x32xf32> to vector<256x32xf32>
    %12 = arith.addf %9, %11 : vector<256x32xf32>
    %cst_8 = arith.constant 0.000000e+00 : f32
    %13 = vector.broadcast %cst_8 : f32 to vector<256x32xf32>
    %14 = arith.maximumf %12, %13 : vector<256x32xf32>
    %15 = vector.shape_cast %14 : vector<256x32xf32> to vector<2x32x4x32xf32>
    %cst_9 = arith.constant 0.000000e+00 : f32
    %16 = vector.broadcast %cst_9 : f32 to vector<2x1x4x32xf32>
    %17 = tpu.concatenate %16, %15, %16 in 1 : vector<2x1x4x32xf32>, vector<2x32x4x32xf32>, vector<2x1x4x32xf32> -> vector<2x34x4x32xf32>
    %18 = vector.extract_strided_slice %17 {offsets = [0, 0, 0, 0], sizes = [2, 32, 4, 32], strides = [1, 1, 1, 1]} : vector<2x34x4x32xf32> to vector<2x32x4x32xf32>
    %19 = vector.extract_strided_slice %17 {offsets = [0, 1, 0, 0], sizes = [2, 32, 4, 32], strides = [1, 1, 1, 1]} : vector<2x34x4x32xf32> to vector<2x32x4x32xf32>
    %20 = vector.extract_strided_slice %17 {offsets = [0, 2, 0, 0], sizes = [2, 32, 4, 32], strides = [1, 1, 1, 1]} : vector<2x34x4x32xf32> to vector<2x32x4x32xf32>
    %21 = tpu.concatenate %18, %19, %20 in 3 : vector<2x32x4x32xf32>, vector<2x32x4x32xf32>, vector<2x32x4x32xf32> -> vector<2x32x4x96xf32>
    %22 = vector.shape_cast %21 : vector<2x32x4x96xf32> to vector<256x96xf32>
    %c0_10 = arith.constant 0 : index
    %c0_11 = arith.constant 0 : index
    %23 = vector.load %arg4[%c0_10, %c0_11] : memref<96x32xf32, #tpu.memory_space<vmem>>, vector<96x32xf32>
    %cst_12 = arith.constant dense<0.000000e+00> : vector<256x32xf32>
    %24 = tpu.matmul %22, %23, %cst_12 {dimension_numbers = #tpu.dot_dimension_numbers<[1], [0], [0], [1], [0, 0, 1, 1], [], []>} : vector<256x96xf32>, vector<96x32xf32>, vector<256x32xf32> -> vector<256x32xf32>
    %c0_13 = arith.constant 0 : index
    %c0_14 = arith.constant 0 : index
    %25 = vector.load %arg5[%c0_13, %c0_14] : memref<1x32xf32, #tpu.memory_space<vmem>>, vector<1x32xf32>
    %26 = vector.broadcast %25 : vector<1x32xf32> to vector<256x32xf32>
    %27 = arith.addf %24, %26 : vector<256x32xf32>
    %cst_15 = arith.constant 0.000000e+00 : f32
    %28 = vector.broadcast %cst_15 : f32 to vector<256x32xf32>
    %29 = arith.maximumf %27, %28 : vector<256x32xf32>
    %30 = vector.shape_cast %29 : vector<256x32xf32> to vector<2x32x4x32xf32>
    %31 = vector.shape_cast %30 : vector<2x32x4x32xf32> to vector<2x128x32xf32>
    %cst_16 = arith.constant dense<0.000000e+00> : vector<2x32xf32>
    %32 = vector.multi_reduction <add>, %31, %cst_16 [1] : vector<2x128x32xf32> to vector<2x32xf32>
    %cst_17 = arith.constant 7.812500e-03 : f32
    %33 = vector.broadcast %cst_17 : f32 to vector<2x32xf32>
    %34 = arith.mulf %32, %33 : vector<2x32xf32>
    %cst_18 = arith.constant 0.000000e+00 : f32
    %35 = vector.broadcast %cst_18 : f32 to vector<2x1xf32>
    %36 = tpu.concatenate %35, %34, %35 in 1 : vector<2x1xf32>, vector<2x32xf32>, vector<2x1xf32> -> vector<2x34xf32>
    %cst_19 = arith.constant 0.000000e+00 : f32
    %37 = vector.broadcast %cst_19 : f32 to vector<2x32xf32>
    %c0_20 = arith.constant 0 : index
    %c0_21 = arith.constant 0 : index
    %38 = vector.load %arg6[%c0_20, %c0_21] : memref<1x3xf32, #tpu.memory_space<vmem>>, vector<1x1xf32>
    %39 = vector.extract_strided_slice %36 {offsets = [0, 0], sizes = [2, 32], strides = [1, 1]} : vector<2x34xf32> to vector<2x32xf32>
    %40 = vector.broadcast %38 : vector<1x1xf32> to vector<2x32xf32>
    %41 = arith.mulf %40, %39 : vector<2x32xf32>
    %42 = arith.addf %37, %41 : vector<2x32xf32>
    %c0_22 = arith.constant 0 : index
    %c1 = arith.constant 1 : index
    %43 = vector.load %arg6[%c0_22, %c1] : memref<1x3xf32, #tpu.memory_space<vmem>>, vector<1x1xf32>
    %44 = vector.extract_strided_slice %36 {offsets = [0, 1], sizes = [2, 32], strides = [1, 1]} : vector<2x34xf32> to vector<2x32xf32>
    %45 = vector.broadcast %43 : vector<1x1xf32> to vector<2x32xf32>
    %46 = arith.mulf %45, %44 : vector<2x32xf32>
    %47 = arith.addf %42, %46 : vector<2x32xf32>
    %c0_23 = arith.constant 0 : index
    %c2 = arith.constant 2 : index
    %48 = vector.load %arg6[%c0_23, %c2] : memref<1x3xf32, #tpu.memory_space<vmem>>, vector<1x1xf32>
    %49 = vector.extract_strided_slice %36 {offsets = [0, 2], sizes = [2, 32], strides = [1, 1]} : vector<2x34xf32> to vector<2x32xf32>
    %50 = vector.broadcast %48 : vector<1x1xf32> to vector<2x32xf32>
    %51 = arith.mulf %50, %49 : vector<2x32xf32>
    %52 = arith.addf %47, %51 : vector<2x32xf32>
    %53 = arith.negf %52 : vector<2x32xf32>
    %54 = math.exp %53 : vector<2x32xf32>
    %cst_24 = arith.constant 1.000000e+00 : f32
    %55 = vector.broadcast %cst_24 : f32 to vector<2x32xf32>
    %56 = arith.addf %55, %54 : vector<2x32xf32>
    %57 = arith.divf %55, %56 : vector<2x32xf32>
    %58 = vector.shape_cast %57 : vector<2x32xf32> to vector<2x1x1x32xf32>
    %59 = vector.broadcast %58 : vector<2x1x1x32xf32> to vector<2x32x4x32xf32>
    %60 = arith.mulf %30, %59 : vector<2x32x4x32xf32>
    %c0_25 = arith.constant 0 : index
    %c0_26 = arith.constant 0 : index
    %c0_27 = arith.constant 0 : index
    %c0_28 = arith.constant 0 : index
    %61 = vector.load %arg7[%c0_25, %c0_26, %c0_27, %c0_28] : memref<2x32x4x32xf32, #tpu.memory_space<vmem>>, vector<2x32x4x32xf32>
    tpu.vector_store %arg7[%c0_25, %c0_26, %c0_27, %c0_28], %60 {strides = array<i32>} : memref<2x32x4x32xf32, #tpu.memory_space<vmem>>, vector<2x32x4x32xf32>,
    %62 = vector.shape_cast %60 : vector<2x32x4x32xf32> to vector<32x2x4x32xf32>
    %cst_29 = arith.constant dense<0xFF800000> : vector<32x4x32xf32>
    %63 = vector.multi_reduction <maximumf>, %62, %cst_29 [1] : vector<32x2x4x32xf32> to vector<32x4x32xf32>
    %64 = vector.shape_cast %63 : vector<32x4x32xf32> to vector<2x16x4x32xf32>
    %65 = vector.shape_cast %64 : vector<2x16x4x32xf32> to vector<2x64x32xf32>
    %cst_30 = arith.constant dense<0.000000e+00> : vector<2x32xf32>
    %66 = vector.multi_reduction <add>, %65, %cst_30 [1] : vector<2x64x32xf32> to vector<2x32xf32>
    %cst_31 = arith.constant 1.562500e-02 : f32
    %67 = vector.broadcast %cst_31 : f32 to vector<2x32xf32>
    %68 = arith.mulf %66, %67 : vector<2x32xf32>
    %cst_32 = arith.constant 0.000000e+00 : f32
    %69 = vector.broadcast %cst_32 : f32 to vector<2x1xf32>
    %70 = tpu.concatenate %69, %68, %69 in 1 : vector<2x1xf32>, vector<2x32xf32>, vector<2x1xf32> -> vector<2x34xf32>
    %cst_33 = arith.constant 0.000000e+00 : f32
    %71 = vector.broadcast %cst_33 : f32 to vector<2x32xf32>
    %c0_34 = arith.constant 0 : index
    %c0_35 = arith.constant 0 : index
    %72 = vector.load %arg6[%c0_34, %c0_35] : memref<1x3xf32, #tpu.memory_space<vmem>>, vector<1x1xf32>
    %73 = vector.extract_strided_slice %70 {offsets = [0, 0], sizes = [2, 32], strides = [1, 1]} : vector<2x34xf32> to vector<2x32xf32>
    %74 = vector.broadcast %72 : vector<1x1xf32> to vector<2x32xf32>
    %75 = arith.mulf %74, %73 : vector<2x32xf32>
    %76 = arith.addf %71, %75 : vector<2x32xf32>
    %c0_36 = arith.constant 0 : index
    %c1_37 = arith.constant 1 : index
    %77 = vector.load %arg6[%c0_36, %c1_37] : memref<1x3xf32, #tpu.memory_space<vmem>>, vector<1x1xf32>
    %78 = vector.extract_strided_slice %70 {offsets = [0, 1], sizes = [2, 32], strides = [1, 1]} : vector<2x34xf32> to vector<2x32xf32>
    %79 = vector.broadcast %77 : vector<1x1xf32> to vector<2x32xf32>
    %80 = arith.mulf %79, %78 : vector<2x32xf32>
    %81 = arith.addf %76, %80 : vector<2x32xf32>
    %c0_38 = arith.constant 0 : index
    %c2_39 = arith.constant 2 : index
    %82 = vector.load %arg6[%c0_38, %c2_39] : memref<1x3xf32, #tpu.memory_space<vmem>>, vector<1x1xf32>
    %83 = vector.extract_strided_slice %70 {offsets = [0, 2], sizes = [2, 32], strides = [1, 1]} : vector<2x34xf32> to vector<2x32xf32>
    %84 = vector.broadcast %82 : vector<1x1xf32> to vector<2x32xf32>
    %85 = arith.mulf %84, %83 : vector<2x32xf32>
    %86 = arith.addf %81, %85 : vector<2x32xf32>
    %87 = arith.negf %86 : vector<2x32xf32>
    %88 = math.exp %87 : vector<2x32xf32>
    %cst_40 = arith.constant 1.000000e+00 : f32
    %89 = vector.broadcast %cst_40 : f32 to vector<2x32xf32>
    %90 = arith.addf %89, %88 : vector<2x32xf32>
    %91 = arith.divf %89, %90 : vector<2x32xf32>
    %92 = vector.shape_cast %91 : vector<2x32xf32> to vector<2x1x1x32xf32>
    %93 = vector.broadcast %92 : vector<2x1x1x32xf32> to vector<2x16x4x32xf32>
    %94 = arith.mulf %64, %93 : vector<2x16x4x32xf32>
    %c0_41 = arith.constant 0 : index
    %c0_42 = arith.constant 0 : index
    %c0_43 = arith.constant 0 : index
    %c0_44 = arith.constant 0 : index
    %95 = vector.load %arg8[%c0_41, %c0_42, %c0_43, %c0_44] : memref<2x16x4x32xf32, #tpu.memory_space<vmem>>, vector<2x16x4x32xf32>
    tpu.vector_store %arg8[%c0_41, %c0_42, %c0_43, %c0_44], %94 {strides = array<i32>} : memref<2x16x4x32xf32, #tpu.memory_space<vmem>>, vector<2x16x4x32xf32>,
    return
  }
  func.func @transform_0(%arg0: i32) -> (i32, i32, i32, i32) {
    %c0_i32 = arith.constant 0 : i32
    %c0_i32_0 = arith.constant 0 : i32
    %c0_i32_1 = arith.constant 0 : i32
    %c0_i32_2 = arith.constant 0 : i32
    return %arg0, %c0_i32, %c0_i32_0, %c0_i32_1 : i32, i32, i32, i32
  }
  func.func @transform_1(%arg0: i32) -> (i32, i32) {
    %c0_i32 = arith.constant 0 : i32
    %c0_i32_0 = arith.constant 0 : i32
    %c0_i32_1 = arith.constant 0 : i32
    return %c0_i32, %c0_i32_0 : i32, i32
  }
  func.func @transform_2(%arg0: i32) -> (i32, i32) {
    %c0_i32 = arith.constant 0 : i32
    %c0_i32_0 = arith.constant 0 : i32
    %c0_i32_1 = arith.constant 0 : i32
    return %c0_i32, %c0_i32_0 : i32, i32
  }
  func.func @transform_3(%arg0: i32) -> (i32, i32) {
    %c0_i32 = arith.constant 0 : i32
    %c0_i32_0 = arith.constant 0 : i32
    %c0_i32_1 = arith.constant 0 : i32
    return %c0_i32, %c0_i32_0 : i32, i32
  }
  func.func @transform_4(%arg0: i32) -> (i32, i32) {
    %c0_i32 = arith.constant 0 : i32
    %c0_i32_0 = arith.constant 0 : i32
    %c0_i32_1 = arith.constant 0 : i32
    return %c0_i32, %c0_i32_0 : i32, i32
  }
  func.func @transform_5(%arg0: i32) -> (i32, i32) {
    %c0_i32 = arith.constant 0 : i32
    %c0_i32_0 = arith.constant 0 : i32
    %c0_i32_1 = arith.constant 0 : i32
    return %c0_i32, %c0_i32_0 : i32, i32
  }
  func.func @transform_6(%arg0: i32) -> (i32, i32, i32, i32) {
    %c0_i32 = arith.constant 0 : i32
    %c0_i32_0 = arith.constant 0 : i32
    %c0_i32_1 = arith.constant 0 : i32
    %c0_i32_2 = arith.constant 0 : i32
    return %arg0, %c0_i32, %c0_i32_0, %c0_i32_1 : i32, i32, i32, i32
  }
  func.func @transform_7(%arg0: i32) -> (i32, i32, i32, i32) {
    %c0_i32 = arith.constant 0 : i32
    %c0_i32_0 = arith.constant 0 : i32
    %c0_i32_1 = arith.constant 0 : i32
    %c0_i32_2 = arith.constant 0 : i32
    return %arg0, %c0_i32, %c0_i32_0, %c0_i32_1 : i32, i32, i32, i32
  }
}

</mosaic_0001>

<bundles_post_ra>
// kernel: tpu_custom_call.1
= control target key start
LH: loop header
LB: loop body
LE: loop exit
PB: predicated region body
PF: predicated region fallthrough
CT: control target
= control target key end

     0   :  { %13 = vsyncpa [#allocation3], 0  ;;  %s6536_s0 = inlined_call_operand.vmem [shape: f32[4,32,4,6], index: 0, kind: input, shape index: {}]   ;;  %s6537_s1 = inlined_call_operand.vmem [shape: f32[18,32], index: 1, kind: input, shape index: {}]   ;;  %s6538_s2 = inlined_call_operand.vmem [shape: f32[1,32], index: 2, kind: input, shape index: {}]   ;;  %s6539_s3 = inlined_call_operand.vmem [shape: f32[96,32], index: 3, kind: input, shape index: {}]   ;;  %s6540_s4 = inlined_call_operand.vmem [shape: f32[1,32], index: 4, kind: input, shape index: {}]   ;;  %s6541_s5 = inlined_call_operand.vmem [shape: f32[1,3], index: 5, kind: input, shape index: {}]   ;;  %s6542_s6 = inlined_call_operand.hbm [shape: f32[4,32,4,32], index: 6, kind: output, shape index: {0}]   ;;  %s6543_s7 = inlined_call_operand.hbm [shape: f32[4,16,4,32], index: 7, kind: output, shape index: {1}]  }
   0x1   :  { %15 = vsyncpa [#allocation3 + $0x1], 0 }
   0x2   :  { %16 = vsyncpa [#allocation5], 0 }
   0x3   :  { %18 = vsyncpa [#allocation5 + $0x1], 0  ;;  %s3832_s24 = smov 0   ;;  %s3834_s25 = smov 0  }
   0x4   :  { %s3836_s26 = smov 0   ;;  %s3838_s27 = smov 0  }
   0x5 LB: > { %s3853_s28 = sadd.s32 4294967295, %s3775_s27   ;;  %s3270_s29 = sadd.s32 4294967294, %s3775_s27   ;;  %s3775_s27 = sphi %s3838_s27, %s6606_s27   ;;  %s3771_s26 = sphi %s3836_s26, %s6605_s26   ;;  %s3767_s25 = sphi %s3834_s25, %s6604_s25   ;;  %s3763_s24 = sphi %s3832_s24, %s6603_s24  }
   0x6   : > { %s3857_s30 = sadd.s32 1, %s3775_s27   ;;  %s162_s8 = sadd.s32 1, %s3771_s26 }
   0x7   : > { %s159_s9 = ssub.s32 %s3775_s27, %s3857_s30  ;;  %p172_p0 = scmp.ne.s32.totalorder %s3771_s26, %s3767_s25 }
   0x8   : > { %p160_p1 = scmp.eq.s32.totalorder %s159_s9, 0  ;;  %p173_p2 = scmp.eq.s32.totalorder %s3853_s28, 1 }
   0x9   : > { %p178_p3 = scmp.ne.s32.totalorder %s3767_s25, %s3763_s24  ;;  %p179_p4 = scmp.eq.s32.totalorder %s3270_s29, 1 }
   0xa   : > { %s3868_s10 = scalar_select %p160_p1, %s3771_s26, %s162_s8  }
   0xb   : > { %p3870_p5 = por %p173_p2, %p172_p0  ;;  %p3874_p6 = por %p179_p4, %p178_p3 }
   0xc   : > { %p3273_p7 = scmp.ge.s32.totalorder %s3775_s27, 1  ;;  %p248_p8 = scmp.lt.s32.totalorder %s3775_s27, 3 }
   0xe   : > { %p249_p9 = pnand %p3273_p7, %p248_p8 }
  0x10   : > { %252 = sbr.rel (%p249_p9) target bundleno = 1665 (0x681), region = 44 }
  0x17   : > { %s3276_s13 = sshll.u32 %s3853_s28, 1  ;;  %v935_v0 = vld [vmem:[%s6537_s1] sm:$0xff]  ;;  %v936_v1 = vld [vmem:[%s6537_s1 + $0x8] sm:$0xff]  ;;  %s3777_s22 = smov 6   ;;  %vm1106_vm0 = vcmask 1041408   ;;  %vm805_vm1 = vcmask 48128  }
  0x18   : > { %p287_p10 = scmp.lt.s32.totalorder %s3276_s13, 3  ;;  %v3570_v2 = vpack.c.bf16 %v936_v1, %v935_v0  ;;  %s3778_s23 = smov 12   ;;  %v937_v8 = vld [vmem:[%s6537_s1 + $0x10] sm:$0x3]  ;;  %vm870_vm2 = vcmask 97280   ;;  %vm1041_vm3 = vcmask 146432  }
  0x19   : > { %v3779_v46 = vmov 0.0   ;;  %s3780_s9 = smov 64   ;;  %vm1842_vm4 = vcmask 261120   ;;  %vm1907_vm5 = vcmask 523264   ;;  %vm2087_vm6 = vcmask 785408   ;;  %s3786_s19 = smov 127  }
  0x1a   : > { %s6608_s13 = smov (!%p287_p10, %s3276_s13), 3  ;;  %3571 = vmatprep.subr.bf16.mxu0 %v3570_v2  ;;  %vm2583_vm7 = vcmask 1041409   ;;  %vm2588_vm8 = vcmask 7168   ;;  %vm2590_vm9 = vcmask 269312   ;;  %s3787_s20 = smov 126   ;;  %vm2727_vm10 = vcmask 257024  }
  0x1b   : > { %s3360_s18 = sshll.u32 %s6608_s13, 7  ;;  %3573 = vmatpush3.bf16.msra.mxu0 %v3570_v2  ;;  %s3362_s29 = sshll.u32 %s3853_s28, 12 }
  0x1c   : > { %s3890_s21 = scalar_lea.vmem %s6536_s0, %s3360_s18  ;;  %3448 = vmatprep.subr.msk.mxu0 %vm1106_vm0, %v937_v8  ;;  %s3785_s18 = smov 1  }
  0x1d   : > { %v3893_v3 = vld [vmem:[%s3890_s21 + $0x8] sm:$0xf]  ;;  %v3896_v4 = vld [vmem:[%s3890_s21] sm:$0xf]  ;;  %v3903_v5 = vld [vmem:[%s3890_s21 + $0xc] sm:$0xf]  ;;  %s6348_s15 = scalar_lea.hbm %s6542_s6, %s3362_s29 }
  0x1e   : > { %427 = vrot.lane.b32.xlu1 %v3893_v3, %s3777_s22  ;;  %423 = vrot.lane.b32.xlu0 %v3896_v4, %s3777_s22  ;;  %v3906_v6 = vld [vmem:[%s3890_s21 + $0x4] sm:$0xf]  ;;  %v3917_v7 = vld [vmem:[%s3890_s21 + $0x10] sm:$0xf] }
  0x1f   : > { %v3927_v9 = vld [vmem:[%s3890_s21 + $0x14] sm:$0xf]  ;;  %3449 = vmatpush3.msk.msra.mxu0 %vm1106_vm0, %v937_v8  ;;  %v3934_v10 = vld [vmem:[%s3890_s21 + $0x1c] sm:$0xf]  ;;  %v3937_v11 = vld [vmem:[%s3890_s21 + $0x18] sm:$0xf] }
  0x20   : > { %v3948_v12 = vld [vmem:[%s3890_s21 + $0x20] sm:$0xf]  ;;  %v3955_v13 = vld [vmem:[%s3890_s21 + $0x24] sm:$0xf]  ;;  %v3962_v14 = vld [vmem:[%s3890_s21 + $0x2c] sm:$0xf] }
  0x21   : > { %v3965_v15 = vld [vmem:[%s3890_s21 + $0x28] sm:$0xf]  ;;  %v3976_v16 = vld [vmem:[%s3890_s21 + $0x30] sm:$0xf]  ;;  %v3983_v17 = vld [vmem:[%s3890_s21 + $0x34] sm:$0xf] }
  0x22   : > { %429 = vrot.lane.b32.xlu1 %v3903_v5, %s3777_s22  ;;  %425 = vrot.lane.b32.xlu0 %v3906_v6, %s3777_s22  ;;  %v3990_v18 = vld [vmem:[%s3890_s21 + $0x3c] sm:$0xf]  ;;  %v3993_v19 = vld [vmem:[%s3890_s21 + $0x38] sm:$0xf] }
  0x23   : > { %v4004_v20 = vld [vmem:[%s3890_s21 + $0x40] sm:$0xf]  ;;  %v4011_v21 = vld [vmem:[%s3890_s21 + $0x44] sm:$0xf]  ;;  %v4018_v22 = vld [vmem:[%s3890_s21 + $0x4c] sm:$0xf] }
  0x24   : > { %v4021_v23 = vld [vmem:[%s3890_s21 + $0x48] sm:$0xf]  ;;  %v4032_v24 = vld [vmem:[%s3890_s21 + $0x50] sm:$0xf]  ;;  %v4039_v25 = vld [vmem:[%s3890_s21 + $0x54] sm:$0xf] }
  0x25   : > { %v4046_v26 = vld [vmem:[%s3890_s21 + $0x5c] sm:$0xf]  ;;  %v4049_v27 = vld [vmem:[%s3890_s21 + $0x58] sm:$0xf]  ;;  %v4060_v28 = vld [vmem:[%s3890_s21 + $0x60] sm:$0xf] }
  0x26   : > { %618 = vrot.lane.b32.xlu1 %v3893_v3, %s3778_s23  ;;  %616 = vrot.lane.b32.xlu0 %v3906_v6, %s3778_s23  ;;  %v4067_v29 = vld [vmem:[%s3890_s21 + $0x64] sm:$0xf]  ;;  %v4074_v30 = vld [vmem:[%s3890_s21 + $0x6c] sm:$0xf] }
  0x27   : > { %v4077_v31 = vld [vmem:[%s3890_s21 + $0x68] sm:$0xf]  ;;  %v4088_v32 = vld [vmem:[%s3890_s21 + $0x70] sm:$0xf]  ;;  %v4095_v33 = vld [vmem:[%s3890_s21 + $0x74] sm:$0xf] }
  0x28   : > { %v326_v34 = vld [vmem:[%s3890_s21 + $0x7c] sm:$0xf]  ;;  %v4103_v35 = vld [vmem:[%s3890_s21 + $0x78] sm:$0xf]  ;;  %v4121_v48 = vld [vmem:[%s3890_s21 + $0x84] sm:$0xf] }
  0x29   : > { %v4124_v49 = vld [vmem:[%s3890_s21 + $0x80] sm:$0xf]  ;;  %v4138_v57 = vld [vmem:[%s3890_s21 + $0x8c] sm:$0xf]  ;;  %v4141_v58 = vld [vmem:[%s3890_s21 + $0x88] sm:$0xf] }
  0x2a   : > { %622 = vrot.lane.b32.xlu1 %v3917_v7, %s3778_s23  ;;  %620 = vrot.lane.b32.xlu0 %v3903_v5, %s3778_s23  ;;  %v4153_v63 = vld [vmem:[%s3890_s21 + $0x90] sm:$0xf] }
  0x2e   : > { %433 = vrot.lane.b32.xlu1 %v3927_v9, %s3777_s22  ;;  %431 = vrot.lane.b32.xlu0 %v3917_v7, %s3777_s22 }
  0x32   : > { %437 = vrot.lane.b32.xlu1 %v3934_v10, %s3777_s22  ;;  %435 = vrot.lane.b32.xlu0 %v3937_v11, %s3777_s22 }
  0x36   : > { %626 = vrot.lane.b32.xlu1 %v3937_v11, %s3778_s23  ;;  %624 = vrot.lane.b32.xlu0 %v3927_v9, %s3778_s23 }
  0x3a   : > { %630 = vrot.lane.b32.xlu1 %v3948_v12, %s3778_s23  ;;  %628 = vrot.lane.b32.xlu0 %v3934_v10, %s3778_s23 }
  0x3e   : > { %441 = vrot.lane.b32.xlu1 %v3955_v13, %s3777_s22  ;;  %439 = vrot.lane.b32.xlu0 %v3948_v12, %s3777_s22 }
  0x42   : > { %445 = vrot.lane.b32.xlu1 %v3962_v14, %s3777_s22  ;;  %443 = vrot.lane.b32.xlu0 %v3965_v15, %s3777_s22 }
  0x46   : > { %634 = vrot.lane.b32.xlu1 %v3965_v15, %s3778_s23  ;;  %632 = vrot.lane.b32.xlu0 %v3955_v13, %s3778_s23 }
  0x4a   : > { %638 = vrot.lane.b32.xlu1 %v3976_v16, %s3778_s23  ;;  %636 = vrot.lane.b32.xlu0 %v3962_v14, %s3778_s23 }
  0x4e   : > { %449 = vrot.lane.b32.xlu1 %v3983_v17, %s3777_s22  ;;  %447 = vrot.lane.b32.xlu0 %v3976_v16, %s3777_s22 }
  0x52   : > { %453 = vrot.lane.b32.xlu1 %v3990_v18, %s3777_s22  ;;  %451 = vrot.lane.b32.xlu0 %v3993_v19, %s3777_s22 }
  0x56   : > { %642 = vrot.lane.b32.xlu1 %v3993_v19, %s3778_s23  ;;  %640 = vrot.lane.b32.xlu0 %v3983_v17, %s3778_s23 }
  0x5a   : > { %646 = vrot.lane.b32.xlu1 %v4004_v20, %s3778_s23  ;;  %644 = vrot.lane.b32.xlu0 %v3990_v18, %s3778_s23 }
  0x5e   : > { %457 = vrot.lane.b32.xlu1 %v4011_v21, %s3777_s22  ;;  %455 = vrot.lane.b32.xlu0 %v4004_v20, %s3777_s22 }
  0x62   : > { %461 = vrot.lane.b32.xlu1 %v4018_v22, %s3777_s22  ;;  %459 = vrot.lane.b32.xlu0 %v4021_v23, %s3777_s22 }
  0x66   : > { %650 = vrot.lane.b32.xlu1 %v4021_v23, %s3778_s23  ;;  %648 = vrot.lane.b32.xlu0 %v4011_v21, %s3778_s23 }
  0x6a   : > { %654 = vrot.lane.b32.xlu1 %v4032_v24, %s3778_s23  ;;  %652 = vrot.lane.b32.xlu0 %v4018_v22, %s3778_s23 }
  0x6e   : > { %465 = vrot.lane.b32.xlu1 %v4039_v25, %s3777_s22  ;;  %463 = vrot.lane.b32.xlu0 %v4032_v24, %s3777_s22 }
  0x72   : > { %469 = vrot.lane.b32.xlu1 %v4046_v26, %s3777_s22  ;;  %467 = vrot.lane.b32.xlu0 %v4049_v27, %s3777_s22 }
  0x76   : > { %658 = vrot.lane.b32.xlu1 %v4049_v27, %s3778_s23  ;;  %656 = vrot.lane.b32.xlu0 %v4039_v25, %s3778_s23 }
  0x7a   : > { %662 = vrot.lane.b32.xlu1 %v4060_v28, %s3778_s23  ;;  %660 = vrot.lane.b32.xlu0 %v4046_v26, %s3778_s23 }
  0x7e   : > { %473 = vrot.lane.b32.xlu1 %v4067_v29, %s3777_s22  ;;  %471 = vrot.lane.b32.xlu0 %v4060_v28, %s3777_s22 }
  0x82   : > { %477 = vrot.lane.b32.xlu1 %v4074_v30, %s3777_s22  ;;  %475 = vrot.lane.b32.xlu0 %v4077_v31, %s3777_s22 }
  0x86   : > { %666 = vrot.lane.b32.xlu1 %v4077_v31, %s3778_s23  ;;  %664 = vrot.lane.b32.xlu0 %v4067_v29, %s3778_s23 }
  0x8a   : > { %670 = vrot.lane.b32.xlu1 %v4088_v32, %s3778_s23  ;;  %668 = vrot.lane.b32.xlu0 %v4074_v30, %s3778_s23 }
  0x8e   : > { %481 = vrot.lane.b32.xlu1 %v4095_v33, %s3777_s22  ;;  %479 = vrot.lane.b32.xlu0 %v4088_v32, %s3777_s22 }
  0x90   : > { %v428_v36 = vpop.permute.xlu1 %427  ;;  %v424_v37 = vpop.permute.xlu0 %423 }
  0x91   : > { %v806_v40 = vsel %vm805_vm1, 0.0, %v424_v37  ;;  %v808_v50 = vsel %vm805_vm1, %v3906_v6, %v428_v36 }
  0x92   : > { %485 = vrot.lane.b32.xlu1 %v326_v34, %s3777_s22  ;;  %483 = vrot.lane.b32.xlu0 %v4103_v35, %s3777_s22 }
  0x94   : > { %v430_v38 = vpop.permute.xlu1 %429  ;;  %v426_v39 = vpop.permute.xlu0 %425 }
  0x95   : > { %v807_v41 = vsel %vm805_vm1, %v3896_v4, %v426_v39  ;;  %v809_v51 = vsel %vm805_vm1, %v3893_v3, %v430_v38 }
  0x96   : > { %674 = vrot.lane.b32.xlu1 %v4103_v35, %s3778_s23  ;;  %672 = vrot.lane.b32.xlu0 %v4095_v33, %s3778_s23 }
  0x98   : > { %v619_v42 = vpop.permute.xlu1 %618  ;;  %v617_v43 = vpop.permute.xlu0 %616 }
  0x99   : > { %v872_v44 = vsel %vm870_vm2, %v807_v41, %v619_v42  ;;  %v871_v45 = vsel %vm870_vm2, %v806_v40, %v617_v43  ;;  %v4183_v41 = vld [vmem:[%s3890_s21 + $0x98] sm:$0xf] }
  0x9a   : > { %678 = vrot.lane.b32.xlu1 %v3779_v46, %s3778_s23  ;;  %676 = vrot.lane.b32.xlu0 %v326_v34, %s3778_s23  ;;  %v1009_v47 = vcombine.low %v871_v45, %v872_v44  ;;  %v4166_v34 = vld [vmem:[%s3890_s21 + $0x94] sm:$0xf]  ;;  %v4195_v45 = vld [vmem:[%s3890_s21 + $0xa0] sm:$0xf] }
  0x9c   : > { %v623_v52 = vpop.permute.xlu1 %622  ;;  %3450 = vmatprep.mubr.msk.f32.mxu0 %vm1041_vm3, %v1009_v47  ;;  %v621_v53 = vpop.permute.xlu0 %620 }
  0x9d   : > { %v874_v54 = vsel %vm870_vm2, %v809_v51, %v623_v52  ;;  %v873_v55 = vsel %vm870_vm2, %v808_v50, %v621_v53 }
  0x9e   : > { %v1010_v56 = vcombine.low %v873_v55, %v874_v54  ;;  %489 = vrot.lane.b32.xlu1 %v4121_v48, %s3777_s22  ;;  %487 = vrot.lane.b32.xlu0 %v4124_v49, %s3777_s22 }
  0xa0   : > { %v434_v59 = vpop.permute.xlu1 %433  ;;  %3451 = vmatmul.mubr.msk.f32.vlgmr.msra.gmra.mrb[0].mxu0 %vm1041_vm3, %v1010_v56  ;;  %v432_v60 = vpop.permute.xlu0 %431  ;;  %v4208_v56 = vld [vmem:[%s3890_s21 + $0xa4] sm:$0xf] }
  0xa1   : > { %v811_v0 = vsel %vm805_vm1, %v3917_v7, %v434_v59  ;;  %v810_v1 = vsel %vm805_vm1, %v3903_v5, %v432_v60 }
  0xa2   : > { %493 = vrot.lane.b32.xlu1 %v4138_v57, %s3777_s22  ;;  %491 = vrot.lane.b32.xlu0 %v4141_v58, %s3777_s22 }
  0xa4   : > { %v438_v61 = vpop.permute.xlu1 %437  ;;  %v436_v62 = vpop.permute.xlu0 %435 }
  0xa5   : > { %v813_v5 = vsel %vm805_vm1, %v3937_v11, %v438_v61  ;;  %v812_v7 = vsel %vm805_vm1, %v3927_v9, %v436_v62  ;;  %v4180_v11 = vld [vmem:[%s3890_s21 + $0x9c] sm:$0xf] }
  0xa6   : > { %682 = vrot.lane.b32.xlu1 %v4141_v58, %s3778_s23  ;;  %680 = vrot.lane.b32.xlu0 %v4121_v48, %s3778_s23 }
  0xa8   : > { %v627_v2 = vpop.permute.xlu1 %626  ;;  %v625_v3 = vpop.permute.xlu0 %624 }
  0xa9   : > { %v876_v4 = vsel %vm870_vm2, %v811_v0, %v627_v2  ;;  %v875_v6 = vsel %vm870_vm2, %v810_v1, %v625_v3  ;;  %v4225_v1 = vld [vmem:[%s3890_s21 + $0xa8] sm:$0xf] }
  0xaa   : > { %v1011_v8 = vcombine.low %v875_v6, %v876_v4  ;;  %686 = vrot.lane.b32.xlu1 %v4153_v63, %s3778_s23  ;;  %684 = vrot.lane.b32.xlu0 %v4138_v57, %s3778_s23  ;;  %v4237_v6 = vld [vmem:[%s3890_s21 + $0xb0] sm:$0xf] }
  0xac   : > { %v631_v36 = vpop.permute.xlu1 %630  ;;  %3453 = vmatprep.mubr.msk.f32.mxu0 %vm1041_vm3, %v1011_v8  ;;  %v629_v37 = vpop.permute.xlu0 %628 }
  0xad   : > { %v878_v38 = vsel %vm870_vm2, %v813_v5, %v631_v36  ;;  %v877_v39 = vsel %vm870_vm2, %v812_v7, %v629_v37 }
  0xae   : > { %v1012_v40 = vcombine.low %v877_v39, %v878_v38  ;;  %497 = vrot.lane.b32.xlu1 %v4166_v34, %s3777_s22  ;;  %495 = vrot.lane.b32.xlu0 %v4153_v63, %s3777_s22 }
  0xb0   : > { %v442_v9 = vpop.permute.xlu1 %441  ;;  %3454 = vmatmul.mubr.msk.f32.gmra.mrb[2].mxu0 %vm1041_vm3, %v1012_v40  ;;  %v440_v42 = vpop.permute.xlu0 %439  ;;  %v4250_v40 = vld [vmem:[%s3890_s21 + $0xb4] sm:$0xf] }
  0xb1   : > { %v815_v47 = vsel %vm805_vm1, %v3948_v12, %v442_v9  ;;  %v814_v50 = vsel %vm805_vm1, %v3934_v10, %v440_v42 }
  0xb2   : > { %501 = vrot.lane.b32.xlu1 %v4180_v11, %s3777_s22  ;;  %499 = vrot.lane.b32.xlu0 %v4183_v41, %s3777_s22 }
  0xb4   : > { %v446_v43 = vpop.permute.xlu1 %445  ;;  %v444_v44 = vpop.permute.xlu0 %443 }
  0xb5   : > { %v817_v10 = vsel %vm805_vm1, %v3965_v15, %v446_v43  ;;  %v816_v12 = vsel %vm805_vm1, %v3955_v13, %v444_v44  ;;  %v4222_v15 = vld [vmem:[%s3890_s21 + $0xac] sm:$0xf] }
  0xb6   : > { %690 = vrot.lane.b32.xlu1 %v4183_v41, %s3778_s23  ;;  %688 = vrot.lane.b32.xlu0 %v4166_v34, %s3778_s23 }
  0xb8   : > { %v635_v51 = vpop.permute.xlu1 %634  ;;  %v633_v52 = vpop.permute.xlu0 %632 }
  0xb9   : > { %v880_v53 = vsel %vm870_vm2, %v815_v47, %v635_v51  ;;  %v879_v54 = vsel %vm870_vm2, %v814_v50, %v633_v52  ;;  %v4267_v50 = vld [vmem:[%s3890_s21 + $0xb8] sm:$0xf] }
  0xba   : > { %v1013_v55 = vcombine.low %v879_v54, %v880_v53  ;;  %694 = vrot.lane.b32.xlu1 %v4195_v45, %s3778_s23  ;;  %692 = vrot.lane.b32.xlu0 %v4180_v11, %s3778_s23  ;;  %v4279_v54 = vld [vmem:[%s3890_s21 + $0xc0] sm:$0xf] }
  0xbc   : > { %v639_v59 = vpop.permute.xlu1 %638  ;;  %3456 = vmatprep.mubr.msk.f32.mxu0 %vm1041_vm3, %v1013_v55  ;;  %v637_v60 = vpop.permute.xlu0 %636 }
  0xbd   : > { %v882_v61 = vsel %vm870_vm2, %v817_v10, %v639_v59  ;;  %v881_v62 = vsel %vm870_vm2, %v816_v12, %v637_v60 }
  0xbe   : > { %v1014_v0 = vcombine.low %v881_v62, %v882_v61  ;;  %505 = vrot.lane.b32.xlu1 %v4208_v56, %s3777_s22  ;;  %503 = vrot.lane.b32.xlu0 %v4195_v45, %s3777_s22 }
  0xc0   : > { %v450_v13 = vpop.permute.xlu1 %449  ;;  %3457 = vmatmul.mubr.msk.f32.gmra.mrb[4].mxu0 %vm1041_vm3, %v1014_v0  ;;  %v448_v2 = vpop.permute.xlu0 %447  ;;  %v4292_v0 = vld [vmem:[%s3890_s21 + $0xc4] sm:$0xf] }
  0xc1   : > { %v819_v8 = vsel %vm805_vm1, %v3976_v16, %v450_v13  ;;  %v818_v5 = vsel %vm805_vm1, %v3962_v14, %v448_v2 }
  0xc2   : > { %509 = vrot.lane.b32.xlu1 %v4222_v15, %s3777_s22  ;;  %507 = vrot.lane.b32.xlu0 %v4225_v1, %s3777_s22 }
  0xc4   : > { %v454_v3 = vpop.permute.xlu1 %453  ;;  %v452_v4 = vpop.permute.xlu0 %451 }
  0xc5   : > { %v821_v14 = vsel %vm805_vm1, %v3993_v19, %v454_v3  ;;  %v820_v16 = vsel %vm805_vm1, %v3983_v17, %v452_v4  ;;  %v4264_v19 = vld [vmem:[%s3890_s21 + $0xbc] sm:$0xf] }
  0xc6   : > { %698 = vrot.lane.b32.xlu1 %v4225_v1, %s3778_s23  ;;  %696 = vrot.lane.b32.xlu0 %v4208_v56, %s3778_s23 }
  0xc8   : > { %v643_v7 = vpop.permute.xlu1 %642  ;;  %v641_v36 = vpop.permute.xlu0 %640 }
  0xc9   : > { %v884_v37 = vsel %vm870_vm2, %v819_v8, %v643_v7  ;;  %v883_v38 = vsel %vm870_vm2, %v818_v5, %v641_v36  ;;  %v4309_v5 = vld [vmem:[%s3890_s21 + $0xc8] sm:$0xf] }
  0xca   : > { %v1015_v39 = vcombine.low %v883_v38, %v884_v37  ;;  %702 = vrot.lane.b32.xlu1 %v4237_v6, %s3778_s23  ;;  %700 = vrot.lane.b32.xlu0 %v4222_v15, %s3778_s23  ;;  %v4321_v38 = vld [vmem:[%s3890_s21 + $0xd0] sm:$0xf] }
  0xcc   : > { %v647_v9 = vpop.permute.xlu1 %646  ;;  %3459 = vmatprep.mubr.msk.f32.mxu0 %vm1041_vm3, %v1015_v39  ;;  %v645_v42 = vpop.permute.xlu0 %644 }
  0xcd   : > { %v886_v43 = vsel %vm870_vm2, %v821_v14, %v647_v9  ;;  %v885_v44 = vsel %vm870_vm2, %v820_v16, %v645_v42 }
  0xce   : > { %v1016_v47 = vcombine.low %v885_v44, %v886_v43  ;;  %513 = vrot.lane.b32.xlu1 %v4250_v40, %s3777_s22  ;;  %511 = vrot.lane.b32.xlu0 %v4237_v6, %s3777_s22 }
  0xd0   : > { %v458_v17 = vpop.permute.xlu1 %457  ;;  %3460 = vmatmul.mubr.msk.f32.gmra.mrb[6].mxu0 %vm1041_vm3, %v1016_v47  ;;  %v456_v51 = vpop.permute.xlu0 %455  ;;  %v4334_v47 = vld [vmem:[%s3890_s21 + $0xd4] sm:$0xf] }
  0xd1   : > { %v823_v55 = vsel %vm805_vm1, %v4004_v20, %v458_v17  ;;  %v822_v10 = vsel %vm805_vm1, %v3990_v18, %v456_v51 }
  0xd2   : > { %517 = vrot.lane.b32.xlu1 %v4264_v19, %s3777_s22  ;;  %515 = vrot.lane.b32.xlu0 %v4267_v50, %s3777_s22 }
  0xd4   : > { %v462_v52 = vpop.permute.xlu1 %461  ;;  %v460_v53 = vpop.permute.xlu0 %459 }
  0xd5   : > { %v825_v18 = vsel %vm805_vm1, %v4021_v23, %v462_v52  ;;  %v824_v20 = vsel %vm805_vm1, %v4011_v21, %v460_v53  ;;  %v4306_v23 = vld [vmem:[%s3890_s21 + $0xcc] sm:$0xf] }
  0xd6   : > { %706 = vrot.lane.b32.xlu1 %v4267_v50, %s3778_s23  ;;  %704 = vrot.lane.b32.xlu0 %v4250_v40, %s3778_s23 }
  0xd8   : > { %v651_v12 = vpop.permute.xlu1 %650  ;;  %v649_v59 = vpop.permute.xlu0 %648 }
  0xd9   : > { %v888_v60 = vsel %vm870_vm2, %v823_v55, %v651_v12  ;;  %v887_v61 = vsel %vm870_vm2, %v822_v10, %v649_v59  ;;  %v4351_v10 = vld [vmem:[%s3890_s21 + $0xd8] sm:$0xf] }
  0xda   : > { %v1017_v62 = vcombine.low %v887_v61, %v888_v60  ;;  %710 = vrot.lane.b32.xlu1 %v4279_v54, %s3778_s23  ;;  %708 = vrot.lane.b32.xlu0 %v4264_v19, %s3778_s23  ;;  %v4363_v61 = vld [vmem:[%s3890_s21 + $0xe0] sm:$0xf] }
  0xdc   : > { %v655_v13 = vpop.permute.xlu1 %654  ;;  %3462 = vmatprep.mubr.msk.f32.mxu0 %vm1041_vm3, %v1017_v62  ;;  %v653_v2 = vpop.permute.xlu0 %652 }
  0xdd   : > { %v890_v3 = vsel %vm870_vm2, %v825_v18, %v655_v13  ;;  %v889_v4 = vsel %vm870_vm2, %v824_v20, %v653_v2 }
  0xde   : > { %v1018_v8 = vcombine.low %v889_v4, %v890_v3  ;;  %521 = vrot.lane.b32.xlu1 %v4292_v0, %s3777_s22  ;;  %519 = vrot.lane.b32.xlu0 %v4279_v54, %s3777_s22 }
  0xe0   : > { %v466_v21 = vpop.permute.xlu1 %465  ;;  %3463 = vmatmul.mubr.msk.f32.gmra.mrb[8].mxu0 %vm1041_vm3, %v1018_v8  ;;  %v464_v7 = vpop.permute.xlu0 %463  ;;  %v4376_v8 = vld [vmem:[%s3890_s21 + $0xe4] sm:$0xf] }
  0xe1   : > { %v827_v39 = vsel %vm805_vm1, %v4032_v24, %v466_v21  ;;  %v826_v14 = vsel %vm805_vm1, %v4018_v22, %v464_v7 }
  0xe2   : > { %525 = vrot.lane.b32.xlu1 %v4306_v23, %s3777_s22  ;;  %523 = vrot.lane.b32.xlu0 %v4309_v5, %s3777_s22 }
  0xe4   : > { %v470_v36 = vpop.permute.xlu1 %469  ;;  %v468_v37 = vpop.permute.xlu0 %467 }
  0xe5   : > { %v829_v22 = vsel %vm805_vm1, %v4049_v27, %v470_v36  ;;  %v828_v24 = vsel %vm805_vm1, %v4039_v25, %v468_v37  ;;  %v4348_v27 = vld [vmem:[%s3890_s21 + $0xdc] sm:$0xf] }
  0xe6   : > { %714 = vrot.lane.b32.xlu1 %v4309_v5, %s3778_s23  ;;  %712 = vrot.lane.b32.xlu0 %v4292_v0, %s3778_s23 }
  0xe8   : > { %v659_v16 = vpop.permute.xlu1 %658  ;;  %v657_v9 = vpop.permute.xlu0 %656 }
  0xe9   : > { %v892_v42 = vsel %vm870_vm2, %v827_v39, %v659_v16  ;;  %v891_v43 = vsel %vm870_vm2, %v826_v14, %v657_v9  ;;  %v4393_v14 = vld [vmem:[%s3890_s21 + $0xe8] sm:$0xf] }
  0xea   : > { %v1019_v44 = vcombine.low %v891_v43, %v892_v42  ;;  %718 = vrot.lane.b32.xlu1 %v4321_v38, %s3778_s23  ;;  %716 = vrot.lane.b32.xlu0 %v4306_v23, %s3778_s23  ;;  %v4405_v43 = vld [vmem:[%s3890_s21 + $0xf0] sm:$0xf] }
  0xec   : > { %v663_v17 = vpop.permute.xlu1 %662  ;;  %3465 = vmatprep.mubr.msk.f32.mxu0 %vm1041_vm3, %v1019_v44  ;;  %v661_v51 = vpop.permute.xlu0 %660 }
  0xed   : > { %v894_v52 = vsel %vm870_vm2, %v829_v22, %v663_v17  ;;  %v893_v53 = vsel %vm870_vm2, %v828_v24, %v661_v51 }
  0xee   : > { %v1020_v55 = vcombine.low %v893_v53, %v894_v52  ;;  %529 = vrot.lane.b32.xlu1 %v4334_v47, %s3777_s22  ;;  %527 = vrot.lane.b32.xlu0 %v4321_v38, %s3777_s22 }
  0xf0   : > { %v474_v25 = vpop.permute.xlu1 %473  ;;  %3466 = vmatmul.mubr.msk.f32.gmra.mrb[10].mxu0 %vm1041_vm3, %v1020_v55  ;;  %v472_v12 = vpop.permute.xlu0 %471  ;;  %v4418_v55 = vld [vmem:[%s3890_s21 + $0xf4] sm:$0xf] }
  0xf1   : > { %v831_v62 = vsel %vm805_vm1, %v4060_v28, %v474_v25  ;;  %v830_v18 = vsel %vm805_vm1, %v4046_v26, %v472_v12 }
  0xf2   : > { %533 = vrot.lane.b32.xlu1 %v4348_v27, %s3777_s22  ;;  %531 = vrot.lane.b32.xlu0 %v4351_v10, %s3777_s22 }
  0xf4   : > { %v478_v59 = vpop.permute.xlu1 %477  ;;  %v476_v60 = vpop.permute.xlu0 %475 }
  0xf5   : > { %v833_v26 = vsel %vm805_vm1, %v4077_v31, %v478_v59  ;;  %v832_v28 = vsel %vm805_vm1, %v4067_v29, %v476_v60  ;;  %v4390_v31 = vld [vmem:[%s3890_s21 + $0xec] sm:$0xf] }
  0xf6   : > { %722 = vrot.lane.b32.xlu1 %v4351_v10, %s3778_s23  ;;  %720 = vrot.lane.b32.xlu0 %v4334_v47, %s3778_s23 }
  0xf8   : > { %v667_v20 = vpop.permute.xlu1 %666  ;;  %v665_v13 = vpop.permute.xlu0 %664 }
  0xf9   : > { %v896_v2 = vsel %vm870_vm2, %v831_v62, %v667_v20  ;;  %v895_v3 = vsel %vm870_vm2, %v830_v18, %v665_v13  ;;  %v4436_v18 = vld [vmem:[%s3890_s21 + $0xf8] sm:$0xf] }
  0xfa   : > { %v1021_v4 = vcombine.low %v895_v3, %v896_v2  ;;  %726 = vrot.lane.b32.xlu1 %v4363_v61, %s3778_s23  ;;  %724 = vrot.lane.b32.xlu0 %v4348_v27, %s3778_s23 }
  0xfc   : > { %v671_v21 = vpop.permute.xlu1 %670  ;;  %3468 = vmatprep.mubr.msk.f32.mxu0 %vm1041_vm3, %v1021_v4  ;;  %v669_v7 = vpop.permute.xlu0 %668 }
  0xfd   : > { %v898_v36 = vsel %vm870_vm2, %v833_v26, %v671_v21  ;;  %v897_v37 = vsel %vm870_vm2, %v832_v28, %v669_v7 }
  0xfe   : > { %v1022_v39 = vcombine.low %v897_v37, %v898_v36  ;;  %537 = vrot.lane.b32.xlu1 %v4376_v8, %s3777_s22  ;;  %535 = vrot.lane.b32.xlu0 %v4363_v61, %s3777_s22 }
 0x100   : > { %v482_v29 = vpop.permute.xlu1 %481  ;;  %3469 = vmatmul.mubr.msk.f32.gmra.mrb[12].mxu0 %vm1041_vm3, %v1022_v39  ;;  %v480_v16 = vpop.permute.xlu0 %479 }
 0x101   : > { %v835_v44 = vsel %vm805_vm1, %v4088_v32, %v482_v29  ;;  %v834_v22 = vsel %vm805_vm1, %v4074_v30, %v480_v16 }
 0x102   : > { %541 = vrot.lane.b32.xlu1 %v4390_v31, %s3777_s22  ;;  %539 = vrot.lane.b32.xlu0 %v4393_v14, %s3777_s22 }
 0x104   : > { %v486_v9 = vpop.permute.xlu1 %485  ;;  %v484_v42 = vpop.permute.xlu0 %483 }
 0x105   : > { %v837_v30 = vsel %vm805_vm1, %v4103_v35, %v486_v9  ;;  %v836_v32 = vsel %vm805_vm1, %v4095_v33, %v484_v42  ;;  %v358_v35 = vld [vmem:[%s3890_s21 + $0xfc] sm:$0xf]  ;;  %s5538_s21 = sand.u32 1, %s3767_s25  }
 0x106   : > { %730 = vrot.lane.b32.xlu1 %v4393_v14, %s3778_s23  ;;  %728 = vrot.lane.b32.xlu0 %v4376_v8, %s3778_s23  ;;  %s3140_s16 = scalar_lea.sflag [#allocation3], %s5538_s21 }
 0x108   : > { %v675_v24 = vpop.permute.xlu1 %674  ;;  %v673_v17 = vpop.permute.xlu0 %672 }
 0x109   : > { %v900_v51 = vsel %vm870_vm2, %v835_v44, %v675_v24  ;;  %v899_v52 = vsel %vm870_vm2, %v834_v22, %v673_v17 }
 0x10a   : > { %v1023_v53 = vcombine.low %v899_v52, %v900_v51  ;;  %734 = vrot.lane.b32.xlu1 %v4405_v43, %s3778_s23  ;;  %732 = vrot.lane.b32.xlu0 %v4390_v31, %s3778_s23 }
 0x10c   : > { %v4424_v25 = vpop.permute.xlu1 %678  ;;  %3471 = vmatprep.mubr.msk.f32.mxu0 %vm1041_vm3, %v1023_v53  ;;  %v677_v12 = vpop.permute.xlu0 %676 }
 0x10d   : > { %v902_v59 = vsel %vm870_vm2, %v837_v30, %v4424_v25  ;;  %v901_v60 = vsel %vm870_vm2, %v836_v32, %v677_v12 }
 0x10e   : > { %v1024_v62 = vcombine.low %v901_v60, %v902_v59  ;;  %545 = vrot.lane.b32.xlu1 %v4418_v55, %s3777_s22  ;;  %543 = vrot.lane.b32.xlu0 %v4405_v43, %s3777_s22 }
 0x110   : > { %v490_v33 = vpop.permute.xlu1 %489  ;;  %3472 = vmatmul.mubr.msk.f32.gmra.mrb[14].mxu0 %vm1041_vm3, %v1024_v62  ;;  %v488_v20 = vpop.permute.xlu0 %487 }
 0x111   : > { %v839_v3 = vsel %vm805_vm1, %v4124_v49, %v490_v33  ;;  %v838_v4 = vsel %vm805_vm1, 0.0, %v488_v20 }
 0x112   : > { %549 = vrot.lane.b32.xlu1 %v358_v35, %s3777_s22  ;;  %547 = vrot.lane.b32.xlu0 %v4436_v18, %s3777_s22  ;;  %s3781_s22 = smov 32  }
 0x114   : > { %v494_v13 = vpop.permute.xlu1 %493  ;;  %v492_v2 = vpop.permute.xlu0 %491 }
 0x115   : > { %v841_v37 = vsel %vm805_vm1, %v4141_v58, %v494_v13  ;;  %v840_v39 = vsel %vm805_vm1, %v4121_v48, %v492_v2 }
 0x116   : > { %736 = vrot.lane.b32.xlu0 %v4418_v55, %s3778_s23  ;;  %738 = vrot.lane.b32.xlu1 %v4436_v18, %s3778_s23 }
 0x118   : > { %v683_v26 = vpop.permute.xlu1 %682  ;;  %v681_v28 = vpop.permute.xlu0 %680 }
 0x119   : > { %v904_v21 = vsel %vm870_vm2, %v839_v3, %v683_v26  ;;  %v903_v7 = vsel %vm870_vm2, %v838_v4, %v681_v28 }
 0x11a   : > { %v1025_v36 = vcombine.low %v903_v7, %v904_v21  ;;  %740 = vrot.lane.b32.xlu0 %v358_v35, %s3778_s23 }
 0x11c   : > { %v687_v29 = vpop.permute.xlu1 %686  ;;  %3474 = vmatprep.mubr.msk.f32.mxu0 %vm1041_vm3, %v1025_v36  ;;  %v685_v49 = vpop.permute.xlu0 %684 }
 0x11d   : > { %v906_v16 = vsel %vm870_vm2, %v841_v37, %v687_v29  ;;  %v905_v9 = vsel %vm870_vm2, %v840_v39, %v685_v49 }
 0x11e   : > { %v1026_v42 = vcombine.low %v905_v9, %v906_v16  ;;  %1715 = vrot.lane.b32.xlu0 %v3779_v46, %s3780_s9 }
 0x120   : > { %v498_v44 = vpop.permute.xlu1 %497  ;;  %3475 = vmatmul.mubr.msk.f32.gmra.mrb[16].mxu0 %vm1041_vm3, %v1026_v42  ;;  %v496_v58 = vpop.permute.xlu0 %495 }
 0x121   : > { %v843_v48 = vsel %vm805_vm1, %v4153_v63, %v498_v44  ;;  %v842_v17 = vsel %vm805_vm1, %v4138_v57, %v496_v58 }
 0x124   : > { %v502_v22 = vpop.permute.xlu1 %501  ;;  %v500_v24 = vpop.permute.xlu0 %499 }
 0x125   : > { %v845_v46 = vsel %vm805_vm1, %v4183_v41, %v502_v22  ;;  %v844_v12 = vsel %vm805_vm1, %v4166_v34, %v500_v24 }
 0x128   : > { %v691_v51 = vpop.permute.xlu1 %690  ;;  %v689_v52 = vpop.permute.xlu0 %688 }
 0x129   : > { %v908_v53 = vsel %vm870_vm2, %v843_v48, %v691_v51  ;;  %v907_v30 = vsel %vm870_vm2, %v842_v17, %v689_v52 }
 0x12a   : > { %v1027_v32 = vcombine.low %v907_v30, %v908_v53 }
 0x12c   : > { %v695_v59 = vpop.permute.xlu1 %694  ;;  %3477 = vmatprep.mubr.msk.f32.mxu0 %vm1041_vm3, %v1027_v32  ;;  %v693_v63 = vpop.permute.xlu0 %692 }
 0x12d   : > { %v910_v60 = vsel %vm870_vm2, %v845_v46, %v695_v59  ;;  %v909_v57 = vsel %vm870_vm2, %v844_v12, %v693_v63 }
 0x12e   : > { %v1028_v62 = vcombine.low %v909_v57, %v910_v60 }
 0x130   : > { %v506_v35 = vpop.permute.xlu1 %505  ;;  %3478 = vmatmul.mubr.msk.f32.gmra.mrb[18].mxu0 %vm1041_vm3, %v1028_v62  ;;  %v504_v33 = vpop.permute.xlu0 %503 }
 0x131   : > { %v847_v41 = vsel %vm805_vm1, %v4195_v45, %v506_v35  ;;  %v846_v34 = vsel %vm805_vm1, %v4180_v11, %v504_v33 }
 0x134   : > { %v510_v20 = vpop.permute.xlu1 %509  ;;  %v508_v13 = vpop.permute.xlu0 %507 }
 0x135   : > { %v849_v28 = vsel %vm805_vm1, %v4225_v1, %v510_v20  ;;  %v848_v21 = vsel %vm805_vm1, %v4208_v56, %v508_v13 }
 0x138   : > { %v699_v2 = vpop.permute.xlu1 %698  ;;  %v697_v3 = vpop.permute.xlu0 %696 }
 0x139   : > { %v912_v4 = vsel %vm870_vm2, %v847_v41, %v699_v2  ;;  %v911_v26 = vsel %vm870_vm2, %v846_v34, %v697_v3 }
 0x13a   : > { %v1029_v7 = vcombine.low %v911_v26, %v912_v4 }
 0x13c   : > { %v703_v36 = vpop.permute.xlu1 %702  ;;  %v701_v37 = vpop.permute.xlu0 %700  ;;  %3480 = vmatprep.mubr.msk.f32.mxu0 %vm1041_vm3, %v1029_v7 }
 0x13d   : > { %v914_v45 = vsel %vm870_vm2, %v849_v28, %v703_v36  ;;  %v913_v11 = vsel %vm870_vm2, %v848_v21, %v701_v37 }
 0x13e   : > { %v1030_v39 = vcombine.low %v913_v11, %v914_v45  ;;  %v1974_v11 = vld [vmem:[%s6539_s3 + $0x10] sm:$0xff] }
 0x140   : > { %v514_v29 = vpop.permute.xlu1 %513  ;;  %v512_v49 = vpop.permute.xlu0 %511  ;;  %3481 = vmatmul.mubr.msk.f32.gmra.mrb[20].mxu0 %vm1041_vm3, %v1030_v39 }
 0x141   : > { %v851_v1 = vsel %vm805_vm1, %v4237_v6, %v514_v29  ;;  %v850_v56 = vsel %vm805_vm1, %v4222_v15, %v512_v49 }
 0x144   : > { %v518_v16 = vpop.permute.xlu1 %517  ;;  %v516_v9 = vpop.permute.xlu0 %515 }
 0x145   : > { %v853_v24 = vsel %vm805_vm1, %v4267_v50, %v518_v16  ;;  %v852_v48 = vsel %vm805_vm1, %v4250_v40, %v516_v9 }
 0x148   : > { %v707_v42 = vpop.permute.xlu1 %706  ;;  %v705_v44 = vpop.permute.xlu0 %704 }
 0x149   : > { %v916_v58 = vsel %vm870_vm2, %v851_v1, %v707_v42  ;;  %v915_v22 = vsel %vm870_vm2, %v850_v56, %v705_v44  ;;  %v1976_v42 = vld [vmem:[%s6539_s3 + $0x20] sm:$0xff] }
 0x14a   : > { %v1031_v17 = vcombine.low %v915_v22, %v916_v58 }
 0x14c   : > { %v711_v51 = vpop.permute.xlu1 %710  ;;  %v709_v52 = vpop.permute.xlu0 %708  ;;  %3483 = vmatprep.mubr.msk.f32.mxu0 %vm1041_vm3, %v1031_v17  ;;  %v1979_v17 = vld [vmem:[%s6539_s3 + $0x38] sm:$0xff] }
 0x14d   : > { %v918_v6 = vsel %vm870_vm2, %v853_v24, %v711_v51  ;;  %v917_v15 = vsel %vm870_vm2, %v852_v48, %v709_v52  ;;  %v4553_v24 = vld [vmem:[%s6538_s2] ss:$0 sm:$0xff]  ;;  %v1978_v48 = vld [vmem:[%s6539_s3 + $0x30] sm:$0xff] }
 0x14e   : > { %v1032_v53 = vcombine.low %v917_v15, %v918_v6  ;;  %v3586_v51 = vpack.c.bf16 %v1979_v17, %v1978_v48 }
 0x150   : > { %v522_v30 = vpop.permute.xlu1 %521  ;;  %v520_v32 = vpop.permute.xlu0 %519  ;;  %3484 = vmatmul.mubr.msk.f32.gmra.mrb[22].mxu0 %vm1041_vm3, %v1032_v53 }
 0x151   : > { %v855_v50 = vsel %vm805_vm1, %v4279_v54, %v522_v30  ;;  %v854_v40 = vsel %vm805_vm1, %v4264_v19, %v520_v32  ;;  %v1980_v32 = vld [vmem:[%s6539_s3 + $0x40] sm:$0xff] }
 0x154   : > { %v526_v46 = vpop.permute.xlu1 %525  ;;  %v524_v12 = vpop.permute.xlu0 %523 }
 0x155   : > { %v857_v62 = vsel %vm805_vm1, %v4309_v5, %v526_v46  ;;  %v856_v35 = vsel %vm805_vm1, %v4292_v0, %v524_v12  ;;  %v1972_v0 = vld [vmem:[%s6539_s3] sm:$0xff]  ;;  %v1973_v5 = vld [vmem:[%s6539_s3 + $0x8] sm:$0xff] }
 0x156   : > { %v3574_v21 = vpack.c.bf16 %v1973_v5, %v1972_v0  ;;  %v1981_v46 = vld [vmem:[%s6539_s3 + $0x48] sm:$0xff] }
 0x158   : > { %v715_v59 = vpop.permute.xlu1 %714  ;;  %v713_v63 = vpop.permute.xlu0 %712  ;;  %3575 = vmatprep.subr.bf16.mxu0 %v3574_v21  ;;  %3598 = vmatprep.subr.bf16.mxu1 %v3574_v21 }
 0x159   : > { %v920_v60 = vsel %vm870_vm2, %v855_v50, %v715_v59  ;;  %v919_v57 = vsel %vm870_vm2, %v854_v40, %v713_v63  ;;  %3577 = vmatpush3.bf16.msra.mxu0 %v3574_v21  ;;  %3604 = vmatpush3.bf16.msra.mxu1 %v3574_v21  ;;  %v3590_v59 = vpack.c.bf16 %v1981_v46, %v1980_v32 }
 0x15a   : > { %v1033_v33 = vcombine.low %v919_v57, %v920_v60 }
 0x15c   : > { %v719_v20 = vpop.permute.xlu1 %718  ;;  %v717_v13 = vpop.permute.xlu0 %716  ;;  %3486 = vmatprep.mubr.msk.f32.mxu0 %vm1041_vm3, %v1033_v33 }
 0x15d   : > { %v922_v54 = vsel %vm870_vm2, %v857_v62, %v719_v20  ;;  %v921_v19 = vsel %vm870_vm2, %v856_v35, %v717_v13  ;;  %v1982_v35 = vld [vmem:[%s6539_s3 + $0x50] sm:$0xff] }
 0x15e   : > { %v1034_v41 = vcombine.low %v921_v19, %v922_v54 }
 0x160   : > { %v530_v34 = vpop.permute.xlu1 %529  ;;  %v528_v2 = vpop.permute.xlu0 %527  ;;  %3487 = vmatmul.mubr.msk.f32.gmra.mrb[24].mxu0 %vm1041_vm3, %v1034_v41 }
 0x161   : > { %v859_v26 = vsel %vm805_vm1, %v4321_v38, %v530_v34  ;;  %v858_v28 = vsel %vm805_vm1, %v4306_v23, %v528_v2  ;;  %v1975_v38 = vld [vmem:[%s6539_s3 + $0x18] sm:$0xff] }
 0x162   : > { %v3578_v49 = vpack.c.bf16 %v1975_v38, %v1974_v11 }
 0x164   : > { %v534_v3 = vpop.permute.xlu1 %533  ;;  %v532_v4 = vpop.permute.xlu0 %531  ;;  %3579 = vmatprep.subr.bf16.mxu0 %v3578_v49  ;;  %3599 = vmatprep.subr.bf16.mxu1 %v3578_v49 }
 0x165   : > { %v861_v23 = vsel %vm805_vm1, %v4351_v10, %v534_v3  ;;  %v860_v39 = vsel %vm805_vm1, %v4334_v47, %v532_v4  ;;  %3581 = vmatpush3.bf16.msra.mxu0 %v3578_v49  ;;  %v1977_v47 = vld [vmem:[%s6539_s3 + $0x28] sm:$0xff]  ;;  %3605 = vmatpush3.bf16.msra.mxu1 %v3578_v49 }
 0x166   : > { %v3582_v44 = vpack.c.bf16 %v1977_v47, %v1976_v42 }
 0x168   : > { %v723_v7 = vpop.permute.xlu1 %722  ;;  %v721_v36 = vpop.permute.xlu0 %720  ;;  %3583 = vmatprep.subr.bf16.mxu0 %v3582_v44  ;;  %3600 = vmatprep.subr.bf16.mxu1 %v3582_v44 }
 0x169   : > { %v924_v37 = vsel %vm870_vm2, %v859_v26, %v723_v7  ;;  %v923_v45 = vsel %vm870_vm2, %v858_v28, %v721_v36  ;;  %3585 = vmatpush3.bf16.msra.mxu0 %v3582_v44  ;;  %3606 = vmatpush3.bf16.msra.mxu1 %v3582_v44 }
 0x16a   : > { %v1035_v29 = vcombine.low %v923_v45, %v924_v37  ;;  %3587 = vmatprep.subr.bf16.mxu0 %v3586_v51  ;;  %3601 = vmatprep.subr.bf16.mxu1 %v3586_v51 }
 0x16c   : > { %v727_v16 = vpop.permute.xlu1 %726  ;;  %v725_v9 = vpop.permute.xlu0 %724  ;;  %3489 = vmatprep.mubr.msk.f32.mxu0 %vm1041_vm3, %v1035_v29 }
 0x16d   : > { %v926_v1 = vsel %vm870_vm2, %v861_v23, %v727_v16  ;;  %v925_v56 = vsel %vm870_vm2, %v860_v39, %v725_v9  ;;  %3589 = vmatpush3.bf16.msra.mxu0 %v3586_v51  ;;  %3607 = vmatpush3.bf16.msra.mxu1 %v3586_v51 }
 0x16e   : > { %v1036_v10 = vcombine.low %v925_v56, %v926_v1  ;;  %3591 = vmatprep.subr.bf16.mxu0 %v3590_v59  ;;  %3602 = vmatprep.subr.bf16.mxu1 %v3590_v59 }
 0x170   : > { %v538_v58 = vpop.permute.xlu1 %537  ;;  %v536_v22 = vpop.permute.xlu0 %535  ;;  %3490 = vmatmul.mubr.msk.f32.gmra.mrb[26].mxu0 %vm1041_vm3, %v1036_v10 }
 0x171   : > { %v863_v12 = vsel %vm805_vm1, %v4363_v61, %v538_v58  ;;  %v862_v63 = vsel %vm805_vm1, %v4348_v27, %v536_v22  ;;  %v1983_v27 = vld [vmem:[%s6539_s3 + $0x58] sm:$0xff]  ;;  %3593 = vmatpush3.bf16.msra.mxu0 %v3590_v59  ;;  %3608 = vmatpush3.bf16.msra.mxu1 %v3590_v59 }
 0x172   : > { %v3594_v13 = vpack.c.bf16 %v1983_v27, %v1982_v35 }
 0x173   : > { %v3452_v52 = vpop.f32.mrb[0].mxu0 }
 0x174   : > { %v1182_v6 = vadd.f32 %v3452_v52, %v4553_v24  ;;  %v542_v15 = vpop.permute.xlu1 %541  ;;  %v1176_v53 = vpop.f32.mrb[1].mxu0  ;;  %3595 = vmatprep.subr.bf16.mxu0 %v3594_v13  ;;  %3603 = vmatprep.subr.bf16.mxu1 %v3594_v13 }
 0x175   : > { %v540_v30 = vpop.permute.xlu0 %539  ;;  %v1177_v40 = vadd.f32 %v4553_v24, %v1176_v53  ;;  %v865_v61 = vsel %vm805_vm1, %v4393_v14, %v542_v15  ;;  %3597 = vmatpush3.bf16.msra.mxu0 %v3594_v13  ;;  %3609 = vmatpush3.bf16.msra.mxu1 %v3594_v13 }
 0x176   : > { %v4570_v50 = vmax.f32 %v1182_v6, 0.0  ;;  %v864_v54 = vsel %vm805_vm1, %v4376_v8, %v540_v30 }
 0x177   : > { %v4588_v33 = vmax.f32 %v1177_v40, 0.0 }
 0x178   : > { %v731_v60 = vpop.permute.xlu1 %730  ;;  %1465 = vrot.lane.b32.xlu1 %v4570_v50, %s3781_s22  ;;  %1655 = vrot.lane.b32.xlu0 %v4570_v50, %s3780_s9  ;;  %v4593_v14 = vcombine.high %v4570_v50, %v4570_v50 }
 0x179   : > { %v928_v57 = vsel %vm870_vm2, %v863_v12, %v731_v60  ;;  %v729_v62 = vpop.permute.xlu0 %728  ;;  %v4605_v3 = vcombine.high %v4588_v33, %v4588_v33 }
 0x17a   : > { %v927_v20 = vsel %vm870_vm2, %v862_v63, %v729_v62 }
 0x17b   : > { %v1037_v19 = vcombine.low %v927_v20, %v928_v57 }
 0x17c   : > { %v735_v41 = vpop.permute.xlu1 %734  ;;  %1461 = vrot.lane.b32.xlu1 %v4588_v33, %s3781_s22  ;;  %1467 = vrot.lane.b32.xlu0 %v4593_v14, %s3781_s22 }
 0x17d   : > { %v930_v34 = vsel %vm870_vm2, %v865_v61, %v735_v41  ;;  %v733_v2 = vpop.permute.xlu0 %732  ;;  %3492 = vmatprep.mubr.msk.f32.mxu0 %vm1041_vm3, %v1037_v19 }
 0x17e   : > { %v929_v8 = vsel %vm870_vm2, %v864_v54, %v733_v2 }
 0x17f   : > { %v1038_v4 = vcombine.low %v929_v8, %v930_v34 }
 0x180   : > { %v546_v0 = vpop.permute.xlu1 %545  ;;  %1657 = vrot.lane.b32.xlu1 %v4593_v14, %s3780_s9  ;;  %1463 = vrot.lane.b32.xlu0 %v4605_v3, %s3781_s22 }
 0x181   : > { %v544_v5 = vpop.permute.xlu0 %543  ;;  %3493 = vmatmul.mubr.msk.f32.gmra.mrb[28].mxu0 %vm1041_vm3, %v1038_v4  ;;  %v867_v37 = vsel %vm805_vm1, %v4405_v43, %v546_v0 }
 0x182   : > { %v866_v45 = vsel %vm805_vm1, %v4390_v31, %v544_v5 }
 0x183   : > { %v4613_v26 = vpop.f32.mrb[2].mxu0 }
 0x184   : > { %v550_v28 = vpop.permute.xlu1 %549  ;;  %1653 = vrot.lane.b32.xlu1 %v4605_v3, %s3780_s9  ;;  %v1186_v21 = vpop.f32.mrb[3].mxu0 }
 0x185   : > { %v1187_v7 = vadd.f32 %v4553_v24, %v1186_v21  ;;  %v548_v36 = vpop.permute.xlu0 %547  ;;  %v869_v49 = vsel %vm805_vm1, %v4436_v18, %v550_v28 }
 0x186   : > { %v868_v43 = vsel %vm805_vm1, %v4418_v55, %v548_v36  ;;  %v934_v31 = vsel %vm870_vm2, %v869_v49, %v4424_v25 }
 0x187   : > { %v4622_v11 = vmax.f32 %v1187_v7, 0.0 }
 0x188   : > { %v739_v38 = vpop.permute.xlu1 %738 }
 0x189   : > { %v737_v23 = vpop.permute.xlu0 %736  ;;  %1659 = vrot.lane.b32.xlu0 %v4622_v11, %s3780_s9  ;;  %v932_v39 = vsel %vm870_vm2, %v867_v37, %v739_v38 }
 0x18a   : > { %v931_v29 = vsel %vm870_vm2, %v866_v45, %v737_v23 }
 0x18b   : > { %v1039_v16 = vcombine.low %v931_v29, %v932_v39 }
 0x18d   : > { %v741_v9 = vpop.permute.xlu0 %740  ;;  %3495 = vmatprep.mubr.msk.f32.mxu0 %vm1041_vm3, %v1039_v16 }
 0x18e   : > { %v933_v1 = vsel %vm870_vm2, %v868_v43, %v741_v9 }
 0x18f   : > { %v1040_v56 = vcombine.low %v933_v1, %v934_v31 }
 0x191   : > { %3496 = vmatmul.mubr.msk.f32.gmra.mrb[30].mxu0 %vm1041_vm3, %v1040_v56  ;;  %v4786_v36 = vpop.permute.xlu0 %1715 }
 0x193   : > { %v3458_v42 = vpop.f32.mrb[4].mxu0 }
 0x194   : > { %v1202_v47 = vadd.f32 %v3458_v42, %v4553_v24  ;;  %v1196_v10 = vpop.f32.mrb[5].mxu0 }
 0x195   : > { %v1197_v55 = vadd.f32 %v4553_v24, %v1196_v10 }
 0x196   : > { %v4638_v18 = vmax.f32 %v1202_v47, 0.0 }
 0x197   : > { %v4645_v25 = vmax.f32 %v1197_v55, 0.0 }
 0x198   : > { %1481 = vrot.lane.b32.xlu1 %v4638_v18, %s3781_s22  ;;  %1671 = vrot.lane.b32.xlu0 %v4638_v18, %s3780_s9  ;;  %v4649_v44 = vcombine.high %v4638_v18, %v4638_v18 }
 0x199   : > { %v4657_v58 = vcombine.high %v4645_v25, %v4645_v25 }
 0x19c   : > { %1477 = vrot.lane.b32.xlu1 %v4645_v25, %s3781_s22  ;;  %1483 = vrot.lane.b32.xlu0 %v4649_v44, %s3781_s22 }
 0x1a0   : > { %1673 = vrot.lane.b32.xlu1 %v4649_v44, %s3780_s9  ;;  %1479 = vrot.lane.b32.xlu0 %v4657_v58, %s3781_s22 }
 0x1a3   : > { %v3461_v22 = vpop.f32.mrb[6].mxu0 }
 0x1a4   : > { %v1212_v48 = vadd.f32 %v3461_v22, %v4553_v24  ;;  %1669 = vrot.lane.b32.xlu1 %v4657_v58, %s3780_s9  ;;  %v1206_v17 = vpop.f32.mrb[7].mxu0 }
 0x1a5   : > { %v1207_v52 = vadd.f32 %v4553_v24, %v1206_v17 }
 0x1a6   : > { %v4666_v51 = vmax.f32 %v1212_v48, 0.0 }
 0x1a7   : > { %v4673_v6 = vmax.f32 %v1207_v52, 0.0 }
 0x1a8   : > { %1489 = vrot.lane.b32.xlu1 %v4666_v51, %s3781_s22  ;;  %1679 = vrot.lane.b32.xlu0 %v4666_v51, %s3780_s9  ;;  %v4681_v15 = vcombine.high %v4666_v51, %v4666_v51 }
 0x1a9   : > { %v4689_v53 = vcombine.high %v4673_v6, %v4673_v6 }
 0x1ac   : > { %1485 = vrot.lane.b32.xlu1 %v4673_v6, %s3781_s22  ;;  %1675 = vrot.lane.b32.xlu0 %v4673_v6, %s3780_s9 }
 0x1b0   : > { %1681 = vrot.lane.b32.xlu1 %v4681_v15, %s3780_s9  ;;  %1491 = vrot.lane.b32.xlu0 %v4681_v15, %s3781_s22 }
 0x1b3   : > { %v3464_v30 = vpop.f32.mrb[8].mxu0 }
 0x1b4   : > { %v1222_v32 = vadd.f32 %v3464_v30, %v4553_v24  ;;  %1677 = vrot.lane.b32.xlu1 %v4689_v53, %s3780_s9  ;;  %v1216_v46 = vpop.f32.mrb[9].mxu0  ;;  %1487 = vrot.lane.b32.xlu0 %v4689_v53, %s3781_s22 }
 0x1b5   : > { %v1217_v40 = vadd.f32 %v4553_v24, %v1216_v46 }
 0x1b6   : > { %v4696_v12 = vmax.f32 %v1222_v32, 0.0 }
 0x1b7   : > { %v4703_v59 = vmax.f32 %v1217_v40, 0.0 }
 0x1b8   : > { %1497 = vrot.lane.b32.xlu1 %v4696_v12, %s3781_s22  ;;  %1687 = vrot.lane.b32.xlu0 %v4696_v12, %s3780_s9  ;;  %v4711_v63 = vcombine.high %v4696_v12, %v4696_v12 }
 0x1b9   : > { %v4719_v60 = vcombine.high %v4703_v59, %v4703_v59 }
 0x1bc   : > { %1493 = vrot.lane.b32.xlu1 %v4703_v59, %s3781_s22  ;;  %1683 = vrot.lane.b32.xlu0 %v4703_v59, %s3780_s9 }
 0x1c0   : > { %1689 = vrot.lane.b32.xlu1 %v4711_v63, %s3780_s9  ;;  %1499 = vrot.lane.b32.xlu0 %v4711_v63, %s3781_s22 }
 0x1c3   : > { %v3467_v61 = vpop.f32.mrb[10].mxu0 }
 0x1c4   : > { %v1232_v57 = vadd.f32 %v3467_v61, %v4553_v24  ;;  %1685 = vrot.lane.b32.xlu1 %v4719_v60, %s3780_s9  ;;  %v1226_v62 = vpop.f32.mrb[11].mxu0  ;;  %1495 = vrot.lane.b32.xlu0 %v4719_v60, %s3781_s22 }
 0x1c5   : > { %v1227_v27 = vadd.f32 %v4553_v24, %v1226_v62 }
 0x1c6   : > { %v4726_v35 = vmax.f32 %v1232_v57, 0.0 }
 0x1c7   : > { %v4733_v20 = vmax.f32 %v1227_v27, 0.0 }
 0x1c8   : > { %1505 = vrot.lane.b32.xlu1 %v4726_v35, %s3781_s22  ;;  %1695 = vrot.lane.b32.xlu0 %v4726_v35, %s3780_s9  ;;  %v4741_v13 = vcombine.high %v4726_v35, %v4726_v35 }
 0x1c9   : > { %v4749_v54 = vcombine.high %v4733_v20, %v4733_v20 }
 0x1cc   : > { %1501 = vrot.lane.b32.xlu1 %v4733_v20, %s3781_s22  ;;  %1691 = vrot.lane.b32.xlu0 %v4733_v20, %s3780_s9 }
 0x1d0   : > { %1697 = vrot.lane.b32.xlu1 %v4741_v13, %s3780_s9  ;;  %1507 = vrot.lane.b32.xlu0 %v4741_v13, %s3781_s22 }
 0x1d3   : > { %v3470_v19 = vpop.f32.mrb[12].mxu0 }
 0x1d4   : > { %v1242_v41 = vadd.f32 %v3470_v19, %v4553_v24  ;;  %1693 = vrot.lane.b32.xlu1 %v4749_v54, %s3780_s9  ;;  %v1236_v34 = vpop.f32.mrb[13].mxu0  ;;  %1503 = vrot.lane.b32.xlu0 %v4749_v54, %s3781_s22 }
 0x1d5   : > { %v1237_v8 = vadd.f32 %v4553_v24, %v1236_v34 }
 0x1d6   : > { %v4756_v2 = vmax.f32 %v1242_v41, 0.0 }
 0x1d7   : > { %v4763_v4 = vmax.f32 %v1237_v8, 0.0  ;;  %v1192_v8 = vadd.f32 %v4613_v26, %v4553_v24 }
 0x1d8   : > { %1513 = vrot.lane.b32.xlu1 %v4756_v2, %s3781_s22  ;;  %1703 = vrot.lane.b32.xlu0 %v4756_v2, %s3780_s9  ;;  %v4771_v0 = vcombine.high %v4756_v2, %v4756_v2 }
 0x1d9   : > { %v4779_v5 = vcombine.high %v4763_v4, %v4763_v4 }
 0x1dc   : > { %1509 = vrot.lane.b32.xlu1 %v4763_v4, %s3781_s22  ;;  %1699 = vrot.lane.b32.xlu0 %v4763_v4, %s3780_s9 }
 0x1e0   : > { %1705 = vrot.lane.b32.xlu1 %v4771_v0, %s3780_s9  ;;  %1515 = vrot.lane.b32.xlu0 %v4771_v0, %s3781_s22 }
 0x1e3   : > { %v3473_v28 = vpop.f32.mrb[14].mxu0 }
 0x1e4   : > { %v1252_v21 = vadd.f32 %v3473_v28, %v4553_v24  ;;  %1701 = vrot.lane.b32.xlu1 %v4779_v5, %s3780_s9  ;;  %v1246_v7 = vpop.f32.mrb[15].mxu0  ;;  %1511 = vrot.lane.b32.xlu0 %v4779_v5, %s3781_s22 }
 0x1e5   : > { %v1247_v45 = vadd.f32 %v4553_v24, %v1246_v7  ;;  %v4865_v7 = vcombine.high %v4622_v11, %v4622_v11 }
 0x1e6   : > { %v4788_v37 = vmax.f32 %v1252_v21, 0.0 }
 0x1e7   : > { %v4795_v38 = vmax.f32 %v1247_v45, 0.0  ;;  %v4871_v45 = vmax.f32 %v1192_v8, 0.0 }
 0x1e8   : > { %1521 = vrot.lane.b32.xlu1 %v4788_v37, %s3781_s22  ;;  %1711 = vrot.lane.b32.xlu0 %v4788_v37, %s3780_s9  ;;  %v1414_v43 = vcombine.high %v4788_v37, %v4788_v37 }
 0x1e9   : > { %v4807_v31 = vcombine.high %v4795_v38, %v4795_v38 }
 0x1ea   : > { %v1466_v23 = vpop.permute.xlu1 %1465  ;;  %v1656_v39 = vpop.permute.xlu0 %1655 }
 0x1eb   : > { %v1845_v46 = vsel %vm1842_vm4, %v4605_v3, %v1466_v23 }
 0x1ec   : > { %1517 = vrot.lane.b32.xlu1 %v4795_v38, %s3781_s22  ;;  %1707 = vrot.lane.b32.xlu0 %v4795_v38, %s3780_s9 }
 0x1ee   : > { %v1462_v29 = vpop.permute.xlu1 %1461  ;;  %v1468_v49 = vpop.permute.xlu0 %1467 }
 0x1ef   : > { %v1843_v10 = vsel %vm1842_vm4, 0.0, %v1462_v29  ;;  %v1846_v40 = vsel %vm1842_vm4, %v4570_v50, %v1468_v49 }
 0x1f0   : > { %1713 = vrot.lane.b32.xlu1 %v1414_v43, %s3780_s9  ;;  %1523 = vrot.lane.b32.xlu0 %v1414_v43, %s3781_s22 }
 0x1f2   : > { %v1658_v16 = vpop.permute.xlu1 %1657  ;;  %v1464_v9 = vpop.permute.xlu0 %1463 }
 0x1f3   : > { %v3476_v1 = vpop.f32.mrb[16].mxu0  ;;  %v1844_v56 = vsel %vm1842_vm4, %v4588_v33, %v1464_v9  ;;  %v1910_v57 = vsel %vm1907_vm5, %v1845_v46, %v1658_v16  ;;  %v1402_v9 = vcombine.high %v4871_v45, %v4871_v45 }
 0x1f4   : > { %v1262_v42 = vadd.f32 %v3476_v1, %v4553_v24  ;;  %1709 = vrot.lane.b32.xlu1 %v4807_v31, %s3780_s9  ;;  %v1256_v47 = vpop.f32.mrb[17].mxu0  ;;  %1519 = vrot.lane.b32.xlu0 %v4807_v31, %s3781_s22  ;;  %v1909_v33 = vsel %vm1907_vm5, %v1844_v56, %v1656_v39 }
 0x1f5   : > { %v1257_v22 = vadd.f32 %v4553_v24, %v1256_v47 }
 0x1f6   : > { %v4817_v55 = vmax.f32 %v1262_v42, 0.0  ;;  %v1654_v48 = vpop.permute.xlu1 %1653 }
 0x1f7   : > { %v1908_v17 = vsel %vm1907_vm5, %v1843_v10, %v1654_v48  ;;  %v4826_v30 = vmax.f32 %v1257_v22, 0.0 }
 0x1f8   : > { %v2055_v52 = vcombine.low %v1908_v17, %v1909_v33  ;;  %1529 = vrot.lane.b32.xlu1 %v4817_v55, %s3781_s22  ;;  %1719 = vrot.lane.b32.xlu0 %v4817_v55, %s3780_s9  ;;  %v4831_v32 = vcombine.high %v4817_v55, %v4817_v55 }
 0x1f9   : > { %v4845_v19 = vcombine.high %v4826_v30, %v4826_v30 }
 0x1fa   : > { %3522 = vmatprep.mubr.msk.f32.mxu0 %vm2087_vm6, %v2055_v52 }
 0x1fb   : > { %v1660_v61 = vpop.permute.xlu0 %1659 }
 0x1fc   : > { %v1911_v62 = vsel %vm1907_vm5, %v1846_v40, %v1660_v61  ;;  %1525 = vrot.lane.b32.xlu1 %v4826_v30, %s3781_s22  ;;  %1531 = vrot.lane.b32.xlu0 %v4831_v32, %s3781_s22 }
 0x1fd   : > { %v2056_v27 = vcombine.low %v1910_v57, %v1911_v62 }
 0x1ff   : > { %3523 = vmatmul.mubr.msk.f32.vlgmr.msra.gmra.mrb[32].mxu0 %vm2087_vm6, %v2056_v27 }
 0x200   : > { %1721 = vrot.lane.b32.xlu1 %v4831_v32, %s3780_s9  ;;  %1527 = vrot.lane.b32.xlu0 %v4845_v19, %s3781_s22 }
 0x203   : > { %v3479_v50 = vpop.f32.mrb[18].mxu0 }
 0x204   : > { %1717 = vrot.lane.b32.xlu1 %v4845_v19, %s3780_s9  ;;  %v1266_v3 = vpop.f32.mrb[19].mxu0  ;;  %v1272_v23 = vadd.f32 %v3479_v50, %v4553_v24 }
 0x205   : > { %v1267_v41 = vadd.f32 %v4553_v24, %v1266_v3 }
 0x206   : > { %v4882_v49 = vmax.f32 %v1272_v23, 0.0 }
 0x207   : > { %v4855_v34 = vmax.f32 %v1267_v41, 0.0 }
 0x208   : > { %1469 = vrot.lane.b32.xlu1 %v4622_v11, %s3781_s22  ;;  %v4895_v48 = vcombine.high %v4882_v49, %v4882_v49 }
 0x209   : > { %1723 = vrot.lane.b32.xlu0 %v4855_v34, %s3780_s9  ;;  %v4876_v26 = vcombine.high %v4855_v34, %v4855_v34 }
 0x20a   : > { %v1482_v28 = vpop.permute.xlu1 %1481  ;;  %v1672_v21 = vpop.permute.xlu0 %1671 }
 0x20b   : > { %v1853_v40 = vsel %vm1842_vm4, %v4657_v58, %v1482_v28 }
 0x20c   : > { %1533 = vrot.lane.b32.xlu1 %v4855_v34, %s3781_s22 }
 0x20d   : > { %1471 = vrot.lane.b32.xlu0 %v4865_v7, %s3781_s22 }
 0x20e   : > { %v1478_v39 = vpop.permute.xlu1 %1477  ;;  %v1484_v29 = vpop.permute.xlu0 %1483 }
 0x20f   : > { %v1851_v47 = vsel %vm1842_vm4, %v1402_v9, %v1478_v39  ;;  %v1854_v61 = vsel %vm1842_vm4, %v4638_v18, %v1484_v29 }
 0x210   : > { %1473 = vrot.lane.b32.xlu1 %v4871_v45, %s3781_s22 }
 0x211   : > { %1535 = vrot.lane.b32.xlu0 %v4876_v26, %s3781_s22 }
 0x212   : > { %v1674_v43 = vpop.permute.xlu1 %1673  ;;  %v1480_v16 = vpop.permute.xlu0 %1479 }
 0x213   : > { %v3482_v1 = vpop.f32.mrb[20].mxu0  ;;  %v1852_v56 = vsel %vm1842_vm4, %v4645_v25, %v1480_v16  ;;  %v1918_v27 = vsel %vm1907_vm5, %v1853_v40, %v1674_v43 }
 0x214   : > { %1537 = vrot.lane.b32.xlu1 %v4882_v49, %s3781_s22  ;;  %v1276_v42 = vpop.f32.mrb[21].mxu0  ;;  %v1917_v17 = vsel %vm1907_vm5, %v1852_v56, %v1672_v21  ;;  %v1282_v21 = vadd.f32 %v3482_v1, %v4553_v24 }
 0x215   : > { %1475 = vrot.lane.b32.xlu0 %v1402_v9, %s3781_s22  ;;  %v1277_v41 = vadd.f32 %v4553_v24, %v1276_v42 }
 0x216   : > { %v1670_v10 = vpop.permute.xlu1 %1669  ;;  %v4935_v1 = vmax.f32 %v1282_v21, 0.0 }
 0x217   : > { %v1916_v22 = vsel %vm1907_vm5, %v1851_v47, %v1670_v10  ;;  %v4923_v23 = vmax.f32 %v1277_v41, 0.0 }
 0x218   : > { %1661 = vrot.lane.b32.xlu1 %v4865_v7, %s3780_s9  ;;  %v2059_v33 = vcombine.low %v1916_v22, %v1917_v17  ;;  %v4954_v40 = vcombine.high %v4935_v1, %v4935_v1 }
 0x219   : > { %1539 = vrot.lane.b32.xlu0 %v4895_v48, %s3781_s22  ;;  %v4940_v47 = vcombine.high %v4923_v23, %v4923_v23 }
 0x21a   : > { %v1490_v52 = vpop.permute.xlu1 %1489  ;;  %3528 = vmatprep.mubr.msk.f32.mxu1 %vm2087_vm6, %v2059_v33  ;;  %v1680_v46 = vpop.permute.xlu0 %1679 }
 0x21c   : > { %1725 = vrot.lane.b32.xlu1 %v4876_v26, %s3780_s9 }
 0x21d   : > { %1663 = vrot.lane.b32.xlu0 %v4871_v45, %s3780_s9 }
 0x21e   : > { %v1486_v57 = vpop.permute.xlu1 %1485  ;;  %v1676_v62 = vpop.permute.xlu0 %1675 }
 0x21f   : > { %v1919_v50 = vsel %vm1907_vm5, %v1854_v61, %v1676_v62  ;;  %v1855_v39 = vsel %vm1842_vm4, %v4649_v44, %v1486_v57 }
 0x220   : > { %v2060_v3 = vcombine.low %v1918_v27, %v1919_v50  ;;  %1665 = vrot.lane.b32.xlu1 %v1402_v9, %s3780_s9 }
 0x221   : > { %1727 = vrot.lane.b32.xlu0 %v4882_v49, %s3780_s9 }
 0x222   : > { %v1682_v8 = vpop.permute.xlu1 %1681  ;;  %3529 = vmatmul.mubr.msk.f32.vlgmr.msra.gmra.mrb[0].mxu1 %vm2087_vm6, %v2060_v3  ;;  %v1492_v58 = vpop.permute.xlu0 %1491 }
 0x223   : > { %v3485_v28 = vpop.f32.mrb[22].mxu0  ;;  %v1858_v10 = vsel %vm1842_vm4, %v4666_v51, %v1492_v58 }
 0x224   : > { %1729 = vrot.lane.b32.xlu1 %v4895_v48, %s3780_s9  ;;  %v1286_v18 = vpop.f32.mrb[23].mxu0  ;;  %v1292_v27 = vadd.f32 %v3485_v28, %v4553_v24 }
 0x225   : > { %1667 = vrot.lane.b32.xlu0 %v4645_v25, %s3780_s9 }
 0x226   : > { %v1678_v29 = vpop.permute.xlu1 %1677  ;;  %v1488_v43 = vpop.permute.xlu0 %1487  ;;  %v4979_v28 = vmax.f32 %v1292_v27, 0.0 }
 0x227   : > { %v1920_v16 = vsel %vm1907_vm5, %v1855_v39, %v1678_v29  ;;  %v1856_v9 = vsel %vm1842_vm4, %v4673_v6, %v1488_v43  ;;  %v1857_v6 = vsel %vm1842_vm4, %v4689_v53, %v1490_v52  ;;  %v1287_v53 = vadd.f32 %v4553_v24, %v1286_v18 }
 0x228   : > { %v1921_v56 = vsel %vm1907_vm5, %v1856_v9, %v1680_v46  ;;  %1541 = vrot.lane.b32.xlu1 %v4923_v23, %s3781_s22  ;;  %v1922_v33 = vsel %vm1907_vm5, %v1857_v6, %v1682_v8  ;;  %v4998_v6 = vcombine.high %v4979_v28, %v4979_v28 }
 0x229   : > { %v2061_v25 = vcombine.low %v1920_v16, %v1921_v56  ;;  %1731 = vrot.lane.b32.xlu0 %v4923_v23, %s3780_s9  ;;  %v4967_v50 = vmax.f32 %v1287_v53, 0.0 }
 0x22a   : > { %v1498_v42 = vpop.permute.xlu1 %1497  ;;  %v1688_v44 = vpop.permute.xlu0 %1687 }
 0x22b   : > { %3531 = vmatprep.mubr.msk.f32.mxu1 %vm2087_vm6, %v2061_v25  ;;  %v4984_v43 = vcombine.high %v4967_v50, %v4967_v50 }
 0x22c   : > { %1545 = vrot.lane.b32.xlu1 %v4935_v1, %s3781_s22 }
 0x22d   : > { %1543 = vrot.lane.b32.xlu0 %v4940_v47, %s3781_s22 }
 0x22e   : > { %v1494_v22 = vpop.permute.xlu1 %1493  ;;  %v1684_v17 = vpop.permute.xlu0 %1683 }
 0x22f   : > { %v1923_v46 = vsel %vm1907_vm5, %v1858_v10, %v1684_v17  ;;  %v1859_v3 = vsel %vm1842_vm4, %v4681_v15, %v1494_v22 }
 0x230   : > { %v2062_v61 = vcombine.low %v1922_v33, %v1923_v46  ;;  %1733 = vrot.lane.b32.xlu1 %v4940_v47, %s3780_s9 }
 0x231   : > { %1547 = vrot.lane.b32.xlu0 %v4954_v40, %s3781_s22 }
 0x232   : > { %v1690_v51 = vpop.permute.xlu1 %1689  ;;  %3532 = vmatmul.mubr.msk.f32.gmra.mrb[2].mxu1 %vm2087_vm6, %v2062_v61  ;;  %v1500_v52 = vpop.permute.xlu0 %1499 }
 0x233   : > { %v3488_v57 = vpop.f32.mrb[24].mxu0  ;;  %v1862_v16 = vsel %vm1842_vm4, %v4696_v12, %v1500_v52 }
 0x234   : > { %1737 = vrot.lane.b32.xlu1 %v4954_v40, %s3780_s9  ;;  %v1296_v62 = vpop.f32.mrb[25].mxu0  ;;  %v1302_v33 = vadd.f32 %v3488_v57, %v4553_v24 }
 0x235   : > { %1735 = vrot.lane.b32.xlu0 %v4935_v1, %s3780_s9 }
 0x236   : > { %v1686_v41 = vpop.permute.xlu1 %1685  ;;  %v1496_v8 = vpop.permute.xlu0 %1495  ;;  %v5023_v57 = vmax.f32 %v1302_v33, 0.0 }
 0x237   : > { %v1924_v58 = vsel %vm1907_vm5, %v1859_v3, %v1686_v41  ;;  %v1860_v18 = vsel %vm1842_vm4, %v4703_v59, %v1496_v8  ;;  %v1861_v59 = vsel %vm1842_vm4, %v4719_v60, %v1498_v42  ;;  %v1297_v60 = vadd.f32 %v4553_v24, %v1296_v62 }
 0x238   : > { %v1925_v21 = vsel %vm1907_vm5, %v1860_v18, %v1688_v44  ;;  %1549 = vrot.lane.b32.xlu1 %v4967_v50, %s3781_s22  ;;  %v1926_v25 = vsel %vm1907_vm5, %v1861_v59, %v1690_v51  ;;  %v5042_v59 = vcombine.high %v5023_v57, %v5023_v57 }
 0x239   : > { %v2063_v39 = vcombine.low %v1924_v58, %v1925_v21  ;;  %1739 = vrot.lane.b32.xlu0 %v4967_v50, %s3780_s9  ;;  %v5011_v46 = vmax.f32 %v1297_v60, 0.0 }
 0x23a   : > { %v1506_v29 = vpop.permute.xlu1 %1505  ;;  %v1696_v15 = vpop.permute.xlu0 %1695 }
 0x23b   : > { %3534 = vmatprep.mubr.msk.f32.mxu1 %vm2087_vm6, %v2063_v39  ;;  %v5028_v8 = vcombine.high %v5011_v46, %v5011_v46 }
 0x23c   : > { %1553 = vrot.lane.b32.xlu1 %v4979_v28, %s3781_s22 }
 0x23d   : > { %1551 = vrot.lane.b32.xlu0 %v4984_v43, %s3781_s22 }
 0x23e   : > { %v1502_v9 = vpop.permute.xlu1 %1501  ;;  %v1692_v56 = vpop.permute.xlu0 %1691 }
 0x23f   : > { %v1927_v44 = vsel %vm1907_vm5, %v1862_v16, %v1692_v56  ;;  %v1863_v61 = vsel %vm1842_vm4, %v4711_v63, %v1502_v9 }
 0x240   : > { %v2064_v10 = vcombine.low %v1926_v25, %v1927_v44  ;;  %1741 = vrot.lane.b32.xlu1 %v4984_v43, %s3780_s9 }
 0x241   : > { %1555 = vrot.lane.b32.xlu0 %v4998_v6, %s3781_s22 }
 0x242   : > { %v1698_v12 = vpop.permute.xlu1 %1697  ;;  %3535 = vmatmul.mubr.msk.f32.gmra.mrb[4].mxu1 %vm2087_vm6, %v2064_v10  ;;  %v1508_v42 = vpop.permute.xlu0 %1507 }
 0x243   : > { %v3491_v22 = vpop.f32.mrb[26].mxu0  ;;  %v1866_v58 = vsel %vm1842_vm4, %v4726_v35, %v1508_v42 }
 0x244   : > { %1745 = vrot.lane.b32.xlu1 %v4998_v6, %s3780_s9  ;;  %v1306_v17 = vpop.f32.mrb[27].mxu0  ;;  %v1312_v25 = vadd.f32 %v3491_v22, %v4553_v24 }
 0x245   : > { %1743 = vrot.lane.b32.xlu0 %v4979_v28, %s3780_s9 }
 0x246   : > { %v1694_v53 = vpop.permute.xlu1 %1693  ;;  %v1504_v51 = vpop.permute.xlu0 %1503  ;;  %v5067_v22 = vmax.f32 %v1312_v25, 0.0 }
 0x247   : > { %v1928_v52 = vsel %vm1907_vm5, %v1863_v61, %v1694_v53  ;;  %v1864_v62 = vsel %vm1842_vm4, %v4733_v20, %v1504_v51  ;;  %v1865_v20 = vsel %vm1842_vm4, %v4749_v54, %v1506_v29  ;;  %v1307_v54 = vadd.f32 %v4553_v24, %v1306_v17 }
 0x248   : > { %v1929_v27 = vsel %vm1907_vm5, %v1864_v62, %v1696_v15  ;;  %1557 = vrot.lane.b32.xlu1 %v5011_v46, %s3781_s22  ;;  %v1930_v39 = vsel %vm1907_vm5, %v1865_v20, %v1698_v12  ;;  %v5086_v20 = vcombine.high %v5067_v22, %v5067_v22 }
 0x249   : > { %v2065_v3 = vcombine.low %v1928_v52, %v1929_v27  ;;  %1747 = vrot.lane.b32.xlu0 %v5011_v46, %s3780_s9  ;;  %v5055_v44 = vmax.f32 %v1307_v54, 0.0 }
 0x24a   : > { %v1514_v41 = vpop.permute.xlu1 %1513  ;;  %v1704_v63 = vpop.permute.xlu0 %1703 }
 0x24b   : > { %3537 = vmatprep.mubr.msk.f32.mxu1 %vm2087_vm6, %v2065_v3  ;;  %v5072_v51 = vcombine.high %v5055_v44, %v5055_v44 }
 0x24c   : > { %1561 = vrot.lane.b32.xlu1 %v5023_v57, %s3781_s22 }
 0x24d   : > { %1559 = vrot.lane.b32.xlu0 %v5028_v8, %s3781_s22 }
 0x24e   : > { %v1510_v18 = vpop.permute.xlu1 %1509  ;;  %v1700_v21 = vpop.permute.xlu0 %1699 }
 0x24f   : > { %v1931_v15 = vsel %vm1907_vm5, %v1866_v58, %v1700_v21  ;;  %v1867_v10 = vsel %vm1842_vm4, %v4741_v13, %v1510_v18 }
 0x250   : > { %v2066_v16 = vcombine.low %v1930_v39, %v1931_v15  ;;  %1749 = vrot.lane.b32.xlu1 %v5028_v8, %s3780_s9 }
 0x251   : > { %1563 = vrot.lane.b32.xlu0 %v5042_v59, %s3781_s22 }
 0x252   : > { %v1706_v35 = vpop.permute.xlu1 %1705  ;;  %3538 = vmatmul.mubr.msk.f32.gmra.mrb[6].mxu1 %vm2087_vm6, %v2066_v16  ;;  %v1516_v29 = vpop.permute.xlu0 %1515 }
 0x253   : > { %v1870_v52 = vsel %vm1842_vm4, %v4756_v2, %v1516_v29 }
 0x254   : > { %1753 = vrot.lane.b32.xlu1 %v5042_v59, %s3780_s9  ;;  %v3494_v9 = vpop.f32.mrb[28].mxu0 }
 0x255   : > { %1751 = vrot.lane.b32.xlu0 %v5023_v57, %s3780_s9  ;;  %v1316_v56 = vpop.f32.mrb[29].mxu0  ;;  %v1322_v16 = vadd.f32 %v3494_v9, %v4553_v24 }
 0x256   : > { %v1702_v60 = vpop.permute.xlu1 %1701  ;;  %v1512_v12 = vpop.permute.xlu0 %1511 }
 0x257   : > { %v1932_v42 = vsel %vm1907_vm5, %v1867_v10, %v1702_v60  ;;  %v1868_v17 = vsel %vm1842_vm4, %v4763_v4, %v1512_v12  ;;  %v1869_v4 = vsel %vm1842_vm4, %v4779_v5, %v1514_v41  ;;  %v1317_v5 = vadd.f32 %v4553_v24, %v1316_v56 }
 0x258   : > { %v1933_v33 = vsel %vm1907_vm5, %v1868_v17, %v1704_v63  ;;  %1565 = vrot.lane.b32.xlu1 %v5055_v44, %s3781_s22  ;;  %v1934_v3 = vsel %vm1907_vm5, %v1869_v4, %v1706_v35 }
 0x259   : > { %v2067_v61 = vcombine.low %v1932_v42, %v1933_v33  ;;  %1755 = vrot.lane.b32.xlu0 %v5055_v44, %s3780_s9  ;;  %v5103_v54 = vmax.f32 %v1317_v5, 0.0 }
 0x25a   : > { %v1522_v53 = vpop.permute.xlu1 %1521  ;;  %v1712_v13 = vpop.permute.xlu0 %1711 }
 0x25b   : > { %3540 = vmatprep.mubr.msk.f32.mxu1 %vm2087_vm6, %v2067_v61  ;;  %v1873_v15 = vsel %vm1842_vm4, %v4807_v31, %v1522_v53  ;;  %v5123_v33 = vcombine.high %v5103_v54, %v5103_v54 }
 0x25c   : > { %1569 = vrot.lane.b32.xlu1 %v5067_v22, %s3781_s22 }
 0x25d   : > { %1567 = vrot.lane.b32.xlu0 %v5072_v51, %s3781_s22 }
 0x25e   : > { %v1518_v62 = vpop.permute.xlu1 %1517  ;;  %v1708_v27 = vpop.permute.xlu0 %1707 }
 0x25f   : > { %v1935_v63 = vsel %vm1907_vm5, %v1870_v52, %v1708_v27  ;;  %v1871_v35 = vsel %vm1842_vm4, %v4771_v0, %v1518_v62  ;;  %v5118_v0 = vmax.f32 %v1322_v16, 0.0 }
 0x260   : > { %v2068_v58 = vcombine.low %v1934_v3, %v1935_v63  ;;  %1757 = vrot.lane.b32.xlu1 %v5072_v51, %s3780_s9 }
 0x261   : > { %1571 = vrot.lane.b32.xlu0 %v5086_v20, %s3781_s22  ;;  %v5132_v53 = vcombine.high %v5118_v0, %v5118_v0 }
 0x262   : > { %v1714_v2 = vpop.permute.xlu1 %1713  ;;  %3541 = vmatmul.mubr.msk.f32.gmra.mrb[8].mxu1 %vm2087_vm6, %v2068_v58  ;;  %v1524_v41 = vpop.permute.xlu0 %1523 }
 0x263   : > { %v1874_v18 = vsel %vm1842_vm4, %v4788_v37, %v1524_v41  ;;  %v1938_v56 = vsel %vm1907_vm5, %v1873_v15, %v1714_v2 }
 0x264   : > { %v3497_v21 = vpop.f32.mrb[30].mxu0  ;;  %1761 = vrot.lane.b32.xlu1 %v5086_v20, %s3780_s9  ;;  %v1939_v25 = vsel %vm1907_vm5, %v1874_v18, %v4786_v36 }
 0x265   : > { %v1326_v39 = vpop.f32.mrb[31].mxu0  ;;  %1759 = vrot.lane.b32.xlu0 %v5067_v22, %s3780_s9  ;;  %v2070_v12 = vcombine.low %v1938_v56, %v1939_v25  ;;  %v1332_v27 = vadd.f32 %v3497_v21, %v4553_v24 }
 0x266   : > { %v1710_v29 = vpop.permute.xlu1 %1709  ;;  %v1520_v37 = vpop.permute.xlu0 %1519 }
 0x267   : > { %v1936_v10 = vsel %vm1907_vm5, %v1871_v35, %v1710_v29  ;;  %v1872_v60 = vsel %vm1842_vm4, %v4795_v38, %v1520_v37 }
 0x268   : > { %v1937_v31 = vsel %vm1907_vm5, %v1872_v60, %v1712_v13  ;;  %1573 = vrot.lane.b32.xlu1 %v5103_v54, %s3781_s22  ;;  %v1327_v13 = vadd.f32 %v4553_v24, %v1326_v39 }
 0x269   : > { %v2069_v9 = vcombine.low %v1936_v10, %v1937_v31  ;;  %1763 = vrot.lane.b32.xlu0 %v5103_v54, %s3780_s9 }
 0x26a   : > { %v1530_v42 = vpop.permute.xlu1 %1529  ;;  %v1720_v17 = vpop.permute.xlu0 %1719  ;;  %v5146_v3 = vmax.f32 %v1327_v13, 0.0 }
 0x26b   : > { %3543 = vmatprep.mubr.msk.f32.mxu1 %vm2087_vm6, %v2069_v9  ;;  %v1877_v24 = vsel %vm1842_vm4, %v4845_v19, %v1530_v42 }
 0x26c   : > { %1577 = vrot.lane.b32.xlu1 %v5118_v0, %s3781_s22  ;;  %3544 = vmatmul.mubr.msk.f32.gmra.mrb[10].mxu1 %vm2087_vm6, %v2070_v12  ;;  %v5164_v15 = vcombine.high %v5146_v3, %v5146_v3 }
 0x26d   : > { %1575 = vrot.lane.b32.xlu0 %v5123_v33, %s3781_s22 }
 0x26e   : > { %v1526_v38 = vpop.permute.xlu1 %1525  ;;  %v1532_v61 = vpop.permute.xlu0 %1531 }
 0x26f   : > { %v1875_v63 = vsel %vm1842_vm4, 0.0, %v1526_v38  ;;  %v1878_v21 = vsel %vm1842_vm4, %v4817_v55, %v1532_v61 }
 0x270   : > { %1765 = vrot.lane.b32.xlu1 %v5123_v33, %s3780_s9 }
 0x271   : > { %1579 = vrot.lane.b32.xlu0 %v5132_v53, %s3781_s22 }
 0x272   : > { %v1722_v4 = vpop.permute.xlu1 %1721  ;;  %v1528_v52 = vpop.permute.xlu0 %1527 }
 0x273   : > { %v1876_v62 = vsel %vm1842_vm4, %v4826_v30, %v1528_v52  ;;  %v5155_v30 = vmax.f32 %v1332_v27, 0.0  ;;  %v1942_v16 = vsel %vm1907_vm5, %v1877_v24, %v1722_v4 }
 0x274   : > { %1769 = vrot.lane.b32.xlu1 %v5132_v53, %s3780_s9  ;;  %v1941_v2 = vsel %vm1907_vm5, %v1876_v62, %v1720_v17 }
 0x275   : > { %1767 = vrot.lane.b32.xlu0 %v5118_v0, %s3780_s9  ;;  %v1430_v37 = vcombine.high %v5155_v30, %v5155_v30 }
 0x276   : > { %v1718_v58 = vpop.permute.xlu1 %1717 }
 0x277   : > { %v1940_v5 = vsel %vm1907_vm5, %v1875_v63, %v1718_v58 }
 0x278   : > { %v2071_v41 = vcombine.low %v1940_v5, %v1941_v2  ;;  %1581 = vrot.lane.b32.xlu1 %v5146_v3, %s3781_s22 }
 0x279   : > { %1771 = vrot.lane.b32.xlu0 %v5146_v3, %s3780_s9 }
 0x27a   : > { %v1470_v18 = vpop.permute.xlu1 %1469  ;;  %3546 = vmatprep.mubr.msk.f32.mxu1 %vm2087_vm6, %v2071_v41 }
 0x27b   : > { %v1724_v39 = vpop.permute.xlu0 %1723  ;;  %v1847_v42 = vsel %vm1842_vm4, %v4593_v14, %v1470_v18 }
 0x27c   : > { %v1943_v35 = vsel %vm1907_vm5, %v1878_v21, %v1724_v39  ;;  %1585 = vrot.lane.b32.xlu1 %v5155_v30, %s3781_s22 }
 0x27d   : > { %v2072_v29 = vcombine.low %v1942_v16, %v1943_v35  ;;  %1583 = vrot.lane.b32.xlu0 %v5164_v15, %s3781_s22 }
 0x27e   : > { %v1534_v19 = vpop.permute.xlu1 %1533 }
 0x27f   : > { %3547 = vmatmul.mubr.msk.f32.gmra.mrb[12].mxu1 %vm2087_vm6, %v2072_v29  ;;  %v1472_v55 = vpop.permute.xlu0 %1471  ;;  %v1879_v62 = vsel %vm1842_vm4, %v4831_v32, %v1534_v19 }
 0x280   : > { %1773 = vrot.lane.b32.xlu1 %v5164_v15, %s3780_s9  ;;  %v1848_v17 = vsel %vm1842_vm4, %v4622_v11, %v1472_v55 }
 0x281   : > { %1587 = vrot.lane.b32.xlu0 %v1430_v37, %s3781_s22  ;;  %s3274_s22 = sshll.u32 %s5538_s21, 8 }
 0x282   : > { %v1474_v56 = vpop.permute.xlu1 %1473  ;;  %s5622_s23 = scalar_lea.vmem [#allocation2], %s3274_s22 }
 0x283   : > { %v1536_v25 = vpop.permute.xlu0 %1535  ;;  %v1849_v2 = vsel %vm1842_vm4, %v4865_v7, %v1474_v56  ;;  %s3159_s8 = sshll.u32 %s5622_s23, 4  ;;  %s6350_s8 = int_to_ptr.vmem [resolvable:$true] %s3159_s8 }
 0x284   : > { %1777 = vrot.lane.b32.xlu1 %v1430_v37, %s3780_s9  ;;  %v1880_v27 = vsel %vm1842_vm4, %v4855_v34, %v1536_v25  ;;  %s3681_s17 = scalar_lea.vmem %s6350_s8, 4096 }
 0x285   : > { %1775 = vrot.lane.b32.xlu0 %v5155_v30, %s3780_s9  ;;  %p3682_p11 = scmp.ne.s32.totalorder %s6350_s8, %s3681_s17 }
 0x286   : > { %v1538_v10 = vpop.permute.xlu1 %1537 }
 0x287   : > { %v1476_v60 = vpop.permute.xlu0 %1475  ;;  %v1881_v39 = vsel %vm1842_vm4, %v4876_v26, %v1538_v10  ;;  %p3683_p12 = pnand %p3682_p11, %p3870_p5 }
 0x288   : > { %v1850_v41 = vsel %vm1842_vm4, %v4871_v45, %v1476_v60 }
 0x289   : > { %p3684_p13 = pneg %p3683_p12 }
 0x28a   : > { %v1662_v31 = vpop.permute.xlu1 %1661 }
 0x28b   : > { %v1540_v9 = vpop.permute.xlu0 %1539  ;;  %v1912_v61 = vsel %vm1907_vm5, %v1847_v42, %v1662_v31 }
 0x28c   : > { %v1882_v16 = vsel %vm1842_vm4, %v4882_v49, %v1540_v9 }
 0x28e   : > { %v1726_v12 = vpop.permute.xlu1 %1725 }
 0x28f   : > { %v1664_v38 = vpop.permute.xlu0 %1663  ;;  %v1944_v14 = vsel %vm1907_vm5, %v1879_v62, %v1726_v12 }
 0x290   : > { %v1913_v13 = vsel %vm1907_vm5, %v1848_v17, %v1664_v38 }
 0x291   : > { %v2057_v4 = vcombine.low %v1912_v61, %v1913_v13 }
 0x292   : > { %v1666_v52 = vpop.permute.xlu1 %1665 }
 0x293   : > { %3525 = vmatprep.mubr.msk.f32.mxu0 %vm2087_vm6, %v2057_v4  ;;  %v1728_v63 = vpop.permute.xlu0 %1727  ;;  %v1914_v34 = vsel %vm1907_vm5, %v1849_v2, %v1666_v52 }
 0x294   : > { %v1945_v11 = vsel %vm1907_vm5, %v1880_v27, %v1728_v63 }
 0x295   : > { %v2073_v58 = vcombine.low %v1944_v14, %v1945_v11 }
 0x296   : > { %v1730_v5 = vpop.permute.xlu1 %1729 }
 0x297   : > { %3549 = vmatprep.mubr.msk.f32.mxu1 %vm2087_vm6, %v2073_v58  ;;  %v1668_v32 = vpop.permute.xlu0 %1667  ;;  %v1946_v45 = vsel %vm1907_vm5, %v1881_v39, %v1730_v5 }
 0x298   : > { %v1915_v18 = vsel %vm1907_vm5, %v1850_v41, %v1668_v32 }
 0x299   : > { %v2058_v24 = vcombine.low %v1914_v34, %v1915_v18 }
 0x29a   : > { %v1542_v21 = vpop.permute.xlu1 %1541 }
 0x29b   : > { %3526 = vmatmul.mubr.msk.f32.gmra.mrb[34].mxu0 %vm2087_vm6, %v2058_v24  ;;  %v1732_v7 = vpop.permute.xlu0 %1731  ;;  %v1883_v26 = vsel %vm1842_vm4, %v4895_v48, %v1542_v21 }
 0x29c   : > { %v1947_v35 = vsel %vm1907_vm5, %v1882_v16, %v1732_v7 }
 0x29d   : > { %v2074_v29 = vcombine.low %v1946_v45, %v1947_v35 }
 0x29e   : > { %v1546_v19 = vpop.permute.xlu1 %1545 }
 0x29f   : > { %3550 = vmatmul.mubr.msk.f32.gmra.mrb[14].mxu1 %vm2087_vm6, %v2074_v29  ;;  %v1544_v55 = vpop.permute.xlu0 %1543  ;;  %v1885_v42 = vsel %vm1842_vm4, %v4940_v47, %v1546_v19 }
 0x2a0   : > { %v1884_v49 = vsel %vm1842_vm4, %v4923_v23, %v1544_v55 }
 0x2a2   : > { %v1734_v37 = vpop.permute.xlu1 %1733 }
 0x2a3   : > { %v1548_v56 = vpop.permute.xlu0 %1547  ;;  %v1948_v60 = vsel %vm1907_vm5, %v1883_v26, %v1734_v37 }
 0x2a4   : > { %v1886_v17 = vsel %vm1842_vm4, %v4935_v1, %v1548_v56 }
 0x2a6   : > { %v1738_v25 = vpop.permute.xlu1 %1737 }
 0x2a7   : > { %v1736_v10 = vpop.permute.xlu0 %1735  ;;  %v1950_v48 = vsel %vm1907_vm5, %v1885_v42, %v1738_v25 }
 0x2a8   : > { %v1949_v31 = vsel %vm1907_vm5, %v1884_v49, %v1736_v10 }
 0x2a9   : > { %v2075_v9 = vcombine.low %v1948_v60, %v1949_v31 }
 0x2aa   : > { %v1550_v12 = vpop.permute.xlu1 %1549 }
 0x2ab   : > { %3552 = vmatprep.mubr.msk.f32.mxu1 %vm2087_vm6, %v2075_v9  ;;  %v1740_v38 = vpop.permute.xlu0 %1739  ;;  %v1887_v47 = vsel %vm1842_vm4, %v4954_v40, %v1550_v12 }
 0x2ac   : > { %v1951_v23 = vsel %vm1907_vm5, %v1886_v17, %v1740_v38 }
 0x2ad   : > { %v2076_v61 = vcombine.low %v1950_v48, %v1951_v23 }
 0x2ae   : > { %v1554_v13 = vpop.permute.xlu1 %1553 }
 0x2af   : > { %3553 = vmatmul.mubr.msk.f32.gmra.mrb[16].mxu1 %vm2087_vm6, %v2076_v61  ;;  %v1552_v4 = vpop.permute.xlu0 %1551  ;;  %v1889_v2 = vsel %vm1842_vm4, %v4984_v43, %v1554_v13 }
 0x2b0   : > { %v1888_v1 = vsel %vm1842_vm4, %v4967_v50, %v1552_v4 }
 0x2b2   : > { %v1742_v52 = vpop.permute.xlu1 %1741 }
 0x2b3   : > { %v1556_v62 = vpop.permute.xlu0 %1555  ;;  %v1952_v14 = vsel %vm1907_vm5, %v1887_v47, %v1742_v52 }
 0x2b4   : > { %v1890_v41 = vsel %vm1842_vm4, %v4979_v28, %v1556_v62 }
 0x2b6   : > { %v1746_v27 = vpop.permute.xlu1 %1745 }
 0x2b7   : > { %v1744_v63 = vpop.permute.xlu0 %1743  ;;  %v1954_v40 = vsel %vm1907_vm5, %v1889_v2, %v1746_v27 }
 0x2b8   : > { %v1953_v11 = vsel %vm1907_vm5, %v1888_v1, %v1744_v63 }
 0x2b9   : > { %v2077_v58 = vcombine.low %v1952_v14, %v1953_v11 }
 0x2ba   : > { %v1558_v5 = vpop.permute.xlu1 %1557 }
 0x2bb   : > { %3555 = vmatprep.mubr.msk.f32.mxu1 %vm2087_vm6, %v2077_v58  ;;  %v1748_v32 = vpop.permute.xlu0 %1747  ;;  %v1891_v43 = vsel %vm1842_vm4, %v4998_v6, %v1558_v5 }
 0x2bc   : > { %v1955_v50 = vsel %vm1907_vm5, %v1890_v41, %v1748_v32 }
 0x2bd   : > { %v2078_v34 = vcombine.low %v1954_v40, %v1955_v50 }
 0x2be   : > { %v1562_v18 = vpop.permute.xlu1 %1561 }
 0x2bf   : > { %3556 = vmatmul.mubr.msk.f32.gmra.mrb[18].mxu1 %vm2087_vm6, %v2078_v34  ;;  %v1560_v24 = vpop.permute.xlu0 %1559  ;;  %v1893_v55 = vsel %vm1842_vm4, %v5028_v8, %v1562_v18 }
 0x2c0   : > { %v1892_v28 = vsel %vm1842_vm4, %v5011_v46, %v1560_v24 }
 0x2c2   : > { %v1750_v21 = vpop.permute.xlu1 %1749 }
 0x2c3   : > { %v1564_v39 = vpop.permute.xlu0 %1563  ;;  %v1956_v45 = vsel %vm1907_vm5, %v1891_v43, %v1750_v21 }
 0x2c4   : > { %v1894_v37 = vsel %vm1842_vm4, %v5023_v57, %v1564_v39 }
 0x2c6   : > { %v1754_v16 = vpop.permute.xlu1 %1753 }
 0x2c7   : > { %v1752_v7 = vpop.permute.xlu0 %1751  ;;  %v1958_v6 = vsel %vm1907_vm5, %v1893_v55, %v1754_v16 }
 0x2c8   : > { %v1957_v35 = vsel %vm1907_vm5, %v1892_v28, %v1752_v7 }
 0x2c9   : > { %v2079_v29 = vcombine.low %v1956_v45, %v1957_v35 }
 0x2ca   : > { %v1566_v19 = vpop.permute.xlu1 %1565 }
 0x2cb   : > { %3558 = vmatprep.mubr.msk.f32.mxu1 %vm2087_vm6, %v2079_v29  ;;  %v1756_v56 = vpop.permute.xlu0 %1755  ;;  %v1895_v57 = vsel %vm1842_vm4, %v5042_v59, %v1566_v19 }
 0x2cc   : > { %v1959_v46 = vsel %vm1907_vm5, %v1894_v37, %v1756_v56 }
 0x2cd   : > { %v2080_v25 = vcombine.low %v1958_v6, %v1959_v46 }
 0x2ce   : > { %v1570_v26 = vpop.permute.xlu1 %1569 }
 0x2cf   : > { %3559 = vmatmul.mubr.msk.f32.gmra.mrb[20].mxu1 %vm2087_vm6, %v2080_v25  ;;  %v1568_v49 = vpop.permute.xlu0 %1567  ;;  %v1897_v61 = vsel %vm1842_vm4, %v5072_v51, %v1570_v26 }
 0x2d0   : > { %v1896_v12 = vsel %vm1842_vm4, %v5055_v44, %v1568_v49 }
 0x2d2   : > { %v1758_v10 = vpop.permute.xlu1 %1757  ;;  %v5251_v60 = vpop.f32.mrb[32].mxu0 }
 0x2d3   : > { %v5253_v31 = vpop.f32.mrb[33].mxu0  ;;  %v1572_v8 = vpop.permute.xlu0 %1571  ;;  %v1960_v17 = vsel %vm1907_vm5, %v1895_v57, %v1758_v10  ;;  %v5317_v57 = vld [vmem:[%s6541_s5] ss:$0 sm:$0xff] }
 0x2d4   : > { %v1898_v13 = vsel %vm1842_vm4, %v5067_v22, %v1572_v8 }
 0x2d6   : > { %v1762_v9 = vpop.permute.xlu1 %1761 }
 0x2d7   : > { %v1760_v42 = vpop.permute.xlu0 %1759  ;;  %v1962_v59 = vsel %vm1907_vm5, %v1897_v61, %v1762_v9  ;;  %v3782_v9 = vmov 2  }
 0x2d8   : > { %v1961_v38 = vsel %vm1907_vm5, %v1896_v12, %v1760_v42  ;;  %3668 = vset.pattern.permute.xlu1 %v3782_v9  ;;  %v3783_v12 = vmov 1   ;;  %v3784_v42 = vmov 0  }
 0x2d9   : > { %v2081_v48 = vcombine.low %v1960_v17, %v1961_v38  ;;  %3667 = vset.pattern.permute.xlu0 %v3783_v12  ;;  %2615 = vperm.xlu1 %3668, %v5317_v57  }
 0x2da   : > { %v1574_v23 = vpop.permute.xlu1 %1573  ;;  %2605 = vperm.xlu0 %3667, %v5317_v57  }
 0x2db   : > { %3561 = vmatprep.mubr.msk.f32.mxu1 %vm2087_vm6, %v2081_v48  ;;  %v1764_v4 = vpop.permute.xlu0 %1763  ;;  %v1899_v51 = vsel %vm1842_vm4, %v5086_v20, %v1574_v23 }
 0x2dc   : > { %v1963_v44 = vsel %vm1907_vm5, %v1898_v13, %v1764_v4  ;;  %v5329_v4 = vld [vmem:[%s6540_s4] ss:$0 sm:$0xff] }
 0x2dd   : > { %v2082_v52 = vcombine.low %v1962_v59, %v1963_v44  ;;  %v2224_v59 = vadd.f32 %v5251_v60, %v5329_v4  ;;  %v2219_v44 = vadd.f32 %v5329_v4, %v5253_v31 }
 0x2de   : > { %v1578_v62 = vpop.permute.xlu1 %1577  ;;  %3669 = vset.pattern.permute.xlu0 %v3784_v42 }
 0x2df   : > { %3562 = vmatmul.mubr.msk.f32.gmra.mrb[22].mxu1 %vm2087_vm6, %v2082_v52  ;;  %v1576_v27 = vpop.permute.xlu0 %1575  ;;  %v1901_v41 = vsel %vm1842_vm4, %v5123_v33, %v1578_v62  ;;  %2599 = vperm.xlu0 %3669, %v5317_v57   ;;  %v5336_v62 = vmax.f32 %v2224_v59, 0.0 }
 0x2e0   : > { %v1900_v22 = vsel %vm1842_vm4, %v5103_v54, %v1576_v27  ;;  %v5338_v27 = vmax.f32 %v2219_v44, 0.0 }
 0x2e2   : > { %v1766_v47 = vpop.permute.xlu1 %1765 }
 0x2e3   : > { %v1580_v1 = vpop.permute.xlu0 %1579  ;;  %v1964_v11 = vsel %vm1907_vm5, %v1899_v51, %v1766_v47  ;;  %3670 = vset.pattern.permute.xlu0 %v3783_v12 }
 0x2e4   : > { %v1902_v32 = vsel %vm1842_vm4, %v5118_v0, %v1580_v1  ;;  %3017 = vperm.xlu0 %3670, %v5317_v57   ;;  %v2506_v1 = vsel %vm1842_vm4, %v5336_v62, 0.0 }
 0x2e6   : > { %v1770_v63 = vpop.permute.xlu1 %1769 }
 0x2e7   : > { %v1768_v14 = vpop.permute.xlu0 %1767  ;;  %v1966_v20 = vsel %vm1907_vm5, %v1901_v41, %v1770_v63  ;;  %v2505_v63 = vsel %vm1842_vm4, %v5338_v27, 0.0 }
 0x2e8   : > { %v1965_v58 = vsel %vm1907_vm5, %v1900_v22, %v1768_v14  ;;  %3671 = vset.pattern.permute.xlu0 %v3784_v42  ;;  %v2507_v14 = vadd.f32 %v2506_v1, %v2505_v63 }
 0x2e9   : > { %v2083_v5 = vcombine.low %v1964_v11, %v1965_v58  ;;  %3011 = vperm.xlu0 %3671, %v5317_v57  }
 0x2ea   : > { %v1582_v2 = vpop.permute.xlu1 %1581 }
 0x2eb   : > { %3564 = vmatprep.mubr.msk.f32.mxu1 %vm2087_vm6, %v2083_v5  ;;  %v1772_v40 = vpop.permute.xlu0 %1771  ;;  %v1903_v28 = vsel %vm1842_vm4, %v5132_v53, %v1582_v2 }
 0x2ec   : > { %v1967_v54 = vsel %vm1907_vm5, %v1902_v32, %v1772_v40 }
 0x2ed   : > { %v2084_v50 = vcombine.low %v1966_v20, %v1967_v54  ;;  %3672 = vset.pattern.permute.xlu0 %v3782_v9 }
 0x2ee   : > { %v1586_v34 = vpop.permute.xlu1 %1585 }
 0x2ef   : > { %3565 = vmatmul.mubr.msk.f32.gmra.mrb[24].mxu1 %vm2087_vm6, %v2084_v50  ;;  %v1584_v18 = vpop.permute.xlu0 %1583  ;;  %v1905_v33 = vsel %vm1842_vm4, %v5164_v15, %v1586_v34 }
 0x2f0   : > { %v1904_v7 = vsel %vm1842_vm4, %v5146_v3, %v1584_v18 }
 0x2f2   : > { %v1774_v24 = vpop.permute.xlu1 %1773 }
 0x2f3   : > { %v1588_v21 = vpop.permute.xlu0 %1587  ;;  %v1968_v29 = vsel %vm1907_vm5, %v1903_v28, %v1774_v24 }
 0x2f4   : > { %v1906_v0 = vsel %vm1842_vm4, %v5155_v30, %v1588_v21 }
 0x2f5   : > { %v5283_v39 = vpop.f32.mrb[0].mxu1  ;;  %v1971_v15 = vsel %vm1907_vm5, %v1906_v0, %v4786_v36 }
 0x2f6   : > { %v1778_v16 = vpop.permute.xlu1 %1777  ;;  %v2238_v43 = vpop.f32.mrb[1].mxu1  ;;  %v2244_v2 = vadd.f32 %v5283_v39, %v5329_v4 }
 0x2f7   : > { %v1970_v45 = vsel %vm1907_vm5, %v1905_v33, %v1778_v16  ;;  %v1776_v35 = vpop.permute.xlu0 %1775  ;;  %v2239_v11 = vadd.f32 %v5329_v4, %v2238_v43 }
 0x2f8   : > { %v1969_v19 = vsel %vm1907_vm5, %v1904_v7, %v1776_v35  ;;  %v2086_v30 = vcombine.low %v1970_v45, %v1971_v15  ;;  %v5360_v20 = vmax.f32 %v2244_v2, 0.0 }
 0x2f9   : > { %v2085_v55 = vcombine.low %v1968_v29, %v1969_v19  ;;  %v5356_v41 = vmax.f32 %v2239_v11, 0.0 }
 0x2fa   : > { %v2514_v18 = vsel %vm1842_vm4, %v5360_v20, 0.0 }
 0x2fb   : > { %3567 = vmatprep.mubr.msk.f32.mxu1 %vm2087_vm6, %v2085_v55  ;;  %v2512_v54 = vsel %vm1842_vm4, %v5356_v41, 0.0 }
 0x2fc   : > { %3568 = vmatmul.mubr.msk.f32.gmra.mrb[26].mxu1 %vm2087_vm6, %v2086_v30 }
 0x305   : > { %v3533_v53 = vpop.f32.mrb[2].mxu1 }
 0x306   : > { %v2248_v37 = vpop.f32.mrb[3].mxu1  ;;  %v2254_v24 = vadd.f32 %v3533_v53, %v5329_v4 }
 0x307   : > { %v2249_v50 = vadd.f32 %v5329_v4, %v2248_v37 }
 0x308   : > { %v5373_v43 = vmax.f32 %v2254_v24, 0.0 }
 0x309   : > { %v5368_v21 = vmax.f32 %v2249_v50, 0.0 }
 0x30a   : > { %v2518_v55 = vsel %vm1842_vm4, %v5373_v43, 0.0 }
 0x30b   : > { %v2516_v28 = vsel %vm1842_vm4, %v5368_v21, 0.0 }
 0x315   : > { %v5300_v56 = vpop.f32.mrb[4].mxu1 }
 0x316   : > { %v2258_v3 = vpop.f32.mrb[5].mxu1  ;;  %v2264_v19 = vadd.f32 %v5300_v56, %v5329_v4 }
 0x317   : > { %v2259_v16 = vadd.f32 %v5329_v4, %v2258_v3 }
 0x319   : > { %v5382_v15 = vmax.f32 %v2259_v16, 0.0 }
 0x325   : > { %v5302_v6 = vpop.f32.mrb[6].mxu1 }
 0x326   : > { %v5304_v46 = vpop.f32.mrb[7].mxu1  ;;  %v2274_v59 = vadd.f32 %v5302_v6, %v5329_v4 }
 0x327   : > { %v2269_v56 = vadd.f32 %v5329_v4, %v5304_v46 }
 0x328   : > { %v5419_v6 = vmax.f32 %v2274_v59, 0.0 }
 0x32a   : > { %v2526_v24 = vsel %vm1842_vm4, %v5419_v6, 0.0 }
 0x335   : > { %v5306_v25 = vpop.f32.mrb[8].mxu1 }
 0x336   : > { %v5308_v26 = vpop.f32.mrb[9].mxu1 }
 0x337   : > { %v2279_v2 = vadd.f32 %v5329_v4, %v5308_v26 }
 0x339   : > { %v5437_v26 = vmax.f32 %v2279_v2, 0.0 }
 0x33f   : > { %v5310_v36 = vpop.f32.mrb[10].mxu1 }
 0x340   : > { %v5312_v49 = vpop.f32.mrb[11].mxu1 }
 0x352   : > { %v3548_v10 = vpop.f32.mrb[12].mxu1 }
 0x353   : > { %v2298_v8 = vpop.f32.mrb[13].mxu1  ;;  %v2304_v7 = vadd.f32 %v3548_v10, %v5329_v4  ;;  %v5392_v10 = vmax.f32 %v2264_v19, 0.0  ;;  %v2289_v19 = vadd.f32 %v5329_v4, %v5312_v49 }
 0x354   : > { %v2299_v45 = vadd.f32 %v5329_v4, %v2298_v8  ;;  %v2520_v8 = vsel %vm1842_vm4, %v5382_v15, 0.0 }
 0x355   : > { %v5386_v30 = vmax.f32 %v2304_v7, 0.0  ;;  %v2522_v46 = vsel %vm1842_vm4, %v5392_v10, 0.0 }
 0x356   : > { %v5388_v53 = vmax.f32 %v2299_v45, 0.0 }
 0x357   : > { %v2543_v9 = vsel %vm1842_vm4, %v5386_v30, 0.0 }
 0x358   : > { %v2542_v12 = vsel %vm1842_vm4, %v5388_v53, 0.0 }
 0x359   : > { %v2544_v44 = vadd.f32 %v2543_v9, %v2542_v12  ;;  %v2294_v12 = vadd.f32 %v5310_v36, %v5329_v4 }
 0x36e   : > { %v3527_v17 = vpop.f32.mrb[34].mxu0 }
 0x36f   : > { %v2228_v38 = vpop.f32.mrb[35].mxu0  ;;  %v2234_v51 = vadd.f32 %v3527_v17, %v5329_v4 }
 0x370   : > { %v2229_v52 = vadd.f32 %v5329_v4, %v2228_v38 }
 0x371   : > { %v5352_v58 = vmax.f32 %v2234_v51, 0.0 }
 0x372   : > { %v3551_v48 = vpop.f32.mrb[14].mxu1  ;;  %v5340_v47 = vmax.f32 %v2229_v52, 0.0  ;;  %v5410_v52 = vmax.f32 %v2269_v56, 0.0 }
 0x373   : > { %v2308_v23 = vpop.f32.mrb[15].mxu1  ;;  %v2510_v32 = vsel %vm1842_vm4, %v5352_v58, 0.0  ;;  %v2314_v42 = vadd.f32 %v3551_v48, %v5329_v4 }
 0x374   : > { %v2508_v31 = vsel %vm1842_vm4, %v5340_v47, 0.0  ;;  %v2309_v29 = vadd.f32 %v5329_v4, %v2308_v23 }
 0x375   : > { %v2509_v5 = vadd.f32 %v2508_v31, %v2507_v14  ;;  %v5412_v1 = vmax.f32 %v2314_v42, 0.0  ;;  %v5463_v42 = vmax.f32 %v2289_v19, 0.0 }
 0x376   : > { %v5390_v3 = vmax.f32 %v2309_v29, 0.0  ;;  %v2528_v29 = vsel %vm1842_vm4, %v5437_v26, 0.0 }
 0x377   : > { %v2511_v40 = vadd.f32 %v2510_v32, %v2509_v5  ;;  %v2524_v5 = vsel %vm1842_vm4, %v5410_v52, 0.0  ;;  %v2547_v32 = vsel %vm1842_vm4, %v5412_v1, 0.0  ;;  %v2532_v36 = vsel %vm1842_vm4, %v5463_v42, 0.0 }
 0x378   : > { %v2545_v23 = vsel %vm1842_vm4, %v5390_v3, 0.0 }
 0x379   : > { %v2513_v34 = vadd.f32 %v2512_v54, %v2511_v40  ;;  %v2546_v51 = vadd.f32 %v2545_v23, %v2544_v44 }
 0x37b   : > { %v2515_v39 = vadd.f32 %v2514_v18, %v2513_v34  ;;  %v2548_v50 = vadd.f32 %v2547_v32, %v2546_v51  ;;  %v2284_v34 = vadd.f32 %v5306_v25, %v5329_v4  ;;  %v5473_v51 = vmax.f32 %v2294_v12, 0.0 }
 0x37d   : > { %v2517_v35 = vadd.f32 %v2516_v28, %v2515_v39 }
 0x37f   : > { %v2519_v37 = vadd.f32 %v2518_v55, %v2517_v35  ;;  %v5446_v35 = vmax.f32 %v2284_v34, 0.0 }
 0x381   : > { %v2521_v38 = vadd.f32 %v2520_v8, %v2519_v37  ;;  %v2530_v9 = vsel %vm1842_vm4, %v5446_v35, 0.0 }
 0x382   : > { %v5324_v61 = vpop.f32.mrb[16].mxu1 }
 0x383   : > { %v2318_v13 = vpop.f32.mrb[17].mxu1  ;;  %v2523_v48 = vadd.f32 %v2522_v46, %v2521_v38  ;;  %v2324_v31 = vadd.f32 %v5324_v61, %v5329_v4 }
 0x384   : > { %v2319_v17 = vadd.f32 %v5329_v4, %v2318_v13 }
 0x385   : > { %v2525_v54 = vadd.f32 %v2524_v5, %v2523_v48  ;;  %v5429_v61 = vmax.f32 %v2324_v31, 0.0 }
 0x386   : > { %v5414_v63 = vmax.f32 %v2319_v17, 0.0 }
 0x387   : > { %v2527_v28 = vadd.f32 %v2526_v24, %v2525_v54  ;;  %v2551_v7 = vsel %vm1842_vm4, %v5429_v61, 0.0 }
 0x388   : > { %v2549_v40 = vsel %vm1842_vm4, %v5414_v63, 0.0 }
 0x389   : > { %v2550_v18 = vadd.f32 %v2549_v40, %v2548_v50  ;;  %v2529_v37 = vadd.f32 %v2528_v29, %v2527_v28  ;;  %v2534_v40 = vsel %vm1842_vm4, %v5473_v51, 0.0 }
 0x38b   : > { %v2552_v25 = vadd.f32 %v2551_v7, %v2550_v18  ;;  %v2531_v59 = vadd.f32 %v2530_v9, %v2529_v37 }
 0x392   : > { %v5347_v60 = vpop.f32.mrb[18].mxu1 }
 0x393   : > { %v2328_v22 = vpop.f32.mrb[19].mxu1  ;;  %v2334_v39 = vadd.f32 %v5347_v60, %v5329_v4 }
 0x394   : > { %v2329_v14 = vadd.f32 %v5329_v4, %v2328_v22 }
 0x395   : > { %v5452_v55 = vmax.f32 %v2334_v39, 0.0 }
 0x396   : > { %v5431_v22 = vmax.f32 %v2329_v14, 0.0 }
 0x397   : > { %v2555_v49 = vsel %vm1842_vm4, %v5452_v55, 0.0 }
 0x398   : > { %v2553_v45 = vsel %vm1842_vm4, %v5431_v22, 0.0 }
 0x3a2   : > { %v5370_v33 = vpop.f32.mrb[20].mxu1 }
 0x3a3   : > { %v2338_v0 = vpop.f32.mrb[21].mxu1  ;;  %v2344_v8 = vadd.f32 %v5370_v33, %v5329_v4 }
 0x3a4   : > { %v2339_v16 = vadd.f32 %v5329_v4, %v2338_v0  ;;  %v2554_v0 = vadd.f32 %v2553_v45, %v2552_v25 }
 0x3a5   : > { %v5469_v33 = vmax.f32 %v2344_v8, 0.0 }
 0x3a6   : > { %v5454_v60 = vmax.f32 %v2339_v16, 0.0  ;;  %v2556_v38 = vadd.f32 %v2555_v49, %v2554_v0 }
 0x3a7   : > { %v2559_v5 = vsel %vm1842_vm4, %v5469_v33, 0.0 }
 0x3a8   : > { %v2557_v17 = vsel %vm1842_vm4, %v5454_v60, 0.0 }
 0x3a9   : > { %v2558_v48 = vadd.f32 %v2557_v17, %v2556_v38 }
 0x3ab   : > { %v2560_v32 = vadd.f32 %v2559_v5, %v2558_v48 }
 0x3b2   : > { %v3563_v13 = vpop.f32.mrb[22].mxu1 }
 0x3b3   : > { %v2348_v11 = vpop.f32.mrb[23].mxu1  ;;  %v2354_v31 = vadd.f32 %v3563_v13, %v5329_v4 }
 0x3b4   : > { %v2349_v56 = vadd.f32 %v5329_v4, %v2348_v11  ;;  %v2533_v11 = vadd.f32 %v2532_v36, %v2531_v59 }
 0x3b5   : > { %v5485_v54 = vmax.f32 %v2354_v31, 0.0 }
 0x3b6   : > { %v5471_v44 = vmax.f32 %v2349_v56, 0.0  ;;  %v2535_v18 = vadd.f32 %v2534_v40, %v2533_v11 }
 0x3b7   : > { %v2563_v24 = vsel %vm1842_vm4, %v5485_v54, 0.0 }
 0x3b8   : > { %v2561_v2 = vsel %vm1842_vm4, %v5471_v44, 0.0  ;;  %v2536_v28 = vrot.slane %v2535_v18, 4 }
 0x3b9   : > { %v2562_v34 = vadd.f32 %v2561_v2, %v2560_v32 }
 0x3ba   : > { %v2537_v37 = vadd.f32 %v2536_v28, %v2535_v18  ;;  %v2616_v18 = vpop.permute.xlu1 %2615 }
 0x3bb   : > { %v2564_v16 = vadd.f32 %v2563_v24, %v2562_v34 }
 0x3bc   : > { %v2538_v38 = vrot.slane %v2537_v37, 2 }
 0x3c2   : > { %v3566_v23 = vpop.f32.mrb[24].mxu1 }
 0x3c3   : > { %v2358_v46 = vpop.f32.mrb[25].mxu1  ;;  %v2364_v13 = vadd.f32 %v3566_v23, %v5329_v4 }
 0x3c4   : > { %v2359_v14 = vadd.f32 %v5329_v4, %v2358_v46 }
 0x3c5   : > { %v5494_v7 = vmax.f32 %v2364_v13, 0.0 }
 0x3c6   : > { %v5487_v50 = vmax.f32 %v2359_v14, 0.0 }
 0x3c7   : > { %v2567_v8 = vsel %vm1842_vm4, %v5494_v7, 0.0 }
 0x3c8   : > { %v2565_v39 = vsel %vm1842_vm4, %v5487_v50, 0.0 }
 0x3c9   : > { %v2566_v25 = vadd.f32 %v2565_v39, %v2564_v16  ;;  %v2606_v39 = vpop.permute.xlu0 %2605 }
 0x3cb   : > { %v2568_v12 = vadd.f32 %v2567_v8, %v2566_v25 }
 0x3cd   : > { %v2600_v25 = vpop.permute.xlu0 %2599 }
 0x3cf   : > { %v3569_v45 = vpop.f32.mrb[26].mxu1 }
 0x3d0   : > { %v2374_v29 = vadd.f32 %v3569_v45, %v5329_v4  ;;  %v2368_v19 = vpop.f32.mrb[27].mxu1 }
 0x3d1   : > { %v2369_v0 = vadd.f32 %v5329_v4, %v2368_v19  ;;  %v2539_v4 = vadd.f32 %v2538_v38, %v2537_v37  ;;  %v3788_v38 = vmov 1966171168  }
 0x3d2   : > { %v5500_v56 = vmax.f32 %v2374_v29, 0.0 }
 0x3d3   : > { %v5502_v9 = vmax.f32 %v2369_v0, 0.0  ;;  %v2540_v36 = vrot.slane %v2539_v4, 1 }
 0x3d4   : > { %v2571_v23 = vsel %vm1842_vm4, %v5500_v56, 0.0 }
 0x3d5   : > { %v2569_v49 = vsel %vm1842_vm4, %v5502_v9, 0.0  ;;  %v2541_v11 = vadd.f32 %v2540_v36, %v2539_v4 }
 0x3d6   : > { %v2570_v17 = vadd.f32 %v2569_v49, %v2568_v12 }
 0x3d7   : > { %v2579_v32 = vmul.f32 0.0078125, %v2541_v11  ;;  %v2448_v11 = vcombine.high %v5373_v43, %v5373_v43 }
 0x3d8   : > { %v2572_v59 = vadd.f32 %v2571_v23, %v2570_v17  ;;  %v2632_v23 = vunpack.c.l.s4 %v3788_v38 }
 0x3da   : > { %v2573_v46 = vrot.slane %v2572_v59, 4 }
 0x3dc   : > { %v2574_v48 = vadd.f32 %v2573_v46, %v2572_v59  ;;  %v2634_v59 = vlaneseq  ;;  %v2633_v46 = vunpack.c.0.s8 %v2632_v23 }
 0x3de   : > { %v2575_v31 = vrot.slane %v2574_v48, 2  ;;  %v2635_v4 = vshrl.u32 %v2634_v59, 7 }
 0x3e0   : > { %v2576_v14 = vadd.f32 %v2575_v31, %v2574_v48  ;;  %v2441_v48 = vcombine.high %v5338_v27, %v5338_v27  ;;  %v5519_v36 = vsub.s32 %v2633_v46, %v2635_v4  ;;  %v2446_v31 = vcombine.high %v5360_v20, %v5360_v20 }
 0x3e2   : > { %v2577_v5 = vrot.slane %v2576_v14, 1  ;;  %6557 = vst [vmem:[#allocation8_spill] sm:$0xff] %v5519_v36 }
 0x3e4   : > { %v2578_v2 = vadd.f32 %v2577_v5, %v2576_v14  ;;  %v2445_v14 = vcombine.high %v5356_v41, %v5356_v41  ;;  %v2447_v5 = vcombine.high %v5368_v21, %v5368_v21 }
 0x3e6   : > { %v2580_v40 = vmul.f32 0.0078125, %v2578_v2  ;;  %v2450_v2 = vcombine.high %v5392_v10, %v5392_v10 }
 0x3e8   : > { %v2584_v34 = vsel %vm2583_vm7, %v2580_v40, %v2579_v32  ;;  %v2449_v32 = vcombine.high %v5382_v15, %v5382_v15  ;;  %v2452_v40 = vcombine.high %v5419_v6, %v5419_v6 }
 0x3e9   : > { %2585 = vrot.lane.b32.xlu1 %v2584_v34, %s3785_s18  ;;  %v2451_v34 = vcombine.high %v5410_v52, %v5410_v52 }
 0x45b   : > { %v2586_v13 = vpop.permute.xlu1 %2585 }
 0x45c   : > { %v2589_v24 = vsel %vm2588_vm8, 0.0, %v2586_v13  ;;  %v2454_v13 = vcombine.high %v5446_v35, %v5446_v35 }
 0x45d   : > { %v2591_v16 = vsel %vm2590_vm9, %v2589_v24, 0.0  ;;  %v2453_v24 = vcombine.high %v5437_v26, %v5437_v26 }
 0x45e   : > { %v2608_v28 = vmul.f32 %v2606_v39, %v2591_v16  ;;  %v2618_v45 = vmul.f32 %v2616_v18, %v2591_v16  ;;  %v2602_v19 = vmul.f32 %v2600_v25, %v2591_v16  ;;  %v2456_v39 = vcombine.high %v5473_v51, %v5473_v51 }
 0x45f   : > { %v2455_v16 = vcombine.high %v5463_v42, %v5463_v42  ;;  %v5552_v25 = vsub.s32 0, %v2635_v4 }
 0x460   : > { %2610 = vrot.lane.b32.xlu1 %v2608_v28, %s3786_s19  ;;  %v2458_v28 = vcombine.high %v5386_v30, %v5386_v30 }
 0x461   : > { %6558 = vst [vmem:[#allocation9_spill] sm:$0xff] %v5552_v25 }
 0x464   : > { %2620 = vrot.lane.b32.xlu1 %v2618_v45, %s3787_s20  ;;  %v2457_v45 = vcombine.high %v5388_v53, %v5388_v53 }
 0x468   : > { %3027 = vperm.xlu1 %3668, %v5317_v57   ;;  %v2442_v57 = vcombine.high %v5336_v62, %v5336_v62 }
 0x4d2   : > { %v2611_v29 = vpop.permute.xlu1 %2610 }
 0x4d3   : > { %v2613_v0 = vadd.f32 %v2611_v29, %v2602_v19  ;;  %v2444_v19 = vcombine.high %v5352_v58, %v5352_v58 }
 0x4d6   : > { %v2621_v37 = vpop.permute.xlu1 %2620 }
 0x4d7   : > { %v2623_v8 = vadd.f32 %v2621_v37, %v2613_v0  ;;  %v2443_v0 = vcombine.high %v5340_v47, %v5340_v47  ;;  %v2460_v37 = vcombine.high %v5412_v1, %v5412_v1 }
 0x4d9   : > { %v3347_v12 = vmul.f32 -1.442695, %v2623_v8  ;;  %v2459_v8 = vcombine.high %v5390_v3, %v5390_v3 }
 0x4db   : > { %3673 = vpow2.f32 %v3347_v12 }
 0x4e5   : > { %v3674_v49 = vpop.eup %3673 }
 0x4e6   : > { %v2627_v17 = vadd.f32 1.0, %v3674_v49 }
 0x4e8   : > { %3675 = vrcp.f32 %v2627_v17 }
 0x4f2   : > { %v3676_v18 = vpop.eup %3675 }
 0x4f3   : > { %v2637_v29 = vrot.slane %v3676_v18, %v5519_v36 }
 0x4f5   : > { %v2638_v17 = vcombine.high %v2637_v29, %v2637_v29  ;;  %v2645_v38 = vrot.slane %v2637_v29, %v5519_v36 }
 0x4f7   : > { %v2652_v29 = vrot.slane %v2638_v17, %v5519_v36  ;;  %v2656_v49 = vrot.slane %v2645_v38, %v5552_v25 }
 0x4f9   : > { %v5592_v18 = vrot.slane %v2652_v29, %v5552_v25  ;;  %v5595_v12 = vmul.f32 %v2656_v49, %v5338_v27  ;;  %v5597_v17 = vmul.f32 %v2656_v49, %v2441_v48  ;;  %v5600_v38 = vmul.f32 %v2656_v49, %v5336_v62 }
 0x4fa   : > { %v5602_v23 = vmul.f32 %v2656_v49, %v2442_v57  ;;  %v5605_v59 = vmul.f32 %v2656_v49, %v5340_v47  ;;  %v5607_v46 = vmul.f32 %v2656_v49, %v2443_v0  ;;  %v5610_v4 = vmul.f32 %v2656_v49, %v5352_v58 }
 0x4fb   : > { %v5612_v29 = vmul.f32 %v2656_v49, %v2444_v19  ;;  %v5615_v27 = vmul.f32 %v2656_v49, %v5356_v41  ;;  %v5617_v48 = vmul.f32 %v2656_v49, %v2445_v14  ;;  %v5620_v62 = vmul.f32 %v2656_v49, %v5360_v20  ;;  %2728 = vst.msk [vmem:[%s5622_s23] sm:$0xf] %vm2727_vm10, %v5595_v12 }
 0x4fc   : > { %2729 = vst.msk [vmem:[%s5622_s23 + $0x4] sm:$0xf] %vm2727_vm10, %v5597_v17  ;;  %2730 = vst.msk [vmem:[%s5622_s23 + $0x8] sm:$0xf] %vm2727_vm10, %v5600_v38  ;;  %v5633_v47 = vmul.f32 %v2656_v49, %v2446_v31  ;;  %v5636_v58 = vmul.f32 %v2656_v49, %v5368_v21  ;;  %v5638_v41 = vmul.f32 %v2656_v49, %v2447_v5 }
 0x4fd   : > { %v5641_v20 = vmul.f32 %v2656_v49, %v5373_v43  ;;  %2731 = vst.msk [vmem:[%s5622_s23 + $0xc] sm:$0xf] %vm2727_vm10, %v5602_v23  ;;  %2732 = vst.msk [vmem:[%s5622_s23 + $0x10] sm:$0xf] %vm2727_vm10, %v5605_v59  ;;  %v5655_v21 = vmul.f32 %v2656_v49, %v2448_v11  ;;  %v5658_v43 = vmul.f32 %v2656_v49, %v5382_v15 }
 0x4fe   : > { %2733 = vst.msk [vmem:[%s5622_s23 + $0x14] sm:$0xf] %vm2727_vm10, %v5607_v46  ;;  %2734 = vst.msk [vmem:[%s5622_s23 + $0x18] sm:$0xf] %vm2727_vm10, %v5610_v4  ;;  %v5660_v57 = vmul.f32 %v2656_v49, %v2449_v32  ;;  %v5663_v31 = vmul.f32 %v2656_v49, %v5392_v10  ;;  %v5680_v15 = vmul.f32 %v2656_v49, %v2450_v2 }
 0x4ff   : > { %2735 = vst.msk [vmem:[%s5622_s23 + $0x1c] sm:$0xf] %vm2727_vm10, %v5612_v29  ;;  %2736 = vst.msk [vmem:[%s5622_s23 + $0x20] sm:$0xf] %vm2727_vm10, %v5615_v27  ;;  %v5683_v14 = vmul.f32 %v2656_v49, %v5410_v52  ;;  %v5688_v11 = vmul.f32 %v2656_v49, %v2451_v34  ;;  %v5691_v5 = vmul.f32 %v2656_v49, %v5419_v6 }
 0x500   : > { %2737 = vst.msk [vmem:[%s5622_s23 + $0x24] sm:$0xf] %vm2727_vm10, %v5617_v48  ;;  %2738 = vst.msk [vmem:[%s5622_s23 + $0x28] sm:$0xf] %vm2727_vm10, %v5620_v62  ;;  %v5708_v10 = vmul.f32 %v2656_v49, %v2452_v40  ;;  %v5711_v52 = vmul.f32 %v2656_v49, %v5437_v26  ;;  %v5716_v2 = vmul.f32 %v2656_v49, %v2453_v24 }
 0x501   : > { %2739 = vst.msk [vmem:[%s5622_s23 + $0x2c] sm:$0xf] %vm2727_vm10, %v5633_v47  ;;  %2740 = vst.msk [vmem:[%s5622_s23 + $0x30] sm:$0xf] %vm2727_vm10, %v5636_v58  ;;  %v5719_v32 = vmul.f32 %v2656_v49, %v5446_v35  ;;  %v5736_v6 = vmul.f32 %v2656_v49, %v2454_v13  ;;  %v5739_v26 = vmul.f32 %v2656_v49, %v5463_v42 }
 0x502   : > { %2741 = vst.msk [vmem:[%s5622_s23 + $0x34] sm:$0xf] %vm2727_vm10, %v5638_v41  ;;  %2742 = vst.msk [vmem:[%s5622_s23 + $0x38] sm:$0xf] %vm2727_vm10, %v5641_v20  ;;  %v5744_v40 = vmul.f32 %v2656_v49, %v2455_v16  ;;  %v5747_v34 = vmul.f32 %v2656_v49, %v5473_v51  ;;  %v5764_v35 = vmul.f32 %v2656_v49, %v2456_v39 }
 0x503   : > { %2743 = vst.msk [vmem:[%s5622_s23 + $0x3c] sm:$0xf] %vm2727_vm10, %v5655_v21  ;;  %2744 = vst.msk [vmem:[%s5622_s23 + $0x40] sm:$0xf] %vm2727_vm10, %v5658_v43  ;;  %v5768_v42 = vmul.f32 %v5592_v18, %v5388_v53  ;;  %v5774_v13 = vmul.f32 %v5592_v18, %v2457_v45  ;;  %v5778_v24 = vmul.f32 %v5592_v18, %v5386_v30 }
 0x504   : > { %2745 = vst.msk [vmem:[%s5622_s23 + $0x44] sm:$0xf] %vm2727_vm10, %v5660_v57  ;;  %2746 = vst.msk [vmem:[%s5622_s23 + $0x48] sm:$0xf] %vm2727_vm10, %v5663_v31  ;;  %v5796_v53 = vmul.f32 %v5592_v18, %v2458_v28  ;;  %v5800_v51 = vmul.f32 %v5592_v18, %v5390_v3  ;;  %v5806_v39 = vmul.f32 %v5592_v18, %v2459_v8 }
 0x505   : > { %2747 = vst.msk [vmem:[%s5622_s23 + $0x4c] sm:$0xf] %vm2727_vm10, %v5680_v15  ;;  %2748 = vst.msk [vmem:[%s5622_s23 + $0x50] sm:$0xf] %vm2727_vm10, %v5683_v14  ;;  %v5810_v16 = vmul.f32 %v5592_v18, %v5412_v1  ;;  %v5828_v30 = vmul.f32 %v5592_v18, %v2460_v37  ;;  %v5832_v3 = vmul.f32 %v5592_v18, %v5414_v63 }
 0x506   : > { %2749 = vst.msk [vmem:[%s5622_s23 + $0x54] sm:$0xf] %vm2727_vm10, %v5688_v11  ;;  %2750 = vst.msk [vmem:[%s5622_s23 + $0x58] sm:$0xf] %vm2727_vm10, %v5691_v5  ;;  %v6559_v28 = vcombine.high %v5414_v63, %v5414_v63  ;;  %v5842_v19 = vmul.f32 %v5592_v18, %v5429_v61  ;;  %v6561_v1 = vcombine.high %v5429_v61, %v5429_v61 }
 0x507   : > { %2751 = vst.msk [vmem:[%s5622_s23 + $0x5c] sm:$0xf] %vm2727_vm10, %v5708_v10  ;;  %2752 = vst.msk [vmem:[%s5622_s23 + $0x60] sm:$0xf] %vm2727_vm10, %v5711_v52  ;;  %v5864_v0 = vmul.f32 %v5592_v18, %v5431_v22  ;;  %v6562_v37 = vcombine.high %v5431_v22, %v5431_v22  ;;  %v5874_v49 = vmul.f32 %v5592_v18, %v5452_v55 }
 0x508   : > { %2753 = vst.msk [vmem:[%s5622_s23 + $0x64] sm:$0xf] %vm2727_vm10, %v5716_v2  ;;  %2754 = vst.msk [vmem:[%s5622_s23 + $0x68] sm:$0xf] %vm2727_vm10, %v5719_v32  ;;  %v5838_v45 = vmul.f32 %v5592_v18, %v6559_v28  ;;  %v5860_v63 = vmul.f32 %v5592_v18, %v6561_v1  ;;  %v6565_v61 = vcombine.high %v5452_v55, %v5452_v55 }
 0x509   : > { %2755 = vst.msk [vmem:[%s5622_s23 + $0x6c] sm:$0xf] %vm2727_vm10, %v5736_v6  ;;  %2756 = vst.msk [vmem:[%s5622_s23 + $0x70] sm:$0xf] %vm2727_vm10, %v5739_v26  ;;  %v5870_v8 = vmul.f32 %v5592_v18, %v6562_v37  ;;  %v5896_v28 = vmul.f32 %v5592_v18, %v5454_v60  ;;  %v6566_v1 = vcombine.high %v5454_v60, %v5454_v60 }
 0x50a   : > { %2757 = vst.msk [vmem:[%s5622_s23 + $0x74] sm:$0xf] %vm2727_vm10, %v5744_v40  ;;  %2758 = vst.msk [vmem:[%s5622_s23 + $0x78] sm:$0xf] %vm2727_vm10, %v5747_v34  ;;  %v5892_v22 = vmul.f32 %v5592_v18, %v6565_v61  ;;  %v5906_v25 = vmul.f32 %v5592_v18, %v5469_v33  ;;  %v6569_v55 = vcombine.high %v5469_v33, %v5469_v33 }
 0x50b   : > { %6560 = vst [vmem:[#allocation10_spill] sm:$0xff] %v5842_v19  ;;  %2759 = vst.msk [vmem:[%s5622_s23 + $0x7c] sm:$0xf] %vm2727_vm10, %v5764_v35  ;;  %v5902_v37 = vmul.f32 %v5592_v18, %v6566_v1  ;;  %v5928_v61 = vmul.f32 %v5592_v18, %v5471_v44  ;;  %v6570_v1 = vcombine.high %v5471_v44, %v5471_v44 }
 0x50c   : > { %2760 = vst.msk [vmem:[%s5622_s23 + $0x80] sm:$0xf] %vm2727_vm10, %v5768_v42  ;;  %2761 = vst.msk [vmem:[%s5622_s23 + $0x84] sm:$0xf] %vm2727_vm10, %v5774_v13  ;;  %v5924_v60 = vmul.f32 %v5592_v18, %v6569_v55  ;;  %v6571_v33 = vcombine.high %v5485_v54, %v5485_v54  ;;  %v5960_v55 = vmul.f32 %v5592_v18, %v5487_v50 }
 0x50d   : > { %2762 = vst.msk [vmem:[%s5622_s23 + $0x88] sm:$0xf] %vm2727_vm10, %v5778_v24  ;;  %6563 = vst [vmem:[#allocation11_spill] sm:$0xff] %v5870_v8  ;;  %v5934_v36 = vmul.f32 %v5592_v18, %v6570_v1  ;;  %v6572_v1 = vcombine.high %v5487_v50, %v5487_v50 }
 0x50e   : > { %6564 = vst [vmem:[#allocation12_spill] sm:$0xff] %v5874_v49  ;;  %2763 = vst.msk [vmem:[%s5622_s23 + $0x8c] sm:$0xf] %vm2727_vm10, %v5796_v53  ;;  %v5956_v44 = vmul.f32 %v5592_v18, %v6571_v33  ;;  %v5992_v33 = vmul.f32 %v5592_v18, %v5502_v9 }
 0x50f   : > { %2764 = vst.msk [vmem:[%s5622_s23 + $0x90] sm:$0xf] %vm2727_vm10, %v5800_v51  ;;  %2765 = vst.msk [vmem:[%s5622_s23 + $0x94] sm:$0xf] %vm2727_vm10, %v5806_v39 }
 0x510   : > { %2766 = vst.msk [vmem:[%s5622_s23 + $0x98] sm:$0xf] %vm2727_vm10, %v5810_v16  ;;  %6567 = vst [vmem:[#allocation13_spill] sm:$0xff] %v5902_v37 }
 0x511   : > { %6568 = vst [vmem:[#allocation14_spill] sm:$0xff] %v5906_v25  ;;  %2767 = vst.msk [vmem:[%s5622_s23 + $0x9c] sm:$0xf] %vm2727_vm10, %v5828_v30 }
 0x512   : > { %2768 = vst.msk [vmem:[%s5622_s23 + $0xa0] sm:$0xf] %vm2727_vm10, %v5832_v3  ;;  %2769 = vst.msk [vmem:[%s5622_s23 + $0xa4] sm:$0xf] %vm2727_vm10, %v5838_v45 }
 0x513   : > { %2770 = vst.msk [vmem:[%s5622_s23 + $0xa8] sm:$0xf] %vm2727_vm10, %v5842_v19  ;;  %v5938_v19 = vmul.f32 %v5592_v18, %v5485_v54  ;;  %2771 = vst.msk [vmem:[%s5622_s23 + $0xac] sm:$0xf] %vm2727_vm10, %v5860_v63  ;;  %v6573_v54 = vcombine.high %v5494_v7, %v5494_v7 }
 0x514   : > { %2772 = vst.msk [vmem:[%s5622_s23 + $0xb0] sm:$0xf] %vm2727_vm10, %v5864_v0  ;;  %2773 = vst.msk [vmem:[%s5622_s23 + $0xb4] sm:$0xf] %vm2727_vm10, %v5870_v8  ;;  %v5966_v8 = vmul.f32 %v5592_v18, %v6572_v1  ;;  %v6574_v1 = vcombine.high %v5502_v9, %v5502_v9 }
 0x515   : > { %2774 = vst.msk [vmem:[%s5622_s23 + $0xb8] sm:$0xf] %vm2727_vm10, %v5874_v49  ;;  %v5970_v49 = vmul.f32 %v5592_v18, %v5494_v7  ;;  %2775 = vst.msk [vmem:[%s5622_s23 + $0xbc] sm:$0xf] %vm2727_vm10, %v5892_v22  ;;  %v5988_v50 = vmul.f32 %v5592_v18, %v6573_v54  ;;  %v6576_v7 = vcombine.high %v5500_v56, %v5500_v56  ;;  %v2795_v54 = vsel %vm2727_vm10, %v5600_v38, -inf }
 0x516   : > { %2776 = vst.msk [vmem:[%s5622_s23 + $0xc0] sm:$0xf] %vm2727_vm10, %v5896_v28  ;;  %2777 = vst.msk [vmem:[%s5622_s23 + $0xc4] sm:$0xf] %vm2727_vm10, %v5902_v37  ;;  %v5998_v37 = vmul.f32 %v5592_v18, %v6574_v1  ;;  %v2796_v1 = vsel %vm2727_vm10, %v5602_v23, -inf  ;;  %v6071_v38 = vsel %vm2727_vm10, %v5617_v48, -inf }
 0x517   : > { %2778 = vst.msk [vmem:[%s5622_s23 + $0xc8] sm:$0xf] %vm2727_vm10, %v5906_v25  ;;  %v6002_v25 = vmul.f32 %v5592_v18, %v5500_v56  ;;  %2779 = vst.msk [vmem:[%s5622_s23 + $0xcc] sm:$0xf] %vm2727_vm10, %v5924_v60  ;;  %v6020_v9 = vmul.f32 %v5592_v18, %v6576_v7  ;;  %v2792_v56 = vsel %vm2727_vm10, %v5595_v12, -inf  ;;  %v2793_v18 = vsel %vm2727_vm10, %v5597_v17, -inf }
 0x518   : > { %2780 = vst.msk [vmem:[%s5622_s23 + $0xd0] sm:$0xf] %vm2727_vm10, %v5928_v61  ;;  %2781 = vst.msk [vmem:[%s5622_s23 + $0xd4] sm:$0xf] %vm2727_vm10, %v5934_v36  ;;  %v2798_v7 = vsel %vm2727_vm10, %v5605_v59, -inf  ;;  %v2802_v12 = vsel %vm2727_vm10, %v5612_v29, -inf }
 0x519   : > { %6575 = vst [vmem:[#allocation15_spill] sm:$0xff] %v6002_v25  ;;  %2782 = vst.msk [vmem:[%s5622_s23 + $0xd8] sm:$0xf] %vm2727_vm10, %v5938_v19  ;;  %v6067_v17 = vsel %vm2727_vm10, %v5615_v27, -inf  ;;  %v6075_v23 = vsel %vm2727_vm10, %v5620_v62, -inf  ;;  %v2808_v59 = vsel %vm2727_vm10, %v5633_v47, -inf }
 0x51a   : > { %6577 = vst [vmem:[#allocation16_spill] sm:$0xff] %v6020_v9  ;;  %2783 = vst.msk [vmem:[%s5622_s23 + $0xdc] sm:$0xf] %vm2727_vm10, %v5956_v44  ;;  %v2813_v29 = vsel %vm2727_vm10, %v5641_v20, -inf  ;;  %v2814_v27 = vsel %vm2727_vm10, %v5655_v21, -inf  ;;  %v6089_v48 = vsel %vm2727_vm10, %v5658_v43, -inf }
 0x51b   : > { %2784 = vst.msk [vmem:[%s5622_s23 + $0xe0] sm:$0xf] %vm2727_vm10, %v5960_v55  ;;  %2785 = vst.msk [vmem:[%s5622_s23 + $0xe4] sm:$0xf] %vm2727_vm10, %v5966_v8  ;;  %v6093_v62 = vsel %vm2727_vm10, %v5660_v57, -inf  ;;  %v6097_v47 = vsel %vm2727_vm10, %v5663_v31, -inf }
 0x51c   : > { %2786 = vst.msk [vmem:[%s5622_s23 + $0xe8] sm:$0xf] %vm2727_vm10, %v5970_v49  ;;  %2787 = vst.msk [vmem:[%s5622_s23 + $0xec] sm:$0xf] %vm2727_vm10, %v5988_v50  ;;  %v6107_v20 = vsel %vm2727_vm10, %v5688_v11, -inf  ;;  %v6111_v21 = vsel %vm2727_vm10, %v5691_v5, -inf }
 0x51d   : > { %2788 = vst.msk [vmem:[%s5622_s23 + $0xf0] sm:$0xf] %vm2727_vm10, %v5992_v33  ;;  %2789 = vst.msk [vmem:[%s5622_s23 + $0xf4] sm:$0xf] %vm2727_vm10, %v5998_v37  ;;  %v2826_v43 = vsel %vm2727_vm10, %v5708_v10, -inf  ;;  %v6117_v57 = vsel %vm2727_vm10, %v5711_v52, -inf }
 0x51e   : > { %2790 = vst.msk [vmem:[%s5622_s23 + $0xf8] sm:$0xf] %vm2727_vm10, %v6002_v25  ;;  %2791 = vst.msk [vmem:[%s5622_s23 + $0xfc] sm:$0xf] %vm2727_vm10, %v6020_v9  ;;  %v2799_v25 = vsel %vm2727_vm10, %v5607_v46, -inf  ;;  %v2801_v9 = vsel %vm2727_vm10, %v5610_v4, -inf }
 0x51f   : > { %v2810_v46 = vsel %vm2727_vm10, %v5636_v58, -inf  ;;  %v2811_v4 = vsel %vm2727_vm10, %v5638_v41, -inf  ;;  %v2820_v58 = vsel %vm2727_vm10, %v5680_v15, -inf  ;;  %v6103_v41 = vsel %vm2727_vm10, %v5683_v14, -inf  ;;  %6578 = vst [vmem:[#allocation17_spill] sm:$0xff] %v6111_v21  ;;  %6579 = vst [vmem:[#allocation18_spill] sm:$0xff] %v6117_v57 }
 0x520   : > { %v6121_v31 = vsel %vm2727_vm10, %v5716_v2, -inf  ;;  %v6125_v15 = vsel %vm2727_vm10, %v5719_v32, -inf  ;;  %v2832_v14 = vsel %vm2727_vm10, %v5736_v6, -inf  ;;  %v6131_v11 = vsel %vm2727_vm10, %v5739_v26, -inf }
 0x521   : > { %6580 = vst [vmem:[#allocation19_spill] sm:$0xff] %v6121_v31  ;;  %6581 = vst [vmem:[#allocation20_spill] sm:$0xff] %v6125_v15  ;;  %v6135_v5 = vsel %vm2727_vm10, %v5744_v40, -inf  ;;  %v6139_v10 = vsel %vm2727_vm10, %v5747_v34, -inf  ;;  %v6143_v52 = vsel %vm2727_vm10, %v5764_v35, -inf  ;;  %v2840_v2 = vsel %vm2727_vm10, %v5768_v42, -inf }
 0x522   : > { %6582 = vst [vmem:[#allocation21_spill] sm:$0xff] %v6131_v11  ;;  %6583 = vst [vmem:[#allocation22_spill] sm:$0xff] %v6135_v5  ;;  %v2841_v32 = vsel %vm2727_vm10, %v5774_v13, -inf  ;;  %v2843_v6 = vsel %vm2727_vm10, %v5778_v24, -inf  ;;  %v2844_v26 = vsel %vm2727_vm10, %v5796_v53, -inf  ;;  %v2846_v40 = vsel %vm2727_vm10, %v5800_v51, -inf }
 0x523   : > { %6584 = vst [vmem:[#allocation23_spill] sm:$0xff] %v6139_v10  ;;  %6585 = vst [vmem:[#allocation24_spill] sm:$0xff] %v6143_v52  ;;  %v2847_v34 = vsel %vm2727_vm10, %v5806_v39, -inf  ;;  %v2849_v35 = vsel %vm2727_vm10, %v5810_v16, -inf  ;;  %v2850_v42 = vsel %vm2727_vm10, %v5828_v30, -inf  ;;  %v2852_v13 = vsel %vm2727_vm10, %v5832_v3, -inf }
 0x524   : > { %v2853_v24 = vsel %vm2727_vm10, %v5838_v45, -inf  ;;  %v6586_v10 = vld [vmem:[#allocation10_spill] sm:$0xff]  ;;  %v2856_v51 = vsel %vm2727_vm10, %v5860_v63, -inf  ;;  %v2858_v39 = vsel %vm2727_vm10, %v5864_v0, -inf  ;;  %v6587_v52 = vld [vmem:[#allocation11_spill] sm:$0xff]  ;;  %v6588_v11 = vld [vmem:[#allocation12_spill] sm:$0xff]  ;;  %v6201_v57 = vmax.f32 %v2792_v56, %v2793_v18 }
 0x525   : > { %v2855_v53 = vsel %vm2727_vm10, %v6586_v10, -inf  ;;  %v2859_v16 = vsel %vm2727_vm10, %v6587_v52, -inf  ;;  %v2861_v30 = vsel %vm2727_vm10, %v6588_v11, -inf  ;;  %v2862_v3 = vsel %vm2727_vm10, %v5892_v22, -inf  ;;  %v6589_v5 = vld [vmem:[#allocation13_spill] sm:$0xff]  ;;  %v6590_v15 = vld [vmem:[#allocation14_spill] sm:$0xff] }
 0x526   : > { %v2864_v45 = vsel %vm2727_vm10, %v5896_v28, -inf  ;;  %v2865_v10 = vsel %vm2727_vm10, %v6589_v5, -inf  ;;  %v2867_v63 = vsel %vm2727_vm10, %v6590_v15, -inf  ;;  %v2868_v0 = vsel %vm2727_vm10, %v5924_v60, -inf  ;;  %v6591_v56 = vld [vmem:[#allocation15_spill] sm:$0xff]  ;;  %v6592_v18 = vld [vmem:[#allocation16_spill] sm:$0xff] }
 0x527   : > { %v2870_v52 = vsel %vm2727_vm10, %v5928_v61, -inf  ;;  %v2871_v11 = vsel %vm2727_vm10, %v5934_v36, -inf  ;;  %v2873_v22 = vsel %vm2727_vm10, %v5938_v19, -inf  ;;  %v2874_v28 = vsel %vm2727_vm10, %v5956_v44, -inf }
 0x528   : > { %v2876_v5 = vsel %vm2727_vm10, %v5960_v55, -inf  ;;  %v2877_v15 = vsel %vm2727_vm10, %v5966_v8, -inf  ;;  %v2879_v60 = vsel %vm2727_vm10, %v5970_v49, -inf  ;;  %v2880_v61 = vsel %vm2727_vm10, %v5988_v50, -inf }
 0x529   : > { %v6203_v36 = vmax.f32 %v2795_v54, %v2796_v1  ;;  %v6205_v19 = vmax.f32 %v2798_v7, %v2799_v25  ;;  %v6207_v31 = vmax.f32 %v2801_v9, %v2802_v12  ;;  %v6209_v44 = vmax.f32 %v2840_v2, %v2841_v32 }
 0x52a   : > { %v6211_v55 = vmax.f32 %v2843_v6, %v2844_v26  ;;  %v6213_v21 = vmax.f32 %v2846_v40, %v2847_v34  ;;  %v6215_v8 = vmax.f32 %v2849_v35, %v2850_v42  ;;  %v2882_v49 = vsel %vm2727_vm10, %v5992_v33, -inf  ;;  %v6596_v6 = vld [vmem:[#allocation20_spill] sm:$0xff]  ;;  %v6597_v42 = vld [vmem:[#allocation22_spill] sm:$0xff] }
 0x52b   : > { %v2883_v50 = vsel %vm2727_vm10, %v5998_v37, -inf  ;;  %v2885_v25 = vsel %vm2727_vm10, %v6591_v56, -inf  ;;  %v2886_v9 = vsel %vm2727_vm10, %v6592_v18, -inf  ;;  %v6227_v54 = vmax.f32 %v6067_v17, %v6071_v38 }
 0x52c   : > { %v6230_v1 = vmax.f32 %v6075_v23, %v2808_v59  ;;  %v6232_v7 = vmax.f32 %v2810_v46, %v2811_v4  ;;  %v6234_v12 = vmax.f32 %v2813_v29, %v2814_v27  ;;  %v6236_v33 = vmax.f32 %v2852_v13, %v2853_v24  ;;  %v6593_v4 = vld [vmem:[#allocation17_spill] sm:$0xff] }
 0x52d   : > { %v6238_v37 = vmax.f32 %v2855_v53, %v2856_v51  ;;  %v2920_v2 = vcombine.low %v6201_v57, %v6203_v36  ;;  %v2921_v32 = vcombine.low %v6205_v19, %v6207_v31  ;;  %v6246_v17 = vmax.f32 %v6089_v48, %v6093_v62  ;;  %v6594_v62 = vld [vmem:[#allocation19_spill] sm:$0xff]  ;;  %v6598_v13 = vld [vmem:[#allocation21_spill] sm:$0xff] }
 0x52e   : > { %v6249_v38 = vmax.f32 %v6097_v47, %v2820_v58  ;;  %v2928_v23 = vcombine.low %v6209_v44, %v6211_v55  ;;  %v2929_v59 = vcombine.low %v6213_v21, %v6215_v8  ;;  %v6257_v46 = vmax.f32 %v6103_v41, %v6107_v20  ;;  %v6595_v47 = vld [vmem:[#allocation18_spill] sm:$0xff]  ;;  %v6600_v53 = vld [vmem:[#allocation23_spill] sm:$0xff] }
 0x52f   : > { %v6260_v29 = vmax.f32 %v6593_v4, %v2826_v43  ;;  %v6262_v27 = vmax.f32 %v2858_v39, %v2859_v16  ;;  %v6264_v48 = vmax.f32 %v2861_v30, %v2862_v3  ;;  %v6268_v58 = vmax.f32 %v6595_v47, %v6594_v62 }
 0x530   : > { %v6271_v26 = vmax.f32 %v6596_v6, %v2832_v14  ;;  %v6273_v40 = vmax.f32 %v2864_v45, %v2865_v10  ;;  %v6275_v34 = vmax.f32 %v2867_v63, %v2868_v0  ;;  %v2922_v41 = vcombine.low %v6227_v54, %v6230_v1  ;;  %v6599_v14 = vld [vmem:[#allocation24_spill] sm:$0xff] }
 0x531   : > { %v2930_v20 = vcombine.low %v6236_v33, %v6238_v37  ;;  %v2952_v43 = vsel %vm1842_vm4, %v2920_v2, 0.0  ;;  %v2953_v35 = vsel %vm1842_vm4, %v2921_v32, 0.0  ;;  %v6285_v24 = vmax.f32 %v6598_v13, %v6597_v42 }
 0x532   : > { %v6289_v51 = vmax.f32 %v6600_v53, %v6599_v14  ;;  %v2973_v39 = vsel %vm1842_vm4, %v2928_v23, 0.0  ;;  %v2974_v16 = vsel %vm1842_vm4, %v2929_v59, 0.0  ;;  %v6293_v30 = vmax.f32 %v2870_v52, %v2871_v11 }
 0x533   : > { %v6295_v3 = vmax.f32 %v2873_v22, %v2874_v28  ;;  %v2923_v45 = vcombine.low %v6232_v7, %v6234_v12  ;;  %v2931_v10 = vcombine.low %v6262_v27, %v6264_v48  ;;  %v6301_v63 = vmax.f32 %v2876_v5, %v2877_v15 }
 0x534   : > { %v6303_v0 = vmax.f32 %v2879_v60, %v2880_v61  ;;  %v2954_v56 = vadd.f32 %v2953_v35, %v2952_v43  ;;  %v2975_v18 = vadd.f32 %v2974_v16, %v2973_v39  ;;  %v2924_v2 = vcombine.low %v6246_v17, %v6249_v38 }
 0x535   : > { %v2932_v52 = vcombine.low %v6273_v40, %v6275_v34  ;;  %v2955_v11 = vsel %vm1842_vm4, %v2922_v41, 0.0  ;;  %v2976_v22 = vsel %vm1842_vm4, %v2930_v20, 0.0  ;;  %v6311_v28 = vmax.f32 %v2882_v49, %v2883_v50 }
 0x536   : > { %v6313_v32 = vmax.f32 %v2885_v25, %v2886_v9  ;;  %v2956_v5 = vadd.f32 %v2955_v11, %v2954_v56  ;;  %v2977_v15 = vadd.f32 %v2976_v22, %v2975_v18  ;;  %v2925_v60 = vcombine.low %v6257_v46, %v6260_v29 }
 0x537   : > { %v2933_v61 = vcombine.low %v6293_v30, %v6295_v3  ;;  %v2957_v23 = vsel %vm1842_vm4, %v2923_v45, 0.0  ;;  %v2978_v59 = vsel %vm1842_vm4, %v2931_v10, 0.0  ;;  %v2926_v49 = vcombine.low %v6268_v58, %v6271_v26 }
 0x538   : > { %v2958_v4 = vadd.f32 %v2957_v23, %v2956_v5  ;;  %v2979_v62 = vadd.f32 %v2978_v59, %v2977_v15  ;;  %v2934_v50 = vcombine.low %v6301_v63, %v6303_v0  ;;  %v2959_v25 = vsel %vm1842_vm4, %v2924_v2, 0.0 }
 0x539   : > { %v2980_v9 = vsel %vm1842_vm4, %v2932_v52, 0.0  ;;  %v2927_v41 = vcombine.low %v6285_v24, %v6289_v51  ;;  %v2935_v20 = vcombine.low %v6311_v28, %v6313_v32  ;;  %v2961_v43 = vsel %vm1842_vm4, %v2925_v60, 0.0 }
 0x53a   : > { %v2960_v47 = vadd.f32 %v2959_v25, %v2958_v4  ;;  %v2981_v6 = vadd.f32 %v2980_v9, %v2979_v62  ;;  %v2982_v35 = vsel %vm1842_vm4, %v2933_v61, 0.0  ;;  %v2963_v14 = vsel %vm1842_vm4, %v2926_v49, 0.0  ;;  %v3028_v9 = vpop.permute.xlu1 %3027 }
 0x53b   : > { %v2984_v53 = vsel %vm1842_vm4, %v2934_v50, 0.0  ;;  %v2965_v45 = vsel %vm1842_vm4, %v2927_v41, 0.0  ;;  %v2986_v10 = vsel %vm1842_vm4, %v2935_v20, 0.0  ;;  %v3018_v41 = vpop.permute.xlu0 %3017 }
 0x53c   : > { %v2962_v42 = vadd.f32 %v2961_v43, %v2960_v47  ;;  %v2983_v13 = vadd.f32 %v2982_v35, %v2981_v6 }
 0x53e   : > { %v2964_v39 = vadd.f32 %v2963_v14, %v2962_v42  ;;  %v2985_v16 = vadd.f32 %v2984_v53, %v2983_v13 }
 0x540   : > { %v2966_v56 = vadd.f32 %v2965_v45, %v2964_v39  ;;  %v2987_v18 = vadd.f32 %v2986_v10, %v2985_v16 }
 0x542   : > { %v2967_v2 = vrot.slane %v2966_v56, 4  ;;  %v2988_v52 = vrot.slane %v2987_v18, 4 }
 0x544   : > { %v2968_v11 = vadd.f32 %v2967_v2, %v2966_v56  ;;  %v2989_v22 = vadd.f32 %v2988_v52, %v2987_v18 }
 0x546   : > { %v2969_v5 = vrot.slane %v2968_v11, 2  ;;  %v2990_v15 = vrot.slane %v2989_v22, 2 }
 0x548   : > { %v2970_v60 = vadd.f32 %v2969_v5, %v2968_v11  ;;  %v2991_v61 = vadd.f32 %v2990_v15, %v2989_v22 }
 0x54a   : > { %v2971_v23 = vrot.slane %v2970_v60, 1  ;;  %v2992_v59 = vrot.slane %v2991_v61, 1 }
 0x54c   : > { %v2972_v4 = vadd.f32 %v2971_v23, %v2970_v60  ;;  %v2993_v62 = vadd.f32 %v2992_v59, %v2991_v61 }
 0x54e   : > { %v2994_v49 = vmul.f32 0.015625, %v2972_v4  ;;  %v2995_v50 = vmul.f32 0.015625, %v2993_v62 }
 0x550   : > { %v2998_v25 = vsel %vm2583_vm7, %v2995_v50, %v2994_v49 }
 0x551   : > { %2999 = vrot.lane.b32.xlu1 %v2998_v25, %s3785_s18  ;;  %s3789_s18 = smov [#allocation2]  }
 0x5c3   : > { %v3000_v47 = vpop.permute.xlu1 %2999 }
 0x5c4   : > { %v3002_v6 = vsel %vm2588_vm8, 0.0, %v3000_v47 }
 0x5c5   : > { %v3003_v20 = vsel %vm2590_vm9, %v3002_v6, 0.0 }
 0x5c6   : > { %v3020_v43 = vmul.f32 %v3018_v41, %v3003_v20  ;;  %v3030_v35 = vmul.f32 %v3028_v9, %v3003_v20 }
 0x5c8   : > { %3022 = vrot.lane.b32.xlu1 %v3020_v43, %s3786_s19  ;;  %s3685_s19 = sshll.u32 %s3789_s18, 4  ;;  %s3686_s19 = int_to_ptr.vmem [resolvable:$false] %s3685_s19 }
 0x5c9   : > { %p3688_p0 = scmp.lt.s32.totalorder %s6350_s8, %s3686_s19 }
 0x5cc   : > { %3032 = vrot.lane.b32.xlu1 %v3030_v35, %s3787_s20  ;;  %s3687_s20 = scalar_lea.vmem %s3686_s19, 8192 }
 0x5cd   : > { %p3689_p1 = scmp.lt.s32.totalorder %s3687_s20, %s3681_s17 }
 0x5cf   : > { %p3690_p2 = por %p3689_p1, %p3688_p0 }
 0x5d1   : > { %p3691_p3 = pnand %p3690_p2, %p3684_p13 }
 0x5d3   : > { %3694 = shalt.err (!%p3691_p3)
}
 0x5d4   : > { %s3695_s22 = scalar_lea.hbm %s6348_s15, 4096  ;;  %s3699_s13 = scalar_lea.hbm %s6542_s6, 8192 }
 0x5d5   : > { %p3696_p4 = scmp.ne.s32.totalorder %s6348_s15, %s3695_s22  ;;  %p3700_p9 = scmp.lt.u32.totalorder %s6348_s15, %s6542_s6 }
 0x5d6   : > { %p3701_p10 = scmp.lt.u32.totalorder %s3699_s13, %s3695_s22  ;;  %p3703_p12 = scmp.lt.u32.totalorder %s3695_s22, %s6348_s15 }
 0x5d7   : > { %p3697_p7 = pnand %p3696_p4, %p3870_p5 }
 0x5d8   : > { %p3702_p11 = por %p3701_p10, %p3700_p9 }
 0x5d9   : > { %p3698_p8 = pneg %p3697_p7 }
 0x5da   : > { %p3704_p13 = por %p3703_p12, %p3702_p11 }
 0x5dc   : > { %p3705_p0 = pnand %p3704_p13, %p3698_p8 }
 0x5de   : > { %3708 = shalt.err (!%p3705_p0)
}
 0x5df   : > { %s3790_s17 = smov 4   ;;  %v3012_v42 = vpop.permute.xlu0 %3011  ;;  %v6601_v2 = vld [vmem:[#allocation8_spill] sm:$0xff]  ;;  %s3275_s19 = sshll.u32 %s5538_s21, 7  ;;  %v6602_v15 = vld [vmem:[#allocation9_spill] sm:$0xff] }
 0x5e0   : > { %3610 = dma.vmem_to_hbm [thread:$0]  (%p3870_p5), %s6350_s8, 4096, %s6348_s15, %s3140_s16, %s3780_s9, %s3780_s9, %s3790_s17   ;;  %v3014_v14 = vmul.f32 %v3012_v42, %v3003_v20 }
 0x5e1   : > { %s6396_s8 = scalar_lea.vmem [#allocation4], %s3275_s19  ;;  %s3364_s15 = sshll.u32 %s3853_s28, 11 }
 0x5e2   : > { %s3176_s16 = sshll.u32 %s6396_s8, 4  ;;  %s6478_s22 = scalar_lea.hbm %s6543_s7, %s3364_s15  ;;  %s6480_s16 = int_to_ptr.vmem [resolvable:$true] %s3176_s16 }
 0x5e3   : > { %s3145_s23 = scalar_lea.sflag [#allocation5], %s5538_s21  ;;  %s3709_s29 = scalar_lea.vmem %s6480_s16, 2048 }
 0x5e4   : > { %p3710_p1 = scmp.ne.s32.totalorder %s6480_s16, %s3709_s29  ;;  %s3791_s13 = smov [#allocation4]  }
 0x5e5   : > { %s3713_s14 = sshll.u32 %s3791_s13, 4  ;;  %s3714_s14 = int_to_ptr.vmem [resolvable:$false] %s3713_s14 }
 0x5e6   : > { %p3711_p2 = pnand %p3710_p1, %p3870_p5  ;;  %s3715_s18 = scalar_lea.vmem %s3714_s14, 4096 }
 0x5e7   : > { %p3716_p4 = scmp.lt.s32.totalorder %s6480_s16, %s3714_s14  ;;  %p3717_p7 = scmp.lt.s32.totalorder %s3715_s18, %s3709_s29 }
 0x5e8   : > { %p3712_p3 = pneg %p3711_p2 }
 0x5e9   : > { %p3718_p8 = por %p3717_p7, %p3716_p4 }
 0x5eb   : > { %p3719_p9 = pnand %p3718_p8, %p3712_p3 }
 0x63a   : > { %v3023_v13 = vpop.permute.xlu1 %3022 }
 0x63b   : > { %v3025_v53 = vadd.f32 %v3023_v13, %v3014_v14 }
 0x63e   : > { %v3033_v39 = vpop.permute.xlu1 %3032 }
 0x63f   : > { %v3035_v16 = vadd.f32 %v3033_v39, %v3025_v53 }
 0x641   : > { %v3349_v45 = vmul.f32 -1.442695, %v3035_v16 }
 0x643   : > { %3677 = vpow2.f32 %v3349_v45 }
 0x64d   : > { %v3678_v10 = vpop.eup %3677 }
 0x64e   : > { %v3039_v56 = vadd.f32 1.0, %v3678_v10 }
 0x650   : > { %3679 = vrcp.f32 %v3039_v56 }
 0x65a   : > { %v3680_v18 = vpop.eup %3679 }
 0x65b   : > { %v3049_v52 = vrot.slane %v3680_v18, %v6601_v2 }
 0x65d   : > { %v3050_v11 = vcombine.high %v3049_v52, %v3049_v52  ;;  %v3057_v22 = vrot.slane %v3049_v52, %v6601_v2 }
 0x65f   : > { %v3064_v5 = vrot.slane %v3050_v11, %v6601_v2  ;;  %v3068_v60 = vrot.slane %v3057_v22, %v6602_v15 }
 0x661   : > { %v3072_v61 = vrot.slane %v3064_v5, %v6602_v15  ;;  %v3075_v23 = vmul.f32 %v3068_v60, %v6201_v57  ;;  %v3076_v59 = vmul.f32 %v3068_v60, %v6203_v36  ;;  %v3077_v4 = vmul.f32 %v3068_v60, %v6205_v19 }
 0x662   : > { %v3078_v62 = vmul.f32 %v3068_v60, %v6207_v31  ;;  %v3079_v49 = vmul.f32 %v3068_v60, %v6227_v54  ;;  %v3080_v50 = vmul.f32 %v3068_v60, %v6230_v1  ;;  %v3081_v25 = vmul.f32 %v3068_v60, %v6232_v7 }
 0x663   : > { %v3082_v9 = vmul.f32 %v3068_v60, %v6234_v12  ;;  %v3083_v47 = vmul.f32 %v3068_v60, %v6246_v17  ;;  %v3084_v6 = vmul.f32 %v3068_v60, %v6249_v38  ;;  %v3085_v57 = vmul.f32 %v3068_v60, %v6257_v46  ;;  %3107 = vst.msk [vmem:[%s6396_s8] sm:$0xf] %vm2727_vm10, %v3075_v23 }
 0x664   : > { %3108 = vst.msk [vmem:[%s6396_s8 + $0x4] sm:$0xf] %vm2727_vm10, %v3076_v59  ;;  %3109 = vst.msk [vmem:[%s6396_s8 + $0x8] sm:$0xf] %vm2727_vm10, %v3077_v4  ;;  %v3086_v31 = vmul.f32 %v3068_v60, %v6260_v29  ;;  %v3087_v36 = vmul.f32 %v3068_v60, %v6268_v58  ;;  %v3088_v19 = vmul.f32 %v3068_v60, %v6271_v26 }
 0x665   : > { %v3089_v54 = vmul.f32 %v3068_v60, %v6285_v24  ;;  %3110 = vst.msk [vmem:[%s6396_s8 + $0xc] sm:$0xf] %vm2727_vm10, %v3078_v62  ;;  %3111 = vst.msk [vmem:[%s6396_s8 + $0x10] sm:$0xf] %vm2727_vm10, %v3079_v49  ;;  %v3090_v1 = vmul.f32 %v3068_v60, %v6289_v51  ;;  %v3091_v7 = vmul.f32 %v3072_v61, %v6209_v44 }
 0x666   : > { %3112 = vst.msk [vmem:[%s6396_s8 + $0x14] sm:$0xf] %vm2727_vm10, %v3080_v50  ;;  %3113 = vst.msk [vmem:[%s6396_s8 + $0x18] sm:$0xf] %vm2727_vm10, %v3081_v25  ;;  %v3092_v12 = vmul.f32 %v3072_v61, %v6211_v55  ;;  %v3093_v17 = vmul.f32 %v3072_v61, %v6213_v21  ;;  %v3094_v38 = vmul.f32 %v3072_v61, %v6215_v8 }
 0x667   : > { %3114 = vst.msk [vmem:[%s6396_s8 + $0x1c] sm:$0xf] %vm2727_vm10, %v3082_v9  ;;  %3115 = vst.msk [vmem:[%s6396_s8 + $0x20] sm:$0xf] %vm2727_vm10, %v3083_v47  ;;  %v3095_v44 = vmul.f32 %v3072_v61, %v6236_v33  ;;  %v3096_v55 = vmul.f32 %v3072_v61, %v6238_v37  ;;  %v3097_v21 = vmul.f32 %v3072_v61, %v6262_v27 }
 0x668   : > { %3116 = vst.msk [vmem:[%s6396_s8 + $0x24] sm:$0xf] %vm2727_vm10, %v3084_v6  ;;  %3117 = vst.msk [vmem:[%s6396_s8 + $0x28] sm:$0xf] %vm2727_vm10, %v3085_v57  ;;  %v3098_v8 = vmul.f32 %v3072_v61, %v6264_v48  ;;  %v3099_v33 = vmul.f32 %v3072_v61, %v6273_v40  ;;  %v3100_v37 = vmul.f32 %v3072_v61, %v6275_v34 }
 0x669   : > { %3118 = vst.msk [vmem:[%s6396_s8 + $0x2c] sm:$0xf] %vm2727_vm10, %v3086_v31  ;;  %3119 = vst.msk [vmem:[%s6396_s8 + $0x30] sm:$0xf] %vm2727_vm10, %v3087_v36  ;;  %v3101_v46 = vmul.f32 %v3072_v61, %v6293_v30  ;;  %v3102_v29 = vmul.f32 %v3072_v61, %v6295_v3  ;;  %v3103_v27 = vmul.f32 %v3072_v61, %v6301_v63 }
 0x66a   : > { %3120 = vst.msk [vmem:[%s6396_s8 + $0x34] sm:$0xf] %vm2727_vm10, %v3088_v19  ;;  %3121 = vst.msk [vmem:[%s6396_s8 + $0x38] sm:$0xf] %vm2727_vm10, %v3089_v54  ;;  %v3104_v48 = vmul.f32 %v3072_v61, %v6303_v0  ;;  %v3105_v58 = vmul.f32 %v3072_v61, %v6311_v28  ;;  %v3106_v26 = vmul.f32 %v3072_v61, %v6313_v32 }
 0x66b   : > { %3122 = vst.msk [vmem:[%s6396_s8 + $0x3c] sm:$0xf] %vm2727_vm10, %v3090_v1  ;;  %3123 = vst.msk [vmem:[%s6396_s8 + $0x40] sm:$0xf] %vm2727_vm10, %v3091_v7 }
 0x66c   : > { %3124 = vst.msk [vmem:[%s6396_s8 + $0x44] sm:$0xf] %vm2727_vm10, %v3092_v12  ;;  %3125 = vst.msk [vmem:[%s6396_s8 + $0x48] sm:$0xf] %vm2727_vm10, %v3093_v17 }
 0x66d   : > { %3126 = vst.msk [vmem:[%s6396_s8 + $0x4c] sm:$0xf] %vm2727_vm10, %v3094_v38  ;;  %3127 = vst.msk [vmem:[%s6396_s8 + $0x50] sm:$0xf] %vm2727_vm10, %v3095_v44 }
 0x66e   : > { %3128 = vst.msk [vmem:[%s6396_s8 + $0x54] sm:$0xf] %vm2727_vm10, %v3096_v55  ;;  %3129 = vst.msk [vmem:[%s6396_s8 + $0x58] sm:$0xf] %vm2727_vm10, %v3097_v21 }
 0x66f   : > { %3130 = vst.msk [vmem:[%s6396_s8 + $0x5c] sm:$0xf] %vm2727_vm10, %v3098_v8  ;;  %3131 = vst.msk [vmem:[%s6396_s8 + $0x60] sm:$0xf] %vm2727_vm10, %v3099_v33 }
 0x670   : > { %3132 = vst.msk [vmem:[%s6396_s8 + $0x64] sm:$0xf] %vm2727_vm10, %v3100_v37  ;;  %3133 = vst.msk [vmem:[%s6396_s8 + $0x68] sm:$0xf] %vm2727_vm10, %v3101_v46 }
 0x671   : > { %3134 = vst.msk [vmem:[%s6396_s8 + $0x6c] sm:$0xf] %vm2727_vm10, %v3102_v29  ;;  %3135 = vst.msk [vmem:[%s6396_s8 + $0x70] sm:$0xf] %vm2727_vm10, %v3103_v27 }
 0x672   : > { %3136 = vst.msk [vmem:[%s6396_s8 + $0x74] sm:$0xf] %vm2727_vm10, %v3104_v48  ;;  %3137 = vst.msk [vmem:[%s6396_s8 + $0x78] sm:$0xf] %vm2727_vm10, %v3105_v58 }
 0x673   : > { %3138 = vst.msk [vmem:[%s6396_s8 + $0x7c] sm:$0xf] %vm2727_vm10, %v3106_v26 }
 0x674   : > { %3722 = shalt.err (!%p3719_p9)
}
 0x675   : > { %s3723_s19 = scalar_lea.hbm %s6478_s22, 2048  ;;  %s3727_s28 = scalar_lea.hbm %s6543_s7, 4096 }
 0x676   : > { %p3724_p10 = scmp.ne.s32.totalorder %s6478_s22, %s3723_s19  ;;  %p3728_p13 = scmp.lt.u32.totalorder %s6478_s22, %s6543_s7 }
 0x677   : > { %p3729_p0 = scmp.lt.u32.totalorder %s3727_s28, %s3723_s19  ;;  %p3731_p2 = scmp.lt.u32.totalorder %s3723_s19, %s6478_s22 }
 0x678   : > { %p3725_p11 = pnand %p3724_p10, %p3870_p5 }
 0x679   : > { %p3730_p1 = por %p3729_p0, %p3728_p13 }
 0x67a   : > { %p3726_p12 = pneg %p3725_p11 }
 0x67b   : > { %p3732_p3 = por %p3731_p2, %p3730_p1 }
 0x67d   : > { %p3733_p4 = pnand %p3732_p3, %p3726_p12 }
 0x67f   : > { %3736 = shalt.err (!%p3733_p4)
}
 0x680   : > { %3611 = dma.vmem_to_hbm [thread:$0]  (%p3870_p5), %s6480_s16, 2048, %s6478_s22, %s3145_s23, %s3780_s9, %s3780_s9, %s3790_s17  }
 0x681 PF: > { %p3621_p7 = scmp.ge.s32.totalorder %s3775_s27, 2  ;;  %s3191_s29 = sand.u32 1, %s3763_s24  }
 0x682   : > { %s3192_s14 = scalar_lea.sflag [#allocation3], %s3191_s29 }
 0x683   : > { %p3615_p8 = pnand %p3621_p7, %p3874_p6 }
 0x685   : > { %3754 = dma.done.wait (!%p3615_p8), %s3192_s14, 4096  }
 0x686   : > { %3756 = vsyncadd (!%p3615_p8), %s3192_s14, 4294963200  ;;  %s3201_s11 = scalar_lea.sflag [#allocation5], %s3191_s29 }
 0x687   : > { %3758 = dma.done.wait (!%p3615_p8), %s3201_s11, 2048  }
 0x688   : > { %3760 = vsyncadd (!%p3615_p8), %s3201_s11, 4294965248  ;;  %p21_p5 = scmp.ge.s32.totalorder %s3857_s30, 4   ;;  %s6603_s24 = smov %s3767_s25 }
 0x689   : > { %s6604_s25 = smov %s3771_s26  ;;  %s6605_s26 = smov %s3868_s10 }
 0x68a   : > { %s6606_s27 = smov %s3857_s30  ;;  %23 = sbr.rel (!%p21_p5) target bundleno = 5 (0x5), region = 96 }
 0x691   :  { %3206 = vsyncpa [#allocation3], 1 }
 0x692   :  { %3208 = vsyncpa [#allocation3 + $0x1], 1 }
 0x693   :  { %3209 = vsyncpa [#allocation5], 1 }
 0x694   :  { %3211 = vsyncpa [#allocation5 + $0x1], 1 }

</bundles_post_ra>
